<compile_context>
chip_gen: v7x
topology: tpu7x:2x2x1
jax: 0.10.0
libtpu: 0.0.40
codegen_flags: <defaults>
</compile_context>

<pallas_src>
import jax
import jax.numpy as jnp
from jax.experimental import pallas as pl
from jax.experimental.pallas import tpu as pltpu

EPS = 1e-6                 # ResnetBlock2D default eps
GROUPS = 32                # ResnetBlock2D default groups
COMPUTE_DTYPE = jnp.bfloat16


def _query_vmem_capacity():
    try:
        return int(pltpu.get_tpu_info().vmem_capacity_bytes)
    except Exception:
        return 64 * 1024 * 1024          # conservative fallback

_VMEM_CAP = _query_vmem_capacity()
_SMALL_VMEM = _VMEM_CAP <= 64 * 1024 * 1024            # v7x-class (64 MiB) vs v5e/v6e (128 MiB)
VMEM_LIMIT = (40 if _SMALL_VMEM else 100) * 1024 * 1024


def _compiler_params(sem):
    return pltpu.CompilerParams(dimension_semantics=sem, vmem_limit_bytes=VMEM_LIMIT)


def _pick_tile(dim, target, mult):
    """Largest divisor of `dim` that is <= target and a multiple of `mult`; else `dim`.
    TODO(synk): masked edge tiles for ragged dims instead of the whole-dim fallback."""
    if dim <= target:
        return dim
    best = 0
    d = mult
    while d <= target:
        if dim % d == 0:
            best = d
        d += mult
    return best if best > 0 else dim


# --------------------------------------------------------------------------
# GroupNorm (+ optional per-(sample,channel) add) + SiLU : two-pass, L-tiled
# --------------------------------------------------------------------------
def _make_gn_stats_kernel(eps, with_add, inv_count):
    def kernel(*refs):
        if with_add:
            x_ref, add_ref, p_ref, q_ref, o_ref = refs
        else:
            x_ref, p_ref, q_ref, o_ref = refs
        l = pl.program_id(1)

        @pl.when(l == 0)
        def _init():
            o_ref[...] = jnp.zeros_like(o_ref)

        x = x_ref[0].astype(jnp.float32)                         # (lt, C)
        if with_add:
            x = x + add_ref[0].astype(jnp.float32)               # (1, C) broadcast in-kernel
        s_new = o_ref[0, 0:1, :] + jnp.sum(x, axis=0, keepdims=True)
        ss_new = o_ref[0, 1:2, :] + jnp.sum(x * x, axis=0, keepdims=True)
        o_ref[0, 0:1, :] = s_new
        o_ref[0, 1:2, :] = ss_new

        @pl.when(l == pl.num_programs(1) - 1)
        def _finalize():
            # per-group pooling via factored one-hot (C,G)/(G,C) matrices (no dense (C,C))
            gsum = jnp.dot(s_new, p_ref[...], preferred_element_type=jnp.float32)   # (1, G)
            gsq = jnp.dot(ss_new, p_ref[...], preferred_element_type=jnp.float32)
            gmean = gsum * inv_count
            gvar = jnp.maximum(gsq * inv_count - gmean * gmean, 0.0)
            ginv = jax.lax.rsqrt(gvar + eps)
            o_ref[0, 0:1, :] = jnp.dot(gmean, q_ref[...], preferred_element_type=jnp.float32)
            o_ref[0, 1:2, :] = jnp.dot(ginv, q_ref[...], preferred_element_type=jnp.float32)
    return kernel


def _make_gn_apply_kernel(with_add, silu):
    def kernel(*refs):
        if with_add:
            x_ref, add_ref, st_ref, g_ref, b_ref, o_ref = refs
        else:
            x_ref, st_ref, g_ref, b_ref, o_ref = refs
        x = x_ref[0].astype(jnp.float32)                         # (lt, C)
        if with_add:
            x = x + add_ref[0].astype(jnp.float32)
        mean = st_ref[0, 0:1, :]                                 # (1, C)
        inv = st_ref[0, 1:2, :]
        y = (x - mean) * (inv * g_ref[...]) + b_ref[...]
        if silu:
            y = y * jax.nn.sigmoid(y)
        o_ref[0] = y.astype(o_ref.dtype)
    return kernel


def group_norm_silu(x, gamma, beta, *, eps=EPS, groups=GROUPS, add=None, silu=True, l_tile=None):
    """x: (N, H, W, C) channels-last.  add: (N, C) or None.  gamma/beta: (C,)."""
    N, H, W, C = x.shape
    assert C % groups == 0
    L = H * W
    lt = _pick_tile(L, l_tile or (1024 if _SMALL_VMEM else 2048), 8)
    LT = L // lt
    cpg = C // groups
    gidx = jnp.arange(C, dtype=jnp.int32) // cpg
    p_mat = (gidx[:, None] == jnp.arange(groups, dtype=jnp.int32)[None, :]).astype(jnp.float32)
    q_mat = p_mat.T                                              # (G, C)
    inv_count = 1.0 / float(cpg * L)

    xf = x.reshape(N, L, C)                                      # metadata-only reshape
    gam = gamma.reshape(1, C).astype(jnp.float32)
    bet = beta.reshape(1, C).astype(jnp.float32)
    addr = None if add is None else add.reshape(N, 1, C).astype(jnp.float32)

    # ---- pass 1: per-(sample,channel) mean / inv-std (broadcast from groups) ----
    stats_args = [xf]
    stats_specs = [pl.BlockSpec((1, lt, C), lambda n, l: (n, l, 0))]
    if add is not None:
        stats_args.append(addr)
        stats_specs.append(pl.BlockSpec((1, 1, C), lambda n, l: (n, 0, 0)))
    stats_args += [p_mat, q_mat]
    stats_specs += [pl.BlockSpec((C, groups), lambda n, l: (0, 0)),
                    pl.BlockSpec((groups, C), lambda n, l: (0, 0))]
    stats = pl.pallas_call(
        _make_gn_stats_kernel(eps, add is not None, inv_count),
        grid=(N, LT),
        in_specs=stats_specs,
        out_specs=pl.BlockSpec((1, 2, C), lambda n, l: (n, 0, 0)),
        out_shape=jax.ShapeDtypeStruct((N, 2, C), jnp.float32),
        compiler_params=_compiler_params(("parallel", "arbitrary")),
    )(*stats_args)

    # ---- pass 2: normalize (+add) (+SiLU), elementwise over L tiles ----
    apply_args = [xf]
    apply_specs = [pl.BlockSpec((1, lt, C), lambda n, l: (n, l, 0))]
    if add is not None:
        apply_args.append(addr)
        apply_specs.append(pl.BlockSpec((1, 1, C), lambda n, l: (n, 0, 0)))
    apply_args += [stats, gam, bet]
    apply_specs += [pl.BlockSpec((1, 2, C), lambda n, l: (n, 0, 0)),
                    pl.BlockSpec((1, C), lambda n, l: (0, 0)),
                    pl.BlockSpec((1, C), lambda n, l: (0, 0))]
    out = pl.pallas_call(
        _make_gn_apply_kernel(add is not None, silu),
        grid=(N, LT),
        in_specs=apply_specs,
        out_specs=pl.BlockSpec((1, lt, C), lambda n, l: (n, l, 0)),
        out_shape=jax.ShapeDtypeStruct((N, L, C), x.dtype),
        compiler_params=_compiler_params(("parallel", "parallel")),
    )(*apply_args)
    return out.reshape(N, H, W, C)


# --------------------------------------------------------------------------
# 3x3 conv (stride 1, padding 1): row-tiled, kx-fused K=3*Cin matmuls,
# bias + optional residual add fused in the epilogue.
# --------------------------------------------------------------------------
def _make_conv3x3_kernel(th, W, Cin, tn, with_res):
    def kernel(*refs):
        if with_res:
            x_ref, w_ref, b_ref, r_ref, o_ref = refs
        else:
            x_ref, w_ref, b_ref, o_ref = refs
        acc = jnp.zeros((th * W, tn), jnp.float32)
        # 3 matmuls with K = 3*Cin (fills the 256-deep MXU on v6e/v7x); the per-ky row
        # slice is reused for all three kx shifts.
        for ky in range(3):
            rows = x_ref[0, 0, pl.ds(ky, th), :, :]              # (th, W+2, Cin)
            win = jnp.concatenate([rows[:, kx:kx + W, :] for kx in range(3)],
                                  axis=-1)                        # (th, W, 3*Cin)
            acc = acc + jnp.dot(win.reshape(th * W, 3 * Cin), w_ref[ky],
                                preferred_element_type=jnp.float32)
        acc = acc + b_ref[...]                                   # (1, tn) bias
        if with_res:
            acc = acc + r_ref[0, 0].astype(jnp.float32)          # fused residual add
        o_ref[0, 0] = acc.astype(o_ref.dtype)
    return kernel


def conv2d_3x3(x, w, b, *, res=None, block_rows=None, target_tn=256):
    """x: (N, H, W, Cin) bf16 channels-last; w: (Cout, Cin, 3, 3) torch layout; b: (Cout,).
    res (optional): (N, H, W, Cout), added to the conv output in the kernel epilogue."""
    N, H, W, Cin = x.shape
    Cout = w.shape[0]
    tn = _pick_tile(Cout, target_tn, 128)
    row_target = max(1, (1024 if _SMALL_VMEM else 2048) // W)
    th = _pick_tile(H, block_rows or row_target, 1)
    R = H // th

    # Stage the padded input as non-overlapping halo'd row tiles so plain BlockSpec
    # pipelining can row-tile the conv.  TODO(synk): fold this staging (and the norm
    # output write) into the producing kernel to kill the extra HBM round trip.
    xp = jnp.pad(x, ((0, 0), (1, 1), (1, 1), (0, 0)))
    if R > 1:
        xs = jnp.stack([xp[:, r * th:r * th + th + 2] for r in range(R)], axis=1)
    else:
        xs = xp[:, None]                                         # (N, 1, H+2, W+2, Cin)

    wt = jnp.transpose(w, (2, 3, 1, 0)).reshape(3, 3 * Cin, Cout).astype(x.dtype)
    bias = b.reshape(1, Cout).astype(jnp.float32)

    args = [xs, wt, bias]
    in_specs = [pl.BlockSpec((1, 1, th + 2, W + 2, Cin), lambda j, n, r: (n, r, 0, 0, 0)),
                pl.BlockSpec((3, 3 * Cin, tn), lambda j, n, r: (0, 0, j)),
                pl.BlockSpec((1, tn), lambda j, n, r: (0, j))]
    if res is not None:
        args.append(res.reshape(N, R, th * W, Cout).astype(x.dtype))
        in_specs.append(pl.BlockSpec((1, 1, th * W, tn), lambda j, n, r: (n, r, 0, j)))

    # Cout tiles outermost: each weight tile is fetched once and reused across (N, R).
    out = pl.pallas_call(
        _make_conv3x3_kernel(th, W, Cin, tn, res is not None),
        grid=(Cout // tn, N, R),
        in_specs=in_specs,
        out_specs=pl.BlockSpec((1, 1, th * W, tn), lambda j, n, r: (n, r, 0, j)),
        out_shape=jax.ShapeDtypeStruct((N, R, th * W, Cout), x.dtype),
        compiler_params=_compiler_params(("parallel", "parallel", "parallel")),
    )(*args)
    return out.reshape(N, H, W, Cout)


# --------------------------------------------------------------------------
# Matmul + bias (+ optional SiLU on the input), full-K blocks (no k grid axis)
# --------------------------------------------------------------------------
def _make_matmul_kernel(silu_x):
    def kernel(x_ref, w_ref, b_ref, o_ref):
        x = x_ref[...]
        if silu_x:
            xf = x.astype(jnp.float32)
            x = (xf * jax.nn.sigmoid(xf)).astype(x.dtype)
        acc = jnp.dot(x, w_ref[...], preferred_element_type=jnp.float32)
        o_ref[...] = (acc + b_ref[...]).astype(o_ref.dtype)
    return kernel


def matmul_bias(x, w, b, *, silu_x=False, out_dtype=None):
    """(silu(x) if silu_x else x) @ w + b.  K (<=1280 in this module) is kept as one
    full block, so there is no degenerate k axis / accumulator scratch."""
    M, K = x.shape
    Nn = w.shape[1]
    out_dtype = out_dtype or x.dtype
    tm = _pick_tile(M, 256 if _SMALL_VMEM else 512, 8)
    tn = _pick_tile(Nn, 256, 128)
    return pl.pallas_call(
        _make_matmul_kernel(silu_x),
        grid=(M // tm, Nn // tn),
        in_specs=[pl.BlockSpec((tm, K), lambda i, j: (i, 0)),
                  pl.BlockSpec((K, tn), lambda i, j: (0, j)),
                  pl.BlockSpec((1, tn), lambda i, j: (0, j))],
        out_specs=pl.BlockSpec((tm, tn), lambda i, j: (i, j)),
        out_shape=jax.ShapeDtypeStruct((M, Nn), out_dtype),
        compiler_params=_compiler_params(("parallel", "parallel")),
    )(x, w.astype(x.dtype), b.reshape(1, Nn).astype(jnp.float32))


# --------------------------------------------------------------------------
# ResnetBlock2D forward
# --------------------------------------------------------------------------
def resnet_block_2d(x_nchw, temb, p, *, eps=EPS, groups=GROUPS, compute_dtype=COMPUTE_DTYPE,
                    conv_block_rows=None, gn_l_tile=None):
    """x_nchw: (N, C_in, H, W); temb: (N, temb_channels).  Returns (N, C_out, H, W)."""
    N, Cin, H, W = x_nchw.shape
    Cout = p['conv1_w'].shape[0]

    # single layout change at entry; everything below stays channels-last bf16
    x = jnp.transpose(x_nchw, (0, 2, 3, 1)).astype(compute_dtype)

    # norm1 + SiLU + conv1
    h = group_norm_silu(x, p['norm1_g'], p['norm1_b'], eps=eps, groups=groups,
                        silu=True, l_tile=gn_l_tile)
    h = conv2d_3x3(h, p['conv1_w'], p['conv1_b'], block_rows=conv_block_rows)

    # temb: SiLU -> Linear (SiLU fused into the matmul); added to hidden before norm2
    temb_p = matmul_bias(temb.astype(compute_dtype), p['temb_w'].T, p['temb_b'], silu_x=True)

    # norm2(conv1_out + temb) + SiLU    (Dropout(p=0.0) is the identity)
    h = group_norm_silu(h, p['norm2_g'], p['norm2_b'], eps=eps, groups=groups,
                        add=temb_p, silu=True, l_tile=gn_l_tile)

    # shortcut: 1x1 conv iff C_in != C_out, else identity
    if 'convs_w' in p:
        sc = matmul_bias(x.reshape(N * H * W, Cin),
                         p['convs_w'][:, :, 0, 0].T, p['convs_b']).reshape(N, H, W, Cout)
    else:
        sc = x

    # conv2 with the residual add fused into its epilogue
    out = conv2d_3x3(h, p['conv2_w'], p['conv2_b'], res=sc, block_rows=conv_block_rows)

    return jnp.transpose(out, (0, 3, 1, 2)).astype(x_nchw.dtype)


# --------------------------------------------------------------------------
# Deterministic synthetic parameters + pure-JAX reference
# --------------------------------------------------------------------------
def init_params(key, cin, cout, temb_ch):
    ks = jax.random.split(key, 12)

    def nrm(k, shape, scale=0.05):
        return scale * jax.random.normal(k, shape, dtype=jnp.float32)

    p = {
        'norm1_g': jnp.ones((cin,), jnp.float32) + nrm(ks[0], (cin,)),
        'norm1_b': nrm(ks[1], (cin,)),
        'conv1_w': nrm(ks[2], (cout, cin, 3, 3)),
        'conv1_b': nrm(ks[3], (cout,)),
        'temb_w': nrm(ks[4], (cout, temb_ch)),     # torch Linear weight layout (out, in)
        'temb_b': nrm(ks[5], (cout,)),
        'norm2_g': jnp.ones((cout,), jnp.float32) + nrm(ks[6], (cout,)),
        'norm2_b': nrm(ks[7], (cout,)),
        'conv2_w': nrm(ks[8], (cout, cout, 3, 3)),
        'conv2_b': nrm(ks[9], (cout,)),
    }
    if cin != cout:
        p['convs_w'] = nrm(ks[10], (cout, cin, 1, 1))
        p['convs_b'] = nrm(ks[11], (cout,))
    return p


def reference_resnet_block(x, temb, p, eps=EPS, groups=GROUPS):
    def gn(v, g, b):
        n, c, hh, ww = v.shape
        vg = v.reshape(n, groups, (c // groups) * hh * ww)
        m = vg.mean(-1, keepdims=True)
        var = vg.var(-1, keepdims=True)
        vn = ((vg - m) / jnp.sqrt(var + eps)).reshape(n, c, hh, ww)
        return vn * g[None, :, None, None] + b[None, :, None, None]

    def silu(v):
        return v * jax.nn.sigmoid(v)

    def conv(v, w, b):
        o = jax.lax.conv_general_dilated(v, w, (1, 1), 'SAME',
                                         dimension_numbers=('NCHW', 'OIHW', 'NCHW'))
        return o + b[None, :, None, None]

    h = conv(silu(gn(x, p['norm1_g'], p['norm1_b'])), p['conv1_w'], p['conv1_b'])
    t = silu(temb) @ p['temb_w'].T + p['temb_b']
    h = h + t[:, :, None, None]
    h = conv(silu(gn(h, p['norm2_g'], p['norm2_b'])), p['conv2_w'], p['conv2_b'])
    sc = conv(x, p['convs_w'], p['convs_b']) if 'convs_w' in p else x
    return sc + h


# --------------------------------------------------------------------------
if __name__ == "__main__":
    key = jax.random.PRNGKey(0)
    N, H, W, temb_ch = 2, 16, 16, 64
    fwd = jax.jit(resnet_block_2d, static_argnames=("conv_block_rows", "gn_l_tile"))

    # config 1: in==out (identity shortcut), small explicit tiles to exercise the
    #           row-tiled conv (R=2) and L-tiled GN (LT=4) code paths;
    # config 2: in!=out (1x1 conv shortcut), auto (untiled-at-this-size) paths.
    configs = [
        (128, 128, 8, 64),
        (64, 128, None, None),
    ]
    for cin, cout, cbr, glt in configs:
        key, kx, kt, kp = jax.random.split(key, 4)
        x = jax.random.normal(kx, (N, cin, H, W), dtype=jnp.float32)
        temb = jax.random.normal(kt, (N, temb_ch), dtype=jnp.float32)
        params = init_params(kp, cin, cout, temb_ch)

        out = jax.block_until_ready(fwd(x, temb, params, conv_block_rows=cbr, gn_l_tile=glt))
        assert out.shape == (N, cout, H, W)
        assert not bool(jnp.isnan(out).any())

        ref = reference_resnet_block(x, temb, params)
        err = float(jnp.max(jnp.abs(out - ref)))
        scale = float(jnp.max(jnp.abs(ref)))
        assert err <= 0.1 * scale + 0.1, (err, scale)   # loose bound: bf16 internals vs f32 ref

    print("KERNEL_OK")
</pallas_src>

<mosaic_0001>
module attributes {stable_mosaic.version = 11 : i64} {
  func.func @kernel(%arg0: i32, %arg1: i32, %arg2: memref<1x64x128xbf16, #tpu.memory_space<vmem>>, %arg3: memref<1x2x128xf32, #tpu.memory_space<vmem>>, %arg4: memref<1x128xf32, #tpu.memory_space<vmem>>, %arg5: memref<1x128xf32, #tpu.memory_space<vmem>>, %arg6: memref<1x64x128xbf16, #tpu.memory_space<vmem>>) attributes {dimension_semantics = [#tpu.dimension_semantics<parallel>, #tpu.dimension_semantics<parallel>], iteration_bounds = array<i64: 2, 4>, scalar_prefetch = 0 : i64, scratch_operands = 0 : i64, tpu.core_type = #tpu.core_type<tc>, window_params = [{transform_indices = @transform_0, window_bounds = array<i64: 1, 64, 128>}, {transform_indices = @transform_1, window_bounds = array<i64: 1, 2, 128>}, {pipeline_mode = #tpu.pipeline_mode<synchronous>, transform_indices = @transform_2, window_bounds = array<i64: 1, 128>}, {pipeline_mode = #tpu.pipeline_mode<synchronous>, transform_indices = @transform_3, window_bounds = array<i64: 1, 128>}, {transform_indices = @transform_4, window_bounds = array<i64: 1, 64, 128>}]} {
    %c0 = arith.constant 0 : index
    %c0_0 = arith.constant 0 : index
    %c0_1 = arith.constant 0 : index
    %0 = vector.load %arg2[%c0, %c0_0, %c0_1] : memref<1x64x128xbf16, #tpu.memory_space<vmem>>, vector<1x64x128xbf16>
    %1 = vector.shape_cast %0 : vector<1x64x128xbf16> to vector<64x128xbf16>
    %2 = arith.extf %1 : vector<64x128xbf16> to vector<64x128xf32>
    %c0_2 = arith.constant 0 : index
    %c0_3 = arith.constant 0 : index
    %c0_4 = arith.constant 0 : index
    %3 = vector.load %arg3[%c0_2, %c0_3, %c0_4] : memref<1x2x128xf32, #tpu.memory_space<vmem>>, vector<1x1x128xf32>
    %4 = vector.shape_cast %3 : vector<1x1x128xf32> to vector<1x128xf32>
    %c0_5 = arith.constant 0 : index
    %c1 = arith.constant 1 : index
    %c0_6 = arith.constant 0 : index
    %5 = vector.load %arg3[%c0_5, %c1, %c0_6] : memref<1x2x128xf32, #tpu.memory_space<vmem>>, vector<1x1x128xf32>
    %6 = vector.shape_cast %5 : vector<1x1x128xf32> to vector<1x128xf32>
    %7 = vector.broadcast %4 : vector<1x128xf32> to vector<64x128xf32>
    %8 = arith.subf %2, %7 : vector<64x128xf32>
    %c0_7 = arith.constant 0 : index
    %c0_8 = arith.constant 0 : index
    %9 = vector.load %arg4[%c0_7, %c0_8] : memref<1x128xf32, #tpu.memory_space<vmem>>, vector<1x128xf32>
    %10 = arith.mulf %6, %9 : vector<1x128xf32>
    %11 = vector.broadcast %10 : vector<1x128xf32> to vector<64x128xf32>
    %12 = arith.mulf %8, %11 : vector<64x128xf32>
    %c0_9 = arith.constant 0 : index
    %c0_10 = arith.constant 0 : index
    %13 = vector.load %arg5[%c0_9, %c0_10] : memref<1x128xf32, #tpu.memory_space<vmem>>, vector<1x128xf32>
    %14 = vector.broadcast %13 : vector<1x128xf32> to vector<64x128xf32>
    %15 = arith.addf %12, %14 : vector<64x128xf32>
    %16 = arith.negf %15 : vector<64x128xf32>
    %17 = math.exp %16 : vector<64x128xf32>
    %cst = arith.constant 1.000000e+00 : f32
    %18 = vector.broadcast %cst : f32 to vector<64x128xf32>
    %19 = arith.addf %18, %17 : vector<64x128xf32>
    %20 = arith.divf %18, %19 : vector<64x128xf32>
    %21 = arith.mulf %15, %20 : vector<64x128xf32>
    %22 = arith.truncf %21 : vector<64x128xf32> to vector<64x128xbf16>
    %c0_11 = arith.constant 0 : index
    %c0_12 = arith.constant 0 : index
    %c0_13 = arith.constant 0 : index
    %23 = vector.load %arg6[%c0_11, %c0_12, %c0_13] : memref<1x64x128xbf16, #tpu.memory_space<vmem>>, vector<1x64x128xbf16>
    %24 = vector.shape_cast %23 : vector<1x64x128xbf16> to vector<64x128xbf16>
    %25 = vector.shape_cast %22 : vector<64x128xbf16> to vector<1x64x128xbf16>
    tpu.vector_store %arg6[%c0_11, %c0_12, %c0_13], %25 {strides = array<i32>} : memref<1x64x128xbf16, #tpu.memory_space<vmem>>, vector<1x64x128xbf16>,
    return
  }
  func.func @transform_0(%arg0: i32, %arg1: i32) -> (i32, i32, i32) {
    %c0_i32 = arith.constant 0 : i32
    %c0_i32_0 = arith.constant 0 : i32
    return %arg0, %arg1, %c0_i32 : i32, i32, i32
  }
  func.func @transform_1(%arg0: i32, %arg1: i32) -> (i32, i32, i32) {
    %c0_i32 = arith.constant 0 : i32
    %c0_i32_0 = arith.constant 0 : i32
    %c0_i32_1 = arith.constant 0 : i32
    return %arg0, %c0_i32, %c0_i32_0 : i32, i32, i32
  }
  func.func @transform_2(%arg0: i32, %arg1: i32) -> (i32, i32) {
    %c0_i32 = arith.constant 0 : i32
    %c0_i32_0 = arith.constant 0 : i32
    %c0_i32_1 = arith.constant 0 : i32
    return %c0_i32, %c0_i32_0 : i32, i32
  }
  func.func @transform_3(%arg0: i32, %arg1: i32) -> (i32, i32) {
    %c0_i32 = arith.constant 0 : i32
    %c0_i32_0 = arith.constant 0 : i32
    %c0_i32_1 = arith.constant 0 : i32
    return %c0_i32, %c0_i32_0 : i32, i32
  }
  func.func @transform_4(%arg0: i32, %arg1: i32) -> (i32, i32, i32) {
    %c0_i32 = arith.constant 0 : i32
    %c0_i32_0 = arith.constant 0 : i32
    return %arg0, %arg1, %c0_i32 : i32, i32, i32
  }
}

module attributes {stable_mosaic.version = 11 : i64} {
  func.func @kernel(%arg0: i32, %arg1: i32, %arg2: memref<1x64x128xbf16, #tpu.memory_space<vmem>>, %arg3: memref<128x32xf32, #tpu.memory_space<vmem>>, %arg4: memref<32x128xf32, #tpu.memory_space<vmem>>, %arg5: memref<1x2x128xf32, #tpu.memory_space<vmem>>) attributes {dimension_semantics = [#tpu.dimension_semantics<parallel>, #tpu.dimension_semantics<arbitrary>], iteration_bounds = array<i64: 2, 4>, scalar_prefetch = 0 : i64, scratch_operands = 0 : i64, tpu.core_type = #tpu.core_type<tc>, window_params = [{transform_indices = @transform_0, window_bounds = array<i64: 1, 64, 128>}, {pipeline_mode = #tpu.pipeline_mode<synchronous>, transform_indices = @transform_1, window_bounds = array<i64: 128, 32>}, {pipeline_mode = #tpu.pipeline_mode<synchronous>, transform_indices = @transform_2, window_bounds = array<i64: 32, 128>}, {transform_indices = @transform_3, window_bounds = array<i64: 1, 2, 128>}]} {
    %c0_i32 = arith.constant 0 : i32
    %0 = arith.cmpi eq, %arg1, %c0_i32 : i32
    %1 = arith.extui %0 : i1 to i32
    %c0_i32_0 = arith.constant 0 : i32
    %2 = arith.cmpi ne, %1, %c0_i32_0 : i32
    scf.if %2 {
      %cst_16 = arith.constant 0.000000e+00 : f32
      %26 = vector.broadcast %cst_16 : f32 to vector<1x2x128xf32>
      %c0_17 = arith.constant 0 : index
      %c0_18 = arith.constant 0 : index
      %c0_19 = arith.constant 0 : index
      %27 = vector.load %arg5[%c0_17, %c0_18, %c0_19] : memref<1x2x128xf32, #tpu.memory_space<vmem>>, vector<1x2x128xf32>
      tpu.vector_store %arg5[%c0_17, %c0_18, %c0_19], %26 {strides = array<i32>} : memref<1x2x128xf32, #tpu.memory_space<vmem>>, vector<1x2x128xf32>,
    } else {
    }
    %c0 = arith.constant 0 : index
    %c0_1 = arith.constant 0 : index
    %c0_2 = arith.constant 0 : index
    %3 = vector.load %arg2[%c0, %c0_1, %c0_2] : memref<1x64x128xbf16, #tpu.memory_space<vmem>>, vector<1x64x128xbf16>
    %4 = vector.shape_cast %3 : vector<1x64x128xbf16> to vector<64x128xbf16>
    %5 = arith.extf %4 : vector<64x128xbf16> to vector<64x128xf32>
    %c0_3 = arith.constant 0 : index
    %c0_4 = arith.constant 0 : index
    %c0_5 = arith.constant 0 : index
    %6 = vector.load %arg5[%c0_3, %c0_4, %c0_5] : memref<1x2x128xf32, #tpu.memory_space<vmem>>, vector<1x1x128xf32>
    %7 = vector.shape_cast %6 : vector<1x1x128xf32> to vector<1x128xf32>
    %cst = arith.constant dense<0.000000e+00> : vector<128xf32>
    %8 = vector.multi_reduction <add>, %5, %cst [0] : vector<64x128xf32> to vector<128xf32>
    %9 = vector.shape_cast %8 : vector<128xf32> to vector<1x128xf32>
    %10 = arith.addf %7, %9 : vector<1x128xf32>
    %c0_6 = arith.constant 0 : index
    %c1 = arith.constant 1 : index
    %c0_7 = arith.constant 0 : index
    %11 = vector.load %arg5[%c0_6, %c1, %c0_7] : memref<1x2x128xf32, #tpu.memory_space<vmem>>, vector<1x1x128xf32>
    %12 = vector.shape_cast %11 : vector<1x1x128xf32> to vector<1x128xf32>
    %13 = arith.mulf %5, %5 : vector<64x128xf32>
    %cst_8 = arith.constant dense<0.000000e+00> : vector<128xf32>
    %14 = vector.multi_reduction <add>, %13, %cst_8 [0] : vector<64x128xf32> to vector<128xf32>
    %15 = vector.shape_cast %14 : vector<128xf32> to vector<1x128xf32>
    %16 = arith.addf %12, %15 : vector<1x128xf32>
    %c0_9 = arith.constant 0 : index
    %c0_10 = arith.constant 0 : index
    %c0_11 = arith.constant 0 : index
    %17 = vector.load %arg5[%c0_9, %c0_10, %c0_11] : memref<1x2x128xf32, #tpu.memory_space<vmem>>, vector<1x1x128xf32>
    %18 = vector.shape_cast %17 : vector<1x1x128xf32> to vector<1x128xf32>
    %19 = vector.shape_cast %10 : vector<1x128xf32> to vector<1x1x128xf32>
    tpu.vector_store %arg5[%c0_9, %c0_10, %c0_11], %19 {strides = array<i32>} : memref<1x2x128xf32, #tpu.memory_space<vmem>>, vector<1x1x128xf32>,
    %c0_12 = arith.constant 0 : index
    %c1_13 = arith.constant 1 : index
    %c0_14 = arith.constant 0 : index
    %20 = vector.load %arg5[%c0_12, %c1_13, %c0_14] : memref<1x2x128xf32, #tpu.memory_space<vmem>>, vector<1x1x128xf32>
    %21 = vector.shape_cast %20 : vector<1x1x128xf32> to vector<1x128xf32>
    %22 = vector.shape_cast %16 : vector<1x128xf32> to vector<1x1x128xf32>
    tpu.vector_store %arg5[%c0_12, %c1_13, %c0_14], %22 {strides = array<i32>} : memref<1x2x128xf32, #tpu.memory_space<vmem>>, vector<1x1x128xf32>,
    %c3_i32 = arith.constant 3 : i32
    %23 = arith.cmpi eq, %arg1, %c3_i32 : i32
    %24 = arith.extui %23 : i1 to i32
    %c0_i32_15 = arith.constant 0 : i32
    %25 = arith.cmpi ne, %24, %c0_i32_15 : i32
    scf.if %25 {
      %c0_16 = arith.constant 0 : index
      %c0_17 = arith.constant 0 : index
      %26 = vector.load %arg3[%c0_16, %c0_17] : memref<128x32xf32, #tpu.memory_space<vmem>>, vector<128x32xf32>
      %cst_18 = arith.constant dense<0.000000e+00> : vector<1x32xf32>
      %27 = tpu.matmul %10, %26, %cst_18 {dimension_numbers = #tpu.dot_dimension_numbers<[1], [0], [0], [1], [0, 0, 1, 1], [], []>} : vector<1x128xf32>, vector<128x32xf32>, vector<1x32xf32> -> vector<1x32xf32>
      %c0_19 = arith.constant 0 : index
      %c0_20 = arith.constant 0 : index
      %28 = vector.load %arg3[%c0_19, %c0_20] : memref<128x32xf32, #tpu.memory_space<vmem>>, vector<128x32xf32>
      %cst_21 = arith.constant dense<0.000000e+00> : vector<1x32xf32>
      %29 = tpu.matmul %16, %28, %cst_21 {dimension_numbers = #tpu.dot_dimension_numbers<[1], [0], [0], [1], [0, 0, 1, 1], [], []>} : vector<1x128xf32>, vector<128x32xf32>, vector<1x32xf32> -> vector<1x32xf32>
      %cst_22 = arith.constant 9.765625E-4 : f32
      %30 = vector.broadcast %cst_22 : f32 to vector<1x32xf32>
      %31 = arith.mulf %27, %30 : vector<1x32xf32>
      %cst_23 = arith.constant 9.765625E-4 : f32
      %32 = vector.broadcast %cst_23 : f32 to vector<1x32xf32>
      %33 = arith.mulf %29, %32 : vector<1x32xf32>
      %34 = arith.mulf %31, %31 : vector<1x32xf32>
      %35 = arith.subf %33, %34 : vector<1x32xf32>
      %cst_24 = arith.constant 0.000000e+00 : f32
      %36 = vector.broadcast %cst_24 : f32 to vector<1x32xf32>
      %37 = arith.maximumf %35, %36 : vector<1x32xf32>
      %cst_25 = arith.constant 9.99999997E-7 : f32
      %38 = vector.broadcast %cst_25 : f32 to vector<1x32xf32>
      %39 = arith.addf %37, %38 : vector<1x32xf32>
      %40 = math.rsqrt %39 : vector<1x32xf32>
      %c0_26 = arith.constant 0 : index
      %c0_27 = arith.constant 0 : index
      %41 = vector.load %arg4[%c0_26, %c0_27] : memref<32x128xf32, #tpu.memory_space<vmem>>, vector<32x128xf32>
      %cst_28 = arith.constant dense<0.000000e+00> : vector<1x128xf32>
      %42 = tpu.matmul %31, %41, %cst_28 {dimension_numbers = #tpu.dot_dimension_numbers<[1], [0], [0], [1], [0, 0, 1, 1], [], []>} : vector<1x32xf32>, vector<32x128xf32>, vector<1x128xf32> -> vector<1x128xf32>
      %c0_29 = arith.constant 0 : index
      %c0_30 = arith.constant 0 : index
      %c0_31 = arith.constant 0 : index
      %43 = vector.load %arg5[%c0_29, %c0_30, %c0_31] : memref<1x2x128xf32, #tpu.memory_space<vmem>>, vector<1x1x128xf32>
      %44 = vector.shape_cast %43 : vector<1x1x128xf32> to vector<1x128xf32>
      %45 = vector.shape_cast %42 : vector<1x128xf32> to vector<1x1x128xf32>
      tpu.vector_store %arg5[%c0_29, %c0_30, %c0_31], %45 {strides = array<i32>} : memref<1x2x128xf32, #tpu.memory_space<vmem>>, vector<1x1x128xf32>,
      %c0_32 = arith.constant 0 : index
      %c0_33 = arith.constant 0 : index
      %46 = vector.load %arg4[%c0_32, %c0_33] : memref<32x128xf32, #tpu.memory_space<vmem>>, vector<32x128xf32>
      %cst_34 = arith.constant dense<0.000000e+00> : vector<1x128xf32>
      %47 = tpu.matmul %40, %46, %cst_34 {dimension_numbers = #tpu.dot_dimension_numbers<[1], [0], [0], [1], [0, 0, 1, 1], [], []>} : vector<1x32xf32>, vector<32x128xf32>, vector<1x128xf32> -> vector<1x128xf32>
      %c0_35 = arith.constant 0 : index
      %c1_36 = arith.constant 1 : index
      %c0_37 = arith.constant 0 : index
      %48 = vector.load %arg5[%c0_35, %c1_36, %c0_37] : memref<1x2x128xf32, #tpu.memory_space<vmem>>, vector<1x1x128xf32>
      %49 = vector.shape_cast %48 : vector<1x1x128xf32> to vector<1x128xf32>
      %50 = vector.shape_cast %47 : vector<1x128xf32> to vector<1x1x128xf32>
      tpu.vector_store %arg5[%c0_35, %c1_36, %c0_37], %50 {strides = array<i32>} : memref<1x2x128xf32, #tpu.memory_space<vmem>>, vector<1x1x128xf32>,
    } else {
    }
    return
  }
  func.func @transform_0(%arg0: i32, %arg1: i32) -> (i32, i32, i32) {
    %c0_i32 = arith.constant 0 : i32
    %c0_i32_0 = arith.constant 0 : i32
    return %arg0, %arg1, %c0_i32 : i32, i32, i32
  }
  func.func @transform_1(%arg0: i32, %arg1: i32) -> (i32, i32) {
    %c0_i32 = arith.constant 0 : i32
    %c0_i32_0 = arith.constant 0 : i32
    %c0_i32_1 = arith.constant 0 : i32
    return %c0_i32, %c0_i32_0 : i32, i32
  }
  func.func @transform_2(%arg0: i32, %arg1: i32) -> (i32, i32) {
    %c0_i32 = arith.constant 0 : i32
    %c0_i32_0 = arith.constant 0 : i32
    %c0_i32_1 = arith.constant 0 : i32
    return %c0_i32, %c0_i32_0 : i32, i32
  }
  func.func @transform_3(%arg0: i32, %arg1: i32) -> (i32, i32, i32) {
    %c0_i32 = arith.constant 0 : i32
    %c0_i32_0 = arith.constant 0 : i32
    %c0_i32_1 = arith.constant 0 : i32
    return %arg0, %c0_i32, %c0_i32_0 : i32, i32, i32
  }
}

module attributes {stable_mosaic.version = 11 : i64} {
  func.func @kernel(%arg0: i32, %arg1: i32, %arg2: i32, %arg3: memref<1x1x10x18x128xbf16, #tpu.memory_space<vmem>>, %arg4: memref<3x384x128xbf16, #tpu.memory_space<vmem>>, %arg5: memref<1x128xf32, #tpu.memory_space<vmem>>, %arg6: memref<1x1x128x128xbf16, #tpu.memory_space<vmem>>) attributes {dimension_semantics = [#tpu.dimension_semantics<parallel>, #tpu.dimension_semantics<parallel>, #tpu.dimension_semantics<parallel>], iteration_bounds = array<i64: 1, 2, 2>, scalar_prefetch = 0 : i64, scratch_operands = 0 : i64, tpu.core_type = #tpu.core_type<tc>, window_params = [{transform_indices = @transform_0, window_bounds = array<i64: 1, 1, 10, 18, 128>}, {transform_indices = @transform_1, window_bounds = array<i64: 3, 384, 128>}, {transform_indices = @transform_2, window_bounds = array<i64: 1, 128>}, {transform_indices = @transform_3, window_bounds = array<i64: 1, 1, 128, 128>}]} {
    %cst = arith.constant 0.000000e+00 : f32
    %0 = vector.broadcast %cst : f32 to vector<128x128xf32>
    %c0 = arith.constant 0 : index
    %c0_0 = arith.constant 0 : index
    %c0_1 = arith.constant 0 : index
    %c0_2 = arith.constant 0 : index
    %c0_3 = arith.constant 0 : index
    %1 = vector.load %arg3[%c0, %c0_0, %c0_1, %c0_2, %c0_3] : memref<1x1x10x18x128xbf16, #tpu.memory_space<vmem>>, vector<1x1x8x18x128xbf16>
    %2 = vector.shape_cast %1 : vector<1x1x8x18x128xbf16> to vector<8x18x128xbf16>
    %3 = vector.extract_strided_slice %2 {offsets = [0, 0, 0], sizes = [8, 16, 128], strides = [1, 1, 1]} : vector<8x18x128xbf16> to vector<8x16x128xbf16>
    %4 = vector.extract_strided_slice %2 {offsets = [0, 1, 0], sizes = [8, 16, 128], strides = [1, 1, 1]} : vector<8x18x128xbf16> to vector<8x16x128xbf16>
    %5 = vector.extract_strided_slice %2 {offsets = [0, 2, 0], sizes = [8, 16, 128], strides = [1, 1, 1]} : vector<8x18x128xbf16> to vector<8x16x128xbf16>
    %6 = tpu.concatenate %3, %4, %5 in 2 : vector<8x16x128xbf16>, vector<8x16x128xbf16>, vector<8x16x128xbf16> -> vector<8x16x384xbf16>
    %7 = vector.shape_cast %6 : vector<8x16x384xbf16> to vector<128x384xbf16>
    %c0_4 = arith.constant 0 : index
    %c0_5 = arith.constant 0 : index
    %c0_6 = arith.constant 0 : index
    %8 = vector.load %arg4[%c0_4, %c0_5, %c0_6] : memref<3x384x128xbf16, #tpu.memory_space<vmem>>, vector<1x384x128xbf16>
    %9 = vector.shape_cast %8 : vector<1x384x128xbf16> to vector<384x128xbf16>
    %cst_7 = arith.constant dense<0.000000e+00> : vector<128x128xf32>
    %10 = tpu.matmul %7, %9, %cst_7 {dimension_numbers = #tpu.dot_dimension_numbers<[1], [0], [0], [1], [0, 0, 1, 1], [], []>} : vector<128x384xbf16>, vector<384x128xbf16>, vector<128x128xf32> -> vector<128x128xf32>
    %11 = arith.addf %0, %10 : vector<128x128xf32>
    %c0_8 = arith.constant 0 : index
    %c0_9 = arith.constant 0 : index
    %c1 = arith.constant 1 : index
    %c0_10 = arith.constant 0 : index
    %c0_11 = arith.constant 0 : index
    %12 = vector.load %arg3[%c0_8, %c0_9, %c1, %c0_10, %c0_11] : memref<1x1x10x18x128xbf16, #tpu.memory_space<vmem>>, vector<1x1x8x18x128xbf16>
    %13 = vector.shape_cast %12 : vector<1x1x8x18x128xbf16> to vector<8x18x128xbf16>
    %14 = vector.extract_strided_slice %13 {offsets = [0, 0, 0], sizes = [8, 16, 128], strides = [1, 1, 1]} : vector<8x18x128xbf16> to vector<8x16x128xbf16>
    %15 = vector.extract_strided_slice %13 {offsets = [0, 1, 0], sizes = [8, 16, 128], strides = [1, 1, 1]} : vector<8x18x128xbf16> to vector<8x16x128xbf16>
    %16 = vector.extract_strided_slice %13 {offsets = [0, 2, 0], sizes = [8, 16, 128], strides = [1, 1, 1]} : vector<8x18x128xbf16> to vector<8x16x128xbf16>
    %17 = tpu.concatenate %14, %15, %16 in 2 : vector<8x16x128xbf16>, vector<8x16x128xbf16>, vector<8x16x128xbf16> -> vector<8x16x384xbf16>
    %18 = vector.shape_cast %17 : vector<8x16x384xbf16> to vector<128x384xbf16>
    %c1_12 = arith.constant 1 : index
    %c0_13 = arith.constant 0 : index
    %c0_14 = arith.constant 0 : index
    %19 = vector.load %arg4[%c1_12, %c0_13, %c0_14] : memref<3x384x128xbf16, #tpu.memory_space<vmem>>, vector<1x384x128xbf16>
    %20 = vector.shape_cast %19 : vector<1x384x128xbf16> to vector<384x128xbf16>
    %cst_15 = arith.constant dense<0.000000e+00> : vector<128x128xf32>
    %21 = tpu.matmul %18, %20, %cst_15 {dimension_numbers = #tpu.dot_dimension_numbers<[1], [0], [0], [1], [0, 0, 1, 1], [], []>} : vector<128x384xbf16>, vector<384x128xbf16>, vector<128x128xf32> -> vector<128x128xf32>
    %22 = arith.addf %11, %21 : vector<128x128xf32>
    %c0_16 = arith.constant 0 : index
    %c0_17 = arith.constant 0 : index
    %c2 = arith.constant 2 : index
    %c0_18 = arith.constant 0 : index
    %c0_19 = arith.constant 0 : index
    %23 = vector.load %arg3[%c0_16, %c0_17, %c2, %c0_18, %c0_19] : memref<1x1x10x18x128xbf16, #tpu.memory_space<vmem>>, vector<1x1x8x18x128xbf16>
    %24 = vector.shape_cast %23 : vector<1x1x8x18x128xbf16> to vector<8x18x128xbf16>
    %25 = vector.extract_strided_slice %24 {offsets = [0, 0, 0], sizes = [8, 16, 128], strides = [1, 1, 1]} : vector<8x18x128xbf16> to vector<8x16x128xbf16>
    %26 = vector.extract_strided_slice %24 {offsets = [0, 1, 0], sizes = [8, 16, 128], strides = [1, 1, 1]} : vector<8x18x128xbf16> to vector<8x16x128xbf16>
    %27 = vector.extract_strided_slice %24 {offsets = [0, 2, 0], sizes = [8, 16, 128], strides = [1, 1, 1]} : vector<8x18x128xbf16> to vector<8x16x128xbf16>
    %28 = tpu.concatenate %25, %26, %27 in 2 : vector<8x16x128xbf16>, vector<8x16x128xbf16>, vector<8x16x128xbf16> -> vector<8x16x384xbf16>
    %29 = vector.shape_cast %28 : vector<8x16x384xbf16> to vector<128x384xbf16>
    %c2_20 = arith.constant 2 : index
    %c0_21 = arith.constant 0 : index
    %c0_22 = arith.constant 0 : index
    %30 = vector.load %arg4[%c2_20, %c0_21, %c0_22] : memref<3x384x128xbf16, #tpu.memory_space<vmem>>, vector<1x384x128xbf16>
    %31 = vector.shape_cast %30 : vector<1x384x128xbf16> to vector<384x128xbf16>
    %cst_23 = arith.constant dense<0.000000e+00> : vector<128x128xf32>
    %32 = tpu.matmul %29, %31, %cst_23 {dimension_numbers = #tpu.dot_dimension_numbers<[1], [0], [0], [1], [0, 0, 1, 1], [], []>} : vector<128x384xbf16>, vector<384x128xbf16>, vector<128x128xf32> -> vector<128x128xf32>
    %33 = arith.addf %22, %32 : vector<128x128xf32>
    %c0_24 = arith.constant 0 : index
    %c0_25 = arith.constant 0 : index
    %34 = vector.load %arg5[%c0_24, %c0_25] : memref<1x128xf32, #tpu.memory_space<vmem>>, vector<1x128xf32>
    %35 = vector.broadcast %34 : vector<1x128xf32> to vector<128x128xf32>
    %36 = arith.addf %33, %35 : vector<128x128xf32>
    %37 = arith.truncf %36 : vector<128x128xf32> to vector<128x128xbf16>
    %c0_26 = arith.constant 0 : index
    %c0_27 = arith.constant 0 : index
    %c0_28 = arith.constant 0 : index
    %c0_29 = arith.constant 0 : index
    %38 = vector.load %arg6[%c0_26, %c0_27, %c0_28, %c0_29] : memref<1x1x128x128xbf16, #tpu.memory_space<vmem>>, vector<1x1x128x128xbf16>
    %39 = vector.shape_cast %38 : vector<1x1x128x128xbf16> to vector<128x128xbf16>
    %40 = vector.shape_cast %37 : vector<128x128xbf16> to vector<1x1x128x128xbf16>
    tpu.vector_store %arg6[%c0_26, %c0_27, %c0_28, %c0_29], %40 {strides = array<i32>} : memref<1x1x128x128xbf16, #tpu.memory_space<vmem>>, vector<1x1x128x128xbf16>,
    return
  }
  func.func @transform_0(%arg0: i32, %arg1: i32, %arg2: i32) -> (i32, i32, i32, i32, i32) {
    %c0_i32 = arith.constant 0 : i32
    %c0_i32_0 = arith.constant 0 : i32
    %c0_i32_1 = arith.constant 0 : i32
    %c0_i32_2 = arith.constant 0 : i32
    return %arg1, %arg2, %c0_i32, %c0_i32_0, %c0_i32_1 : i32, i32, i32, i32, i32
  }
  func.func @transform_1(%arg0: i32, %arg1: i32, %arg2: i32) -> (i32, i32, i32) {
    %c0_i32 = arith.constant 0 : i32
    %c0_i32_0 = arith.constant 0 : i32
    %c0_i32_1 = arith.constant 0 : i32
    return %c0_i32, %c0_i32_0, %arg0 : i32, i32, i32
  }
  func.func @transform_2(%arg0: i32, %arg1: i32, %arg2: i32) -> (i32, i32) {
    %c0_i32 = arith.constant 0 : i32
    %c0_i32_0 = arith.constant 0 : i32
    return %c0_i32, %arg0 : i32, i32
  }
  func.func @transform_3(%arg0: i32, %arg1: i32, %arg2: i32) -> (i32, i32, i32, i32) {
    %c0_i32 = arith.constant 0 : i32
    %c0_i32_0 = arith.constant 0 : i32
    return %arg1, %arg2, %c0_i32, %arg0 : i32, i32, i32, i32
  }
}

module attributes {stable_mosaic.version = 11 : i64} {
  func.func @kernel(%arg0: i32, %arg1: i32, %arg2: memref<2x64xbf16, #tpu.memory_space<vmem>>, %arg3: memref<64x128xbf16, #tpu.memory_space<vmem>>, %arg4: memref<1x128xf32, #tpu.memory_space<vmem>>, %arg5: memref<2x128xbf16, #tpu.memory_space<vmem>>) attributes {dimension_semantics = [#tpu.dimension_semantics<parallel>, #tpu.dimension_semantics<parallel>], iteration_bounds = array<i64: 1, 1>, scalar_prefetch = 0 : i64, scratch_operands = 0 : i64, tpu.core_type = #tpu.core_type<tc>, window_params = [{transform_indices = @transform_0, window_bounds = array<i64: 2, 64>}, {transform_indices = @transform_1, window_bounds = array<i64: 64, 128>}, {transform_indices = @transform_2, window_bounds = array<i64: 1, 128>}, {transform_indices = @transform_3, window_bounds = array<i64: 2, 128>}]} {
    %c0 = arith.constant 0 : index
    %c0_0 = arith.constant 0 : index
    %0 = vector.load %arg2[%c0, %c0_0] : memref<2x64xbf16, #tpu.memory_space<vmem>>, vector<2x64xbf16>
    %1 = arith.extf %0 : vector<2x64xbf16> to vector<2x64xf32>
    %2 = arith.negf %1 : vector<2x64xf32>
    %3 = math.exp %2 : vector<2x64xf32>
    %cst = arith.constant 1.000000e+00 : f32
    %4 = vector.broadcast %cst : f32 to vector<2x64xf32>
    %5 = arith.addf %4, %3 : vector<2x64xf32>
    %6 = arith.divf %4, %5 : vector<2x64xf32>
    %7 = arith.mulf %1, %6 : vector<2x64xf32>
    %8 = arith.truncf %7 : vector<2x64xf32> to vector<2x64xbf16>
    %c0_1 = arith.constant 0 : index
    %c0_2 = arith.constant 0 : index
    %9 = vector.load %arg3[%c0_1, %c0_2] : memref<64x128xbf16, #tpu.memory_space<vmem>>, vector<64x128xbf16>
    %cst_3 = arith.constant dense<0.000000e+00> : vector<2x128xf32>
    %10 = tpu.matmul %8, %9, %cst_3 {dimension_numbers = #tpu.dot_dimension_numbers<[1], [0], [0], [1], [0, 0, 1, 1], [], []>} : vector<2x64xbf16>, vector<64x128xbf16>, vector<2x128xf32> -> vector<2x128xf32>
    %c0_4 = arith.constant 0 : index
    %c0_5 = arith.constant 0 : index
    %11 = vector.load %arg4[%c0_4, %c0_5] : memref<1x128xf32, #tpu.memory_space<vmem>>, vector<1x128xf32>
    %12 = vector.broadcast %11 : vector<1x128xf32> to vector<2x128xf32>
    %13 = arith.addf %10, %12 : vector<2x128xf32>
    %14 = arith.truncf %13 : vector<2x128xf32> to vector<2x128xbf16>
    %c0_6 = arith.constant 0 : index
    %c0_7 = arith.constant 0 : index
    %15 = vector.load %arg5[%c0_6, %c0_7] : memref<2x128xbf16, #tpu.memory_space<vmem>>, vector<2x128xbf16>
    tpu.vector_store %arg5[%c0_6, %c0_7], %14 {strides = array<i32>} : memref<2x128xbf16, #tpu.memory_space<vmem>>, vector<2x128xbf16>,
    return
  }
  func.func @transform_0(%arg0: i32, %arg1: i32) -> (i32, i32) {
    %c0_i32 = arith.constant 0 : i32
    %c0_i32_0 = arith.constant 0 : i32
    return %arg0, %c0_i32 : i32, i32
  }
  func.func @transform_1(%arg0: i32, %arg1: i32) -> (i32, i32) {
    %c0_i32 = arith.constant 0 : i32
    %c0_i32_0 = arith.constant 0 : i32
    return %c0_i32, %arg1 : i32, i32
  }
  func.func @transform_2(%arg0: i32, %arg1: i32) -> (i32, i32) {
    %c0_i32 = arith.constant 0 : i32
    %c0_i32_0 = arith.constant 0 : i32
    return %c0_i32, %arg1 : i32, i32
  }
  func.func @transform_3(%arg0: i32, %arg1: i32) -> (i32, i32) {
    %c0_i32 = arith.constant 0 : i32
    return %arg0, %arg1 : i32, i32
  }
}

module attributes {stable_mosaic.version = 11 : i64} {
  func.func @kernel(%arg0: i32, %arg1: i32, %arg2: memref<1x64x128xbf16, #tpu.memory_space<vmem>>, %arg3: memref<1x1x128xf32, #tpu.memory_space<vmem>>, %arg4: memref<128x32xf32, #tpu.memory_space<vmem>>, %arg5: memref<32x128xf32, #tpu.memory_space<vmem>>, %arg6: memref<1x2x128xf32, #tpu.memory_space<vmem>>) attributes {dimension_semantics = [#tpu.dimension_semantics<parallel>, #tpu.dimension_semantics<arbitrary>], iteration_bounds = array<i64: 2, 4>, scalar_prefetch = 0 : i64, scratch_operands = 0 : i64, tpu.core_type = #tpu.core_type<tc>, window_params = [{transform_indices = @transform_0, window_bounds = array<i64: 1, 64, 128>}, {transform_indices = @transform_1, window_bounds = array<i64: 1, 1, 128>}, {pipeline_mode = #tpu.pipeline_mode<synchronous>, transform_indices = @transform_2, window_bounds = array<i64: 128, 32>}, {pipeline_mode = #tpu.pipeline_mode<synchronous>, transform_indices = @transform_3, window_bounds = array<i64: 32, 128>}, {transform_indices = @transform_4, window_bounds = array<i64: 1, 2, 128>}]} {
    %c0_i32 = arith.constant 0 : i32
    %0 = arith.cmpi eq, %arg1, %c0_i32 : i32
    %1 = arith.extui %0 : i1 to i32
    %c0_i32_0 = arith.constant 0 : i32
    %2 = arith.cmpi ne, %1, %c0_i32_0 : i32
    scf.if %2 {
      %cst_19 = arith.constant 0.000000e+00 : f32
      %30 = vector.broadcast %cst_19 : f32 to vector<1x2x128xf32>
      %c0_20 = arith.constant 0 : index
      %c0_21 = arith.constant 0 : index
      %c0_22 = arith.constant 0 : index
      %31 = vector.load %arg6[%c0_20, %c0_21, %c0_22] : memref<1x2x128xf32, #tpu.memory_space<vmem>>, vector<1x2x128xf32>
      tpu.vector_store %arg6[%c0_20, %c0_21, %c0_22], %30 {strides = array<i32>} : memref<1x2x128xf32, #tpu.memory_space<vmem>>, vector<1x2x128xf32>,
    } else {
    }
    %c0 = arith.constant 0 : index
    %c0_1 = arith.constant 0 : index
    %c0_2 = arith.constant 0 : index
    %3 = vector.load %arg2[%c0, %c0_1, %c0_2] : memref<1x64x128xbf16, #tpu.memory_space<vmem>>, vector<1x64x128xbf16>
    %4 = vector.shape_cast %3 : vector<1x64x128xbf16> to vector<64x128xbf16>
    %5 = arith.extf %4 : vector<64x128xbf16> to vector<64x128xf32>
    %c0_3 = arith.constant 0 : index
    %c0_4 = arith.constant 0 : index
    %c0_5 = arith.constant 0 : index
    %6 = vector.load %arg3[%c0_3, %c0_4, %c0_5] : memref<1x1x128xf32, #tpu.memory_space<vmem>>, vector<1x1x128xf32>
    %7 = vector.shape_cast %6 : vector<1x1x128xf32> to vector<1x128xf32>
    %8 = vector.broadcast %7 : vector<1x128xf32> to vector<64x128xf32>
    %9 = arith.addf %5, %8 : vector<64x128xf32>
    %c0_6 = arith.constant 0 : index
    %c0_7 = arith.constant 0 : index
    %c0_8 = arith.constant 0 : index
    %10 = vector.load %arg6[%c0_6, %c0_7, %c0_8] : memref<1x2x128xf32, #tpu.memory_space<vmem>>, vector<1x1x128xf32>
    %11 = vector.shape_cast %10 : vector<1x1x128xf32> to vector<1x128xf32>
    %cst = arith.constant dense<0.000000e+00> : vector<128xf32>
    %12 = vector.multi_reduction <add>, %9, %cst [0] : vector<64x128xf32> to vector<128xf32>
    %13 = vector.shape_cast %12 : vector<128xf32> to vector<1x128xf32>
    %14 = arith.addf %11, %13 : vector<1x128xf32>
    %c0_9 = arith.constant 0 : index
    %c1 = arith.constant 1 : index
    %c0_10 = arith.constant 0 : index
    %15 = vector.load %arg6[%c0_9, %c1, %c0_10] : memref<1x2x128xf32, #tpu.memory_space<vmem>>, vector<1x1x128xf32>
    %16 = vector.shape_cast %15 : vector<1x1x128xf32> to vector<1x128xf32>
    %17 = arith.mulf %9, %9 : vector<64x128xf32>
    %cst_11 = arith.constant dense<0.000000e+00> : vector<128xf32>
    %18 = vector.multi_reduction <add>, %17, %cst_11 [0] : vector<64x128xf32> to vector<128xf32>
    %19 = vector.shape_cast %18 : vector<128xf32> to vector<1x128xf32>
    %20 = arith.addf %16, %19 : vector<1x128xf32>
    %c0_12 = arith.constant 0 : index
    %c0_13 = arith.constant 0 : index
    %c0_14 = arith.constant 0 : index
    %21 = vector.load %arg6[%c0_12, %c0_13, %c0_14] : memref<1x2x128xf32, #tpu.memory_space<vmem>>, vector<1x1x128xf32>
    %22 = vector.shape_cast %21 : vector<1x1x128xf32> to vector<1x128xf32>
    %23 = vector.shape_cast %14 : vector<1x128xf32> to vector<1x1x128xf32>
    tpu.vector_store %arg6[%c0_12, %c0_13, %c0_14], %23 {strides = array<i32>} : memref<1x2x128xf32, #tpu.memory_space<vmem>>, vector<1x1x128xf32>,
    %c0_15 = arith.constant 0 : index
    %c1_16 = arith.constant 1 : index
    %c0_17 = arith.constant 0 : index
    %24 = vector.load %arg6[%c0_15, %c1_16, %c0_17] : memref<1x2x128xf32, #tpu.memory_space<vmem>>, vector<1x1x128xf32>
    %25 = vector.shape_cast %24 : vector<1x1x128xf32> to vector<1x128xf32>
    %26 = vector.shape_cast %20 : vector<1x128xf32> to vector<1x1x128xf32>
    tpu.vector_store %arg6[%c0_15, %c1_16, %c0_17], %26 {strides = array<i32>} : memref<1x2x128xf32, #tpu.memory_space<vmem>>, vector<1x1x128xf32>,
    %c3_i32 = arith.constant 3 : i32
    %27 = arith.cmpi eq, %arg1, %c3_i32 : i32
    %28 = arith.extui %27 : i1 to i32
    %c0_i32_18 = arith.constant 0 : i32
    %29 = arith.cmpi ne, %28, %c0_i32_18 : i32
    scf.if %29 {
      %c0_19 = arith.constant 0 : index
      %c0_20 = arith.constant 0 : index
      %30 = vector.load %arg4[%c0_19, %c0_20] : memref<128x32xf32, #tpu.memory_space<vmem>>, vector<128x32xf32>
      %cst_21 = arith.constant dense<0.000000e+00> : vector<1x32xf32>
      %31 = tpu.matmul %14, %30, %cst_21 {dimension_numbers = #tpu.dot_dimension_numbers<[1], [0], [0], [1], [0, 0, 1, 1], [], []>} : vector<1x128xf32>, vector<128x32xf32>, vector<1x32xf32> -> vector<1x32xf32>
      %c0_22 = arith.constant 0 : index
      %c0_23 = arith.constant 0 : index
      %32 = vector.load %arg4[%c0_22, %c0_23] : memref<128x32xf32, #tpu.memory_space<vmem>>, vector<128x32xf32>
      %cst_24 = arith.constant dense<0.000000e+00> : vector<1x32xf32>
      %33 = tpu.matmul %20, %32, %cst_24 {dimension_numbers = #tpu.dot_dimension_numbers<[1], [0], [0], [1], [0, 0, 1, 1], [], []>} : vector<1x128xf32>, vector<128x32xf32>, vector<1x32xf32> -> vector<1x32xf32>
      %cst_25 = arith.constant 9.765625E-4 : f32
      %34 = vector.broadcast %cst_25 : f32 to vector<1x32xf32>
      %35 = arith.mulf %31, %34 : vector<1x32xf32>
      %cst_26 = arith.constant 9.765625E-4 : f32
      %36 = vector.broadcast %cst_26 : f32 to vector<1x32xf32>
      %37 = arith.mulf %33, %36 : vector<1x32xf32>
      %38 = arith.mulf %35, %35 : vector<1x32xf32>
      %39 = arith.subf %37, %38 : vector<1x32xf32>
      %cst_27 = arith.constant 0.000000e+00 : f32
      %40 = vector.broadcast %cst_27 : f32 to vector<1x32xf32>
      %41 = arith.maximumf %39, %40 : vector<1x32xf32>
      %cst_28 = arith.constant 9.99999997E-7 : f32
      %42 = vector.broadcast %cst_28 : f32 to vector<1x32xf32>
      %43 = arith.addf %41, %42 : vector<1x32xf32>
      %44 = math.rsqrt %43 : vector<1x32xf32>
      %c0_29 = arith.constant 0 : index
      %c0_30 = arith.constant 0 : index
      %45 = vector.load %arg5[%c0_29, %c0_30] : memref<32x128xf32, #tpu.memory_space<vmem>>, vector<32x128xf32>
      %cst_31 = arith.constant dense<0.000000e+00> : vector<1x128xf32>
      %46 = tpu.matmul %35, %45, %cst_31 {dimension_numbers = #tpu.dot_dimension_numbers<[1], [0], [0], [1], [0, 0, 1, 1], [], []>} : vector<1x32xf32>, vector<32x128xf32>, vector<1x128xf32> -> vector<1x128xf32>
      %c0_32 = arith.constant 0 : index
      %c0_33 = arith.constant 0 : index
      %c0_34 = arith.constant 0 : index
      %47 = vector.load %arg6[%c0_32, %c0_33, %c0_34] : memref<1x2x128xf32, #tpu.memory_space<vmem>>, vector<1x1x128xf32>
      %48 = vector.shape_cast %47 : vector<1x1x128xf32> to vector<1x128xf32>
      %49 = vector.shape_cast %46 : vector<1x128xf32> to vector<1x1x128xf32>
      tpu.vector_store %arg6[%c0_32, %c0_33, %c0_34], %49 {strides = array<i32>} : memref<1x2x128xf32, #tpu.memory_space<vmem>>, vector<1x1x128xf32>,
      %c0_35 = arith.constant 0 : index
      %c0_36 = arith.constant 0 : index
      %50 = vector.load %arg5[%c0_35, %c0_36] : memref<32x128xf32, #tpu.memory_space<vmem>>, vector<32x128xf32>
      %cst_37 = arith.constant dense<0.000000e+00> : vector<1x128xf32>
      %51 = tpu.matmul %44, %50, %cst_37 {dimension_numbers = #tpu.dot_dimension_numbers<[1], [0], [0], [1], [0, 0, 1, 1], [], []>} : vector<1x32xf32>, vector<32x128xf32>, vector<1x128xf32> -> vector<1x128xf32>
      %c0_38 = arith.constant 0 : index
      %c1_39 = arith.constant 1 : index
      %c0_40 = arith.constant 0 : index
      %52 = vector.load %arg6[%c0_38, %c1_39, %c0_40] : memref<1x2x128xf32, #tpu.memory_space<vmem>>, vector<1x1x128xf32>
      %53 = vector.shape_cast %52 : vector<1x1x128xf32> to vector<1x128xf32>
      %54 = vector.shape_cast %51 : vector<1x128xf32> to vector<1x1x128xf32>
      tpu.vector_store %arg6[%c0_38, %c1_39, %c0_40], %54 {strides = array<i32>} : memref<1x2x128xf32, #tpu.memory_space<vmem>>, vector<1x1x128xf32>,
    } else {
    }
    return
  }
  func.func @transform_0(%arg0: i32, %arg1: i32) -> (i32, i32, i32) {
    %c0_i32 = arith.constant 0 : i32
    %c0_i32_0 = arith.constant 0 : i32
    return %arg0, %arg1, %c0_i32 : i32, i32, i32
  }
  func.func @transform_1(%arg0: i32, %arg1: i32) -> (i32, i32, i32) {
    %c0_i32 = arith.constant 0 : i32
    %c0_i32_0 = arith.constant 0 : i32
    %c0_i32_1 = arith.constant 0 : i32
    return %arg0, %c0_i32, %c0_i32_0 : i32, i32, i32
  }
  func.func @transform_2(%arg0: i32, %arg1: i32) -> (i32, i32) {
    %c0_i32 = arith.constant 0 : i32
    %c0_i32_0 = arith.constant 0 : i32
    %c0_i32_1 = arith.constant 0 : i32
    return %c0_i32, %c0_i32_0 : i32, i32
  }
  func.func @transform_3(%arg0: i32, %arg1: i32) -> (i32, i32) {
    %c0_i32 = arith.constant 0 : i32
    %c0_i32_0 = arith.constant 0 : i32
    %c0_i32_1 = arith.constant 0 : i32
    return %c0_i32, %c0_i32_0 : i32, i32
  }
  func.func @transform_4(%arg0: i32, %arg1: i32) -> (i32, i32, i32) {
    %c0_i32 = arith.constant 0 : i32
    %c0_i32_0 = arith.constant 0 : i32
    %c0_i32_1 = arith.constant 0 : i32
    return %arg0, %c0_i32, %c0_i32_0 : i32, i32, i32
  }
}

module attributes {stable_mosaic.version = 11 : i64} {
  func.func @kernel(%arg0: i32, %arg1: i32, %arg2: memref<1x64x128xbf16, #tpu.memory_space<vmem>>, %arg3: memref<1x1x128xf32, #tpu.memory_space<vmem>>, %arg4: memref<1x2x128xf32, #tpu.memory_space<vmem>>, %arg5: memref<1x128xf32, #tpu.memory_space<vmem>>, %arg6: memref<1x128xf32, #tpu.memory_space<vmem>>, %arg7: memref<1x64x128xbf16, #tpu.memory_space<vmem>>) attributes {dimension_semantics = [#tpu.dimension_semantics<parallel>, #tpu.dimension_semantics<parallel>], iteration_bounds = array<i64: 2, 4>, scalar_prefetch = 0 : i64, scratch_operands = 0 : i64, tpu.core_type = #tpu.core_type<tc>, window_params = [{transform_indices = @transform_0, window_bounds = array<i64: 1, 64, 128>}, {transform_indices = @transform_1, window_bounds = array<i64: 1, 1, 128>}, {transform_indices = @transform_2, window_bounds = array<i64: 1, 2, 128>}, {pipeline_mode = #tpu.pipeline_mode<synchronous>, transform_indices = @transform_3, window_bounds = array<i64: 1, 128>}, {pipeline_mode = #tpu.pipeline_mode<synchronous>, transform_indices = @transform_4, window_bounds = array<i64: 1, 128>}, {transform_indices = @transform_5, window_bounds = array<i64: 1, 64, 128>}]} {
    %c0 = arith.constant 0 : index
    %c0_0 = arith.constant 0 : index
    %c0_1 = arith.constant 0 : index
    %0 = vector.load %arg2[%c0, %c0_0, %c0_1] : memref<1x64x128xbf16, #tpu.memory_space<vmem>>, vector<1x64x128xbf16>
    %1 = vector.shape_cast %0 : vector<1x64x128xbf16> to vector<64x128xbf16>
    %2 = arith.extf %1 : vector<64x128xbf16> to vector<64x128xf32>
    %c0_2 = arith.constant 0 : index
    %c0_3 = arith.constant 0 : index
    %c0_4 = arith.constant 0 : index
    %3 = vector.load %arg3[%c0_2, %c0_3, %c0_4] : memref<1x1x128xf32, #tpu.memory_space<vmem>>, vector<1x1x128xf32>
    %4 = vector.shape_cast %3 : vector<1x1x128xf32> to vector<1x128xf32>
    %5 = vector.broadcast %4 : vector<1x128xf32> to vector<64x128xf32>
    %6 = arith.addf %2, %5 : vector<64x128xf32>
    %c0_5 = arith.constant 0 : index
    %c0_6 = arith.constant 0 : index
    %c0_7 = arith.constant 0 : index
    %7 = vector.load %arg4[%c0_5, %c0_6, %c0_7] : memref<1x2x128xf32, #tpu.memory_space<vmem>>, vector<1x1x128xf32>
    %8 = vector.shape_cast %7 : vector<1x1x128xf32> to vector<1x128xf32>
    %c0_8 = arith.constant 0 : index
    %c1 = arith.constant 1 : index
    %c0_9 = arith.constant 0 : index
    %9 = vector.load %arg4[%c0_8, %c1, %c0_9] : memref<1x2x128xf32, #tpu.memory_space<vmem>>, vector<1x1x128xf32>
    %10 = vector.shape_cast %9 : vector<1x1x128xf32> to vector<1x128xf32>
    %11 = vector.broadcast %8 : vector<1x128xf32> to vector<64x128xf32>
    %12 = arith.subf %6, %11 : vector<64x128xf32>
    %c0_10 = arith.constant 0 : index
    %c0_11 = arith.constant 0 : index
    %13 = vector.load %arg5[%c0_10, %c0_11] : memref<1x128xf32, #tpu.memory_space<vmem>>, vector<1x128xf32>
    %14 = arith.mulf %10, %13 : vector<1x128xf32>
    %15 = vector.broadcast %14 : vector<1x128xf32> to vector<64x128xf32>
    %16 = arith.mulf %12, %15 : vector<64x128xf32>
    %c0_12 = arith.constant 0 : index
    %c0_13 = arith.constant 0 : index
    %17 = vector.load %arg6[%c0_12, %c0_13] : memref<1x128xf32, #tpu.memory_space<vmem>>, vector<1x128xf32>
    %18 = vector.broadcast %17 : vector<1x128xf32> to vector<64x128xf32>
    %19 = arith.addf %16, %18 : vector<64x128xf32>
    %20 = arith.negf %19 : vector<64x128xf32>
    %21 = math.exp %20 : vector<64x128xf32>
    %cst = arith.constant 1.000000e+00 : f32
    %22 = vector.broadcast %cst : f32 to vector<64x128xf32>
    %23 = arith.addf %22, %21 : vector<64x128xf32>
    %24 = arith.divf %22, %23 : vector<64x128xf32>
    %25 = arith.mulf %19, %24 : vector<64x128xf32>
    %26 = arith.truncf %25 : vector<64x128xf32> to vector<64x128xbf16>
    %c0_14 = arith.constant 0 : index
    %c0_15 = arith.constant 0 : index
    %c0_16 = arith.constant 0 : index
    %27 = vector.load %arg7[%c0_14, %c0_15, %c0_16] : memref<1x64x128xbf16, #tpu.memory_space<vmem>>, vector<1x64x128xbf16>
    %28 = vector.shape_cast %27 : vector<1x64x128xbf16> to vector<64x128xbf16>
    %29 = vector.shape_cast %26 : vector<64x128xbf16> to vector<1x64x128xbf16>
    tpu.vector_store %arg7[%c0_14, %c0_15, %c0_16], %29 {strides = array<i32>} : memref<1x64x128xbf16, #tpu.memory_space<vmem>>, vector<1x64x128xbf16>,
    return
  }
  func.func @transform_0(%arg0: i32, %arg1: i32) -> (i32, i32, i32) {
    %c0_i32 = arith.constant 0 : i32
    %c0_i32_0 = arith.constant 0 : i32
    return %arg0, %arg1, %c0_i32 : i32, i32, i32
  }
  func.func @transform_1(%arg0: i32, %arg1: i32) -> (i32, i32, i32) {
    %c0_i32 = arith.constant 0 : i32
    %c0_i32_0 = arith.constant 0 : i32
    %c0_i32_1 = arith.constant 0 : i32
    return %arg0, %c0_i32, %c0_i32_0 : i32, i32, i32
  }
  func.func @transform_2(%arg0: i32, %arg1: i32) -> (i32, i32, i32) {
    %c0_i32 = arith.constant 0 : i32
    %c0_i32_0 = arith.constant 0 : i32
    %c0_i32_1 = arith.constant 0 : i32
    return %arg0, %c0_i32, %c0_i32_0 : i32, i32, i32
  }
  func.func @transform_3(%arg0: i32, %arg1: i32) -> (i32, i32) {
    %c0_i32 = arith.constant 0 : i32
    %c0_i32_0 = arith.constant 0 : i32
    %c0_i32_1 = arith.constant 0 : i32
    return %c0_i32, %c0_i32_0 : i32, i32
  }
  func.func @transform_4(%arg0: i32, %arg1: i32) -> (i32, i32) {
    %c0_i32 = arith.constant 0 : i32
    %c0_i32_0 = arith.constant 0 : i32
    %c0_i32_1 = arith.constant 0 : i32
    return %c0_i32, %c0_i32_0 : i32, i32
  }
  func.func @transform_5(%arg0: i32, %arg1: i32) -> (i32, i32, i32) {
    %c0_i32 = arith.constant 0 : i32
    %c0_i32_0 = arith.constant 0 : i32
    return %arg0, %arg1, %c0_i32 : i32, i32, i32
  }
}

module attributes {stable_mosaic.version = 11 : i64} {
  func.func @kernel(%arg0: i32, %arg1: i32, %arg2: i32, %arg3: memref<1x1x10x18x128xbf16, #tpu.memory_space<vmem>>, %arg4: memref<3x384x128xbf16, #tpu.memory_space<vmem>>, %arg5: memref<1x128xf32, #tpu.memory_space<vmem>>, %arg6: memref<1x1x128x128xbf16, #tpu.memory_space<vmem>>, %arg7: memref<1x1x128x128xbf16, #tpu.memory_space<vmem>>) attributes {dimension_semantics = [#tpu.dimension_semantics<parallel>, #tpu.dimension_semantics<parallel>, #tpu.dimension_semantics<parallel>], iteration_bounds = array<i64: 1, 2, 2>, scalar_prefetch = 0 : i64, scratch_operands = 0 : i64, tpu.core_type = #tpu.core_type<tc>, window_params = [{transform_indices = @transform_0, window_bounds = array<i64: 1, 1, 10, 18, 128>}, {transform_indices = @transform_1, window_bounds = array<i64: 3, 384, 128>}, {transform_indices = @transform_2, window_bounds = array<i64: 1, 128>}, {transform_indices = @transform_3, window_bounds = array<i64: 1, 1, 128, 128>}, {transform_indices = @transform_4, window_bounds = array<i64: 1, 1, 128, 128>}]} {
    %cst = arith.constant 0.000000e+00 : f32
    %0 = vector.broadcast %cst : f32 to vector<128x128xf32>
    %c0 = arith.constant 0 : index
    %c0_0 = arith.constant 0 : index
    %c0_1 = arith.constant 0 : index
    %c0_2 = arith.constant 0 : index
    %c0_3 = arith.constant 0 : index
    %1 = vector.load %arg3[%c0, %c0_0, %c0_1, %c0_2, %c0_3] : memref<1x1x10x18x128xbf16, #tpu.memory_space<vmem>>, vector<1x1x8x18x128xbf16>
    %2 = vector.shape_cast %1 : vector<1x1x8x18x128xbf16> to vector<8x18x128xbf16>
    %3 = vector.extract_strided_slice %2 {offsets = [0, 0, 0], sizes = [8, 16, 128], strides = [1, 1, 1]} : vector<8x18x128xbf16> to vector<8x16x128xbf16>
    %4 = vector.extract_strided_slice %2 {offsets = [0, 1, 0], sizes = [8, 16, 128], strides = [1, 1, 1]} : vector<8x18x128xbf16> to vector<8x16x128xbf16>
    %5 = vector.extract_strided_slice %2 {offsets = [0, 2, 0], sizes = [8, 16, 128], strides = [1, 1, 1]} : vector<8x18x128xbf16> to vector<8x16x128xbf16>
    %6 = tpu.concatenate %3, %4, %5 in 2 : vector<8x16x128xbf16>, vector<8x16x128xbf16>, vector<8x16x128xbf16> -> vector<8x16x384xbf16>
    %7 = vector.shape_cast %6 : vector<8x16x384xbf16> to vector<128x384xbf16>
    %c0_4 = arith.constant 0 : index
    %c0_5 = arith.constant 0 : index
    %c0_6 = arith.constant 0 : index
    %8 = vector.load %arg4[%c0_4, %c0_5, %c0_6] : memref<3x384x128xbf16, #tpu.memory_space<vmem>>, vector<1x384x128xbf16>
    %9 = vector.shape_cast %8 : vector<1x384x128xbf16> to vector<384x128xbf16>
    %cst_7 = arith.constant dense<0.000000e+00> : vector<128x128xf32>
    %10 = tpu.matmul %7, %9, %cst_7 {dimension_numbers = #tpu.dot_dimension_numbers<[1], [0], [0], [1], [0, 0, 1, 1], [], []>} : vector<128x384xbf16>, vector<384x128xbf16>, vector<128x128xf32> -> vector<128x128xf32>
    %11 = arith.addf %0, %10 : vector<128x128xf32>
    %c0_8 = arith.constant 0 : index
    %c0_9 = arith.constant 0 : index
    %c1 = arith.constant 1 : index
    %c0_10 = arith.constant 0 : index
    %c0_11 = arith.constant 0 : index
    %12 = vector.load %arg3[%c0_8, %c0_9, %c1, %c0_10, %c0_11] : memref<1x1x10x18x128xbf16, #tpu.memory_space<vmem>>, vector<1x1x8x18x128xbf16>
    %13 = vector.shape_cast %12 : vector<1x1x8x18x128xbf16> to vector<8x18x128xbf16>
    %14 = vector.extract_strided_slice %13 {offsets = [0, 0, 0], sizes = [8, 16, 128], strides = [1, 1, 1]} : vector<8x18x128xbf16> to vector<8x16x128xbf16>
    %15 = vector.extract_strided_slice %13 {offsets = [0, 1, 0], sizes = [8, 16, 128], strides = [1, 1, 1]} : vector<8x18x128xbf16> to vector<8x16x128xbf16>
    %16 = vector.extract_strided_slice %13 {offsets = [0, 2, 0], sizes = [8, 16, 128], strides = [1, 1, 1]} : vector<8x18x128xbf16> to vector<8x16x128xbf16>
    %17 = tpu.concatenate %14, %15, %16 in 2 : vector<8x16x128xbf16>, vector<8x16x128xbf16>, vector<8x16x128xbf16> -> vector<8x16x384xbf16>
    %18 = vector.shape_cast %17 : vector<8x16x384xbf16> to vector<128x384xbf16>
    %c1_12 = arith.constant 1 : index
    %c0_13 = arith.constant 0 : index
    %c0_14 = arith.constant 0 : index
    %19 = vector.load %arg4[%c1_12, %c0_13, %c0_14] : memref<3x384x128xbf16, #tpu.memory_space<vmem>>, vector<1x384x128xbf16>
    %20 = vector.shape_cast %19 : vector<1x384x128xbf16> to vector<384x128xbf16>
    %cst_15 = arith.constant dense<0.000000e+00> : vector<128x128xf32>
    %21 = tpu.matmul %18, %20, %cst_15 {dimension_numbers = #tpu.dot_dimension_numbers<[1], [0], [0], [1], [0, 0, 1, 1], [], []>} : vector<128x384xbf16>, vector<384x128xbf16>, vector<128x128xf32> -> vector<128x128xf32>
    %22 = arith.addf %11, %21 : vector<128x128xf32>
    %c0_16 = arith.constant 0 : index
    %c0_17 = arith.constant 0 : index
    %c2 = arith.constant 2 : index
    %c0_18 = arith.constant 0 : index
    %c0_19 = arith.constant 0 : index
    %23 = vector.load %arg3[%c0_16, %c0_17, %c2, %c0_18, %c0_19] : memref<1x1x10x18x128xbf16, #tpu.memory_space<vmem>>, vector<1x1x8x18x128xbf16>
    %24 = vector.shape_cast %23 : vector<1x1x8x18x128xbf16> to vector<8x18x128xbf16>
    %25 = vector.extract_strided_slice %24 {offsets = [0, 0, 0], sizes = [8, 16, 128], strides = [1, 1, 1]} : vector<8x18x128xbf16> to vector<8x16x128xbf16>
    %26 = vector.extract_strided_slice %24 {offsets = [0, 1, 0], sizes = [8, 16, 128], strides = [1, 1, 1]} : vector<8x18x128xbf16> to vector<8x16x128xbf16>
    %27 = vector.extract_strided_slice %24 {offsets = [0, 2, 0], sizes = [8, 16, 128], strides = [1, 1, 1]} : vector<8x18x128xbf16> to vector<8x16x128xbf16>
    %28 = tpu.concatenate %25, %26, %27 in 2 : vector<8x16x128xbf16>, vector<8x16x128xbf16>, vector<8x16x128xbf16> -> vector<8x16x384xbf16>
    %29 = vector.shape_cast %28 : vector<8x16x384xbf16> to vector<128x384xbf16>
    %c2_20 = arith.constant 2 : index
    %c0_21 = arith.constant 0 : index
    %c0_22 = arith.constant 0 : index
    %30 = vector.load %arg4[%c2_20, %c0_21, %c0_22] : memref<3x384x128xbf16, #tpu.memory_space<vmem>>, vector<1x384x128xbf16>
    %31 = vector.shape_cast %30 : vector<1x384x128xbf16> to vector<384x128xbf16>
    %cst_23 = arith.constant dense<0.000000e+00> : vector<128x128xf32>
    %32 = tpu.matmul %29, %31, %cst_23 {dimension_numbers = #tpu.dot_dimension_numbers<[1], [0], [0], [1], [0, 0, 1, 1], [], []>} : vector<128x384xbf16>, vector<384x128xbf16>, vector<128x128xf32> -> vector<128x128xf32>
    %33 = arith.addf %22, %32 : vector<128x128xf32>
    %c0_24 = arith.constant 0 : index
    %c0_25 = arith.constant 0 : index
    %34 = vector.load %arg5[%c0_24, %c0_25] : memref<1x128xf32, #tpu.memory_space<vmem>>, vector<1x128xf32>
    %35 = vector.broadcast %34 : vector<1x128xf32> to vector<128x128xf32>
    %36 = arith.addf %33, %35 : vector<128x128xf32>
    %c0_26 = arith.constant 0 : index
    %c0_27 = arith.constant 0 : index
    %c0_28 = arith.constant 0 : index
    %c0_29 = arith.constant 0 : index
    %37 = vector.load %arg6[%c0_26, %c0_27, %c0_28, %c0_29] : memref<1x1x128x128xbf16, #tpu.memory_space<vmem>>, vector<1x1x128x128xbf16>
    %38 = vector.shape_cast %37 : vector<1x1x128x128xbf16> to vector<128x128xbf16>
    %39 = arith.extf %38 : vector<128x128xbf16> to vector<128x128xf32>
    %40 = arith.addf %36, %39 : vector<128x128xf32>
    %41 = arith.truncf %40 : vector<128x128xf32> to vector<128x128xbf16>
    %c0_30 = arith.constant 0 : index
    %c0_31 = arith.constant 0 : index
    %c0_32 = arith.constant 0 : index
    %c0_33 = arith.constant 0 : index
    %42 = vector.load %arg7[%c0_30, %c0_31, %c0_32, %c0_33] : memref<1x1x128x128xbf16, #tpu.memory_space<vmem>>, vector<1x1x128x128xbf16>
    %43 = vector.shape_cast %42 : vector<1x1x128x128xbf16> to vector<128x128xbf16>
    %44 = vector.shape_cast %41 : vector<128x128xbf16> to vector<1x1x128x128xbf16>
    tpu.vector_store %arg7[%c0_30, %c0_31, %c0_32, %c0_33], %44 {strides = array<i32>} : memref<1x1x128x128xbf16, #tpu.memory_space<vmem>>, vector<1x1x128x128xbf16>,
    return
  }
  func.func @transform_0(%arg0: i32, %arg1: i32, %arg2: i32) -> (i32, i32, i32, i32, i32) {
    %c0_i32 = arith.constant 0 : i32
    %c0_i32_0 = arith.constant 0 : i32
    %c0_i32_1 = arith.constant 0 : i32
    %c0_i32_2 = arith.constant 0 : i32
    return %arg1, %arg2, %c0_i32, %c0_i32_0, %c0_i32_1 : i32, i32, i32, i32, i32
  }
  func.func @transform_1(%arg0: i32, %arg1: i32, %arg2: i32) -> (i32, i32, i32) {
    %c0_i32 = arith.constant 0 : i32
    %c0_i32_0 = arith.constant 0 : i32
    %c0_i32_1 = arith.constant 0 : i32
    return %c0_i32, %c0_i32_0, %arg0 : i32, i32, i32
  }
  func.func @transform_2(%arg0: i32, %arg1: i32, %arg2: i32) -> (i32, i32) {
    %c0_i32 = arith.constant 0 : i32
    %c0_i32_0 = arith.constant 0 : i32
    return %c0_i32, %arg0 : i32, i32
  }
  func.func @transform_3(%arg0: i32, %arg1: i32, %arg2: i32) -> (i32, i32, i32, i32) {
    %c0_i32 = arith.constant 0 : i32
    %c0_i32_0 = arith.constant 0 : i32
    return %arg1, %arg2, %c0_i32, %arg0 : i32, i32, i32, i32
  }
  func.func @transform_4(%arg0: i32, %arg1: i32, %arg2: i32) -> (i32, i32, i32, i32) {
    %c0_i32 = arith.constant 0 : i32
    %c0_i32_0 = arith.constant 0 : i32
    return %arg1, %arg2, %c0_i32, %arg0 : i32, i32, i32, i32
  }
}

</mosaic_0001>

<bundles_post_ra>
// kernel: resnet_block_2d.8
= control target key start
LH: loop header
LB: loop body
LE: loop exit
PB: predicated region body
PF: predicated region fallthrough
CT: control target
= control target key end

     0   :  { %s730_s15 = smov 0   ;;  %s732_s16 = smov 0   ;;  %s797_s0 = inlined_call_operand.vmem [shape: bf16[2,256,128], index: 0, kind: input, shape index: {}]   ;;  %s798_s1 = inlined_call_operand.vmem [shape: f32[2,2,128], index: 1, kind: input, shape index: {}]   ;;  %s799_s2 = inlined_call_operand.vmem [shape: f32[1,128], index: 2, kind: input, shape index: {}]   ;;  %s800_s3 = inlined_call_operand.vmem [shape: f32[1,128], index: 3, kind: input, shape index: {}]   ;;  %s801_s4 = inlined_call_operand.vmem [shape: bf16[2,256,128], index: 4, kind: output, shape index: {}]  }
   0x1   :  { %s734_s17 = smov 0   ;;  %s736_s18 = smov 0  }
   0x2   :  { %s738_s19 = smov 0  }
   0x3 LB: > { %s23_s20 = sadd.s32 1, %s695_s17  ;;  %s26_s21 = sadd.s32 1, %s699_s18  ;;  %s703_s19 = sphi %s738_s19, %s14_s19   ;;  %s699_s18 = sphi %s736_s18, %s805_s18   ;;  %s695_s17 = sphi %s734_s17, %s804_s17   ;;  %s691_s16 = sphi %s732_s16, %s803_s16   ;;  %s687_s15 = sphi %s730_s15, %s802_s15  }
   0x4   : > { %p24_p0 = scmp.ge.s32.totalorder %s23_s20, 4  ;;  %p515_p1 = scmp.ge.s32.totalorder %s703_s19, 1 }
   0x5   : > { %p192_p2 = scmp.lt.s32.totalorder %s703_s19, 9 }
   0x6   : > { %s807_s20 = smov (%p24_p0, %s23_s20), 0  ;;  %s809_s21 = smov (!%p24_p0, %s26_s21), %s699_s18 }
   0x7   : > { %p193_p3 = pnand %p515_p1, %p192_p2  ;;  %p28_p4 = scmp.ge.s32.totalorder %s809_s21, 2 }
   0x8   : > { %s516_s22 = sshll.u32 (!%p193_p3), %s687_s15, 3  ;;  %p231_p5 = scmp.lt.s32.totalorder (!%p193_p3), %s691_s16, 1  ;;  %v286_v0 = vlaneseq (!%p193_p3)  ;;  %v284_v2 = vld [vmem:[%s799_s2] sm:$0x1] (!%p193_p3) }
   0x9   : > { %s811_s21 = smov (%p28_p4, %s809_s21), 0  ;;  %196 = sbr.rel (%p193_p3) target bundleno = 68 (0x44), region = 36 }
   0xa   : > { %p233_p6 = scmp.lt.s32.totalorder (!%p193_p3), %s516_s22, 31  ;;  %v287_v1 = vshrl.u32 (!%p193_p3), %v286_v0, 7  ;;  %v524_v23 = vld [vmem:[%s800_s3] ss:$0 sm:$0xff] (!%p193_p3) }
   0xc   : > { %v288_v6 = vsub.s32 (!%p193_p3), 0, %v287_v1 }
  0x10   : > { %s813_s16 = smov (!%p231_p5, %s691_s16), 1  ;;  %s815_s22 = smov (!%p233_p6, %s516_s22), 31 }
  0x11   : > { %s517_s23 = sshll.u32 %s813_s16, 5  ;;  %s519_s24 = sshll.u32 %s813_s16, 1 }
  0x12   : > { %s763_s27 = sadd.s32 %s517_s23, %s815_s22  ;;  %s243_s30 = scalar_lea.vmem %s798_s1, %s519_s24 }
  0x13   : > { %s518_s5 = sshll.u32 %s763_s27, 2  ;;  %v271_v3 = vld [vmem:[%s243_s30 + $0x1] sm:$0x1]  ;;  %v523_v4 = vld [vmem:[%s243_s30] ss:$0 sm:$0xff] }
  0x14   : > { %s238_s8 = scalar_lea.vmem %s797_s0, %s518_s5  ;;  %v285_v5 = vmul.f32 %v284_v2, %v271_v3  ;;  %s252_s13 = scalar_lea.vmem %s801_s4, %s518_s5 }
  0x15   : > { %v552_v7 = vld [vmem:[%s238_s8] sm:$0xff]   ;;  %v587_v8 = vld [vmem:[%s238_s8 + $0x8] sm:$0xff]   ;;  %v588_v9 = vld [vmem:[%s238_s8 + $0x10] sm:$0xff]  }
  0x16   : > { %v553_v10 = vunpack.c.l.bf16 %v552_v7  ;;  %v554_v11 = vunpack.c.h.bf16 %v552_v7  ;;  %v557_v12 = vunpack.c.l.bf16 %v587_v8  ;;  %v558_v13 = vunpack.c.h.bf16 %v587_v8  ;;  %v589_v14 = vld [vmem:[%s238_s8 + $0x18] sm:$0xff]  }
  0x17   : > { %v561_v15 = vunpack.c.l.bf16 %v588_v9  ;;  %v562_v16 = vunpack.c.h.bf16 %v588_v9  ;;  %v565_v17 = vunpack.c.l.bf16 %v589_v14  ;;  %v566_v18 = vunpack.c.h.bf16 %v589_v14 }
  0x18   : > { %v276_v19 = vsub.f32 %v553_v10, %v523_v4  ;;  %v277_v20 = vsub.f32 %v554_v11, %v523_v4  ;;  %v289_v21 = vrot.slane %v285_v5, %v288_v6  ;;  %v278_v22 = vsub.f32 %v557_v12, %v523_v4 }
  0x19   : > { %v279_v24 = vsub.f32 %v558_v13, %v523_v4  ;;  %v280_v25 = vsub.f32 %v561_v15, %v523_v4  ;;  %v281_v26 = vsub.f32 %v562_v16, %v523_v4  ;;  %v282_v27 = vsub.f32 %v565_v17, %v523_v4 }
  0x1a   : > { %v290_v28 = vmul.f32 %v289_v21, %v276_v19  ;;  %v291_v29 = vmul.f32 %v289_v21, %v277_v20  ;;  %v292_v30 = vmul.f32 %v289_v21, %v278_v22  ;;  %v283_v31 = vsub.f32 %v566_v18, %v523_v4 }
  0x1b   : > { %v293_v32 = vmul.f32 %v289_v21, %v279_v24  ;;  %v294_v33 = vmul.f32 %v289_v21, %v280_v25  ;;  %v295_v34 = vmul.f32 %v289_v21, %v281_v26  ;;  %v296_v35 = vmul.f32 %v289_v21, %v282_v27 }
  0x1c   : > { %v305_v36 = vadd.f32 %v524_v23, %v290_v28  ;;  %v306_v37 = vadd.f32 %v524_v23, %v291_v29  ;;  %v307_v38 = vadd.f32 %v524_v23, %v292_v30  ;;  %v297_v39 = vmul.f32 %v289_v21, %v283_v31 }
  0x1d   : > { %v308_v40 = vadd.f32 %v524_v23, %v293_v32  ;;  %v309_v41 = vadd.f32 %v524_v23, %v294_v33  ;;  %v310_v42 = vadd.f32 %v524_v23, %v295_v34  ;;  %v311_v46 = vadd.f32 %v524_v23, %v296_v35 }
  0x1e   : > { %v525_v43 = vmul.f32 -1.442695, %v305_v36  ;;  %v526_v44 = vmul.f32 -1.442695, %v306_v37  ;;  %v527_v45 = vmul.f32 -1.442695, %v307_v38  ;;  %v312_v48 = vadd.f32 %v524_v23, %v297_v39 }
  0x1f   : > { %v528_v47 = vmul.f32 -1.442695, %v308_v40  ;;  %v529_v49 = vmul.f32 -1.442695, %v309_v41  ;;  %v530_v50 = vmul.f32 -1.442695, %v310_v42 }
  0x20   : > { %633 = vpow2.f32 %v525_v43  ;;  %v531_v51 = vmul.f32 -1.442695, %v311_v46  ;;  %v532_v52 = vmul.f32 -1.442695, %v312_v48 }
  0x21   : > { %635 = vpow2.f32 %v526_v44 }
  0x22   : > { %637 = vpow2.f32 %v527_v45 }
  0x23   : > { %639 = vpow2.f32 %v528_v47 }
  0x24   : > { %641 = vpow2.f32 %v529_v49 }
  0x25   : > { %643 = vpow2.f32 %v530_v50 }
  0x26   : > { %645 = vpow2.f32 %v531_v51 }
  0x27   : > { %647 = vpow2.f32 %v532_v52 }
  0x2a   : > { %v634_v53 = vpop.eup %633 }
  0x2b   : > { %v636_v54 = vpop.eup %635  ;;  %v337_v55 = vadd.f32 1.0, %v634_v53 }
  0x2c   : > { %v638_v56 = vpop.eup %637  ;;  %v338_v57 = vadd.f32 1.0, %v636_v54 }
  0x2d   : > { %v640_v58 = vpop.eup %639  ;;  %649 = vrcp.f32 %v337_v55  ;;  %v339_v59 = vadd.f32 1.0, %v638_v56 }
  0x2e   : > { %v642_v60 = vpop.eup %641  ;;  %651 = vrcp.f32 %v338_v57  ;;  %v340_v61 = vadd.f32 1.0, %v640_v58 }
  0x2f   : > { %v644_v62 = vpop.eup %643  ;;  %653 = vrcp.f32 %v339_v59  ;;  %v341_v63 = vadd.f32 1.0, %v642_v60 }
  0x30   : > { %v646_v0 = vpop.eup %645  ;;  %655 = vrcp.f32 %v340_v61  ;;  %v342_v1 = vadd.f32 1.0, %v644_v62 }
  0x31   : > { %v648_v2 = vpop.eup %647  ;;  %657 = vrcp.f32 %v341_v63  ;;  %v343_v3 = vadd.f32 1.0, %v646_v0 }
  0x32   : > { %659 = vrcp.f32 %v342_v1  ;;  %v344_v4 = vadd.f32 1.0, %v648_v2 }
  0x33   : > { %661 = vrcp.f32 %v343_v3 }
  0x34   : > { %663 = vrcp.f32 %v344_v4 }
  0x37   : > { %v650_v5 = vpop.eup %649 }
  0x38   : > { %v652_v6 = vpop.eup %651  ;;  %v361_v7 = vmul.f32 %v650_v5, %v305_v36 }
  0x39   : > { %v654_v8 = vpop.eup %653  ;;  %v362_v9 = vmul.f32 %v652_v6, %v306_v37 }
  0x3a   : > { %v656_v10 = vpop.eup %655  ;;  %v363_v11 = vmul.f32 %v654_v8, %v307_v38 }
  0x3b   : > { %v658_v12 = vpop.eup %657  ;;  %v570_v13 = vpack.c.bf16 %v362_v9, %v361_v7  ;;  %v364_v14 = vmul.f32 %v656_v10, %v308_v40 }
  0x3c   : > { %v660_v15 = vpop.eup %659  ;;  %v365_v16 = vmul.f32 %v658_v12, %v309_v41 }
  0x3d   : > { %v662_v17 = vpop.eup %661  ;;  %571 = vst [vmem:[%s252_s13] sm:$0xff] %v570_v13   ;;  %v575_v18 = vpack.c.bf16 %v364_v14, %v363_v11  ;;  %v366_v19 = vmul.f32 %v660_v15, %v310_v42 }
  0x3e   : > { %v664_v20 = vpop.eup %663  ;;  %v367_v21 = vmul.f32 %v662_v17, %v311_v46 }
  0x3f   : > { %590 = vst [vmem:[%s252_s13 + $0x8] sm:$0xff] %v575_v18   ;;  %v580_v22 = vpack.c.bf16 %v366_v19, %v365_v16  ;;  %v368_v23 = vmul.f32 %v664_v20, %v312_v48 }
  0x41   : > { %591 = vst [vmem:[%s252_s13 + $0x10] sm:$0xff] %v580_v22   ;;  %v585_v24 = vpack.c.bf16 %v368_v23, %v367_v21 }
  0x43   : > { %592 = vst [vmem:[%s252_s13 + $0x18] sm:$0xff] %v585_v24  }
  0x44 PF: > { %s14_s19 = sadd.s32 1, %s703_s19   ;;  %s802_s15 = smov %s695_s17 }
  0x45   : > { %p11_p7 = scmp.ge.s32.totalorder %s14_s19, 10   ;;  %s803_s16 = smov %s699_s18 }
  0x46   : > { %s804_s17 = smov %s807_s20  ;;  %s805_s18 = smov %s811_s21 }
  0x47   :  { %13 = sbr.rel (!%p11_p7) target bundleno = 3 (0x3), region = 69 }

// kernel: resnet_block_2d.7
= control target key start
LH: loop header
LB: loop body
LE: loop exit
PB: predicated region body
PF: predicated region fallthrough
CT: control target
= control target key end

     0   :  { %s992_s12 = smov 0   ;;  %s994_s13 = smov 0   ;;  %s1153_s0 = inlined_call_operand.vmem [shape: bf16[2,256,128], index: 0, kind: input, shape index: {}]   ;;  %s1154_s1 = inlined_call_operand.vmem [shape: f32[128,32], index: 1, kind: input, shape index: {}]   ;;  %s1155_s2 = inlined_call_operand.vmem [shape: f32[32,128], index: 2, kind: input, shape index: {}]   ;;  %s1156_s3 = inlined_call_operand.vmem [shape: f32[2,2,128], index: 3, kind: output, shape index: {}]  }
   0x1   :  { %s996_s14 = smov 0   ;;  %s998_s15 = smov 0  }
   0x2   :  { %s1000_s16 = smov 0  }
   0x3 LB: > { %s22_s17 = sadd.s32 1, %s958_s14  ;;  %s25_s18 = sadd.s32 1, %s962_s15  ;;  %s966_s16 = sphi %s1000_s16, %s13_s16   ;;  %s962_s15 = sphi %s998_s15, %s1160_s15   ;;  %s958_s14 = sphi %s996_s14, %s1159_s14   ;;  %s954_s13 = sphi %s994_s13, %s1158_s13   ;;  %s950_s12 = sphi %s992_s12, %s1157_s12  }
   0x4   : > { %p23_p0 = scmp.ge.s32.totalorder %s22_s17, 4  ;;  %p656_p1 = scmp.ge.s32.totalorder %s966_s16, 1 }
   0x5   : > { %p156_p2 = scmp.lt.s32.totalorder %s966_s16, 9 }
   0x6   : > { %s1162_s17 = smov (%p23_p0, %s22_s17), 0  ;;  %s1164_s18 = smov (!%p23_p0, %s25_s18), %s962_s15 }
   0x7   : > { %p157_p3 = pnand %p656_p1, %p156_p2  ;;  %p27_p4 = scmp.ge.s32.totalorder %s1164_s18, 2 }
   0x8   : > { %s657_s19 = sshll.u32 (!%p157_p3), %s950_s12, 3  ;;  %p184_p5 = scmp.lt.s32.totalorder (!%p157_p3), %s954_s13, 1 }
   0x9   : > { %s1166_s18 = smov (%p27_p4, %s1164_s18), 0  ;;  %160 = sbr.rel (%p157_p3) target bundleno = 511 (0x1ff), region = 32 }
   0xa   : > { %p186_p6 = scmp.lt.s32.totalorder (!%p157_p3), %s657_s19, 31  ;;  %p661_p7 = scmp.ne.s32.totalorder (!%p157_p3), %s950_s12, 0 }
  0x10   : > { %s1168_s13 = smov (!%p184_p5, %s954_s13), 1  ;;  %s1170_s19 = smov (!%p186_p6, %s657_s19), 31 }
  0x11   : > { %s658_s20 = sshll.u32 %s1168_s13, 5  ;;  %s660_s21 = sshll.u32 %s1168_s13, 1  ;;  %v968_v0 = vmov (!%p661_p7), 0.0  }
  0x12   : > { %s189_s22 = sadd.s32 %s658_s20, %s1170_s19  ;;  %s1028_s25 = scalar_lea.vmem %s1156_s3, %s660_s21 }
  0x13   : > { %s659_s26 = sshll.u32 %s189_s22, 2  ;;  %200 = sbr.rel (%p661_p7) target bundleno = 26 (0x1a), region = 36  ;;  %201 = vst [vmem:[%s1028_s25] sm:$0x3] (!%p661_p7), %v968_v0 }
  0x14   : > { %s191_s29 = scalar_lea.vmem %s1153_s0, %s659_s26 }
  0x1a PF: > { %v668_v1 = vld [vmem:[%s191_s29] sm:$0xff]   ;;  %v683_v2 = vld [vmem:[%s191_s29 + $0x8] sm:$0xff]   ;;  %v684_v3 = vld [vmem:[%s191_s29 + $0x10] sm:$0xff]   ;;  %p662_p8 = scmp.ne.s32.totalorder %s950_s12, 3 }
  0x1b   : > { %v669_v4 = vunpack.c.l.bf16 %v668_v1  ;;  %v670_v5 = vunpack.c.h.bf16 %v668_v1  ;;  %v673_v6 = vunpack.c.l.bf16 %v683_v2  ;;  %v674_v7 = vunpack.c.h.bf16 %v683_v2  ;;  %v685_v13 = vld [vmem:[%s191_s29 + $0x18] sm:$0xff]   ;;  %v218_v44 = vld [vmem:[%s1028_s25] sm:$0x1]  ;;  %v233_v47 = vld [vmem:[%s1028_s25 + $0x1] sm:$0x1] }
  0x1c   : > { %v677_v8 = vunpack.c.l.bf16 %v684_v3  ;;  %v678_v14 = vunpack.c.h.bf16 %v684_v3  ;;  %v681_v18 = vunpack.c.l.bf16 %v685_v13  ;;  %v682_v22 = vunpack.c.h.bf16 %v685_v13  ;;  %v262_v51 = vld [vmem:[%s1154_s1] sm:$0xff] (!%p662_p8)  ;;  %v263_v52 = vld [vmem:[%s1154_s1 + $0x8] sm:$0xff] (!%p662_p8)  ;;  %v264_v53 = vld [vmem:[%s1154_s1 + $0x10] sm:$0xff] (!%p662_p8) }
  0x1d   : > { %v219_v9 = vadd.f32 %v670_v5, %v669_v4  ;;  %v234_v10 = vmul.f32 %v669_v4, %v669_v4  ;;  %v235_v11 = vmul.f32 %v670_v5, %v670_v5  ;;  %v236_v12 = vmul.f32 %v673_v6, %v673_v6  ;;  %v265_v56 = vld [vmem:[%s1154_s1 + $0x18] sm:$0xff] (!%p662_p8)  ;;  %v266_v59 = vld [vmem:[%s1154_s1 + $0x20] sm:$0xff] (!%p662_p8)  ;;  %v267_v60 = vld [vmem:[%s1154_s1 + $0x28] sm:$0xff] (!%p662_p8) }
  0x1e   : > { %v237_v16 = vmul.f32 %v674_v7, %v674_v7  ;;  %v238_v20 = vmul.f32 %v677_v8, %v677_v8  ;;  %v239_v24 = vmul.f32 %v678_v14, %v678_v14  ;;  %v240_v27 = vmul.f32 %v681_v18, %v681_v18  ;;  %v268_v62 = vld [vmem:[%s1154_s1 + $0x30] sm:$0xff] (!%p662_p8)  ;;  %v269_v63 = vld [vmem:[%s1154_s1 + $0x38] sm:$0xff] (!%p662_p8)  ;;  %v270_v1 = vld [vmem:[%s1154_s1 + $0x40] sm:$0xff] (!%p662_p8) }
  0x1f   : > { %v220_v15 = vadd.f32 %v673_v6, %v219_v9  ;;  %v242_v17 = vadd.f32 %v235_v11, %v234_v10  ;;  %v241_v30 = vmul.f32 %v682_v22, %v682_v22  ;;  %v969_v54 = vmov (!%p662_p8), 0.0|0.0   ;;  %v271_v2 = vld [vmem:[%s1154_s1 + $0x48] sm:$0xff] (!%p662_p8)  ;;  %v272_v4 = vld [vmem:[%s1154_s1 + $0x50] sm:$0xff] (!%p662_p8)  ;;  %v273_v5 = vld [vmem:[%s1154_s1 + $0x58] sm:$0xff] (!%p662_p8) }
  0x20   : > { %822 = vmatprep.subr.bf16.mxu0 (!%p662_p8), %v969_v54  ;;  %v823_v55 = vpack.c.bf16 (!%p662_p8), %v263_v52, %v262_v51  ;;  %846 = vmatprep.subr.bf16.mxu1 (!%p662_p8), %v969_v54  ;;  %vm970_vm0 = vmmov (!%p662_p8), 0   ;;  %v971_v57 = vmov (!%p662_p8), 0.0   ;;  %v826_v58 = vpack.c.bf16 (!%p662_p8), %v265_v56, %v264_v53  ;;  %v276_v10 = vld [vmem:[%s1154_s1 + $0x70] sm:$0xff] (!%p662_p8)  ;;  %v277_v11 = vld [vmem:[%s1154_s1 + $0x78] sm:$0xff] (!%p662_p8)  ;;  %v425_v13 = vld [vmem:[%s1155_s2] sm:$0xff] (!%p662_p8) }
  0x21   : > { %v221_v19 = vadd.f32 %v674_v7, %v220_v15  ;;  %v243_v21 = vadd.f32 %v242_v17, %v236_v12  ;;  %762 = vmatprep.mubr.msk.f32.mxu0 (!%p662_p8), %vm970_vm0, %v971_v57  ;;  %797 = vmatprep.mubr.msk.f32.mxu1 (!%p662_p8), %vm970_vm0, %v971_v57  ;;  %v829_v61 = vpack.c.bf16 (!%p662_p8), %v267_v60, %v266_v59  ;;  %v274_v7 = vld [vmem:[%s1154_s1 + $0x60] sm:$0xff] (!%p662_p8)  ;;  %v428_v17 = vld [vmem:[%s1155_s2 + $0x18] sm:$0xff] (!%p662_p8)  ;;  %vm429_vm1 = vcmask (!%p662_p8), 261120  }
  0x22   : > { %824 = vmatpush3.bf16.msra.mxu0 (!%p662_p8), %v823_v55  ;;  %848 = vmatpush3.bf16.msra.mxu1 (!%p662_p8), %v823_v55  ;;  %v832_v0 = vpack.c.bf16 (!%p662_p8), %v269_v63, %v268_v62  ;;  %v835_v3 = vpack.c.bf16 (!%p662_p8), %v271_v2, %v270_v1  ;;  %v838_v6 = vpack.c.bf16 (!%p662_p8), %v273_v5, %v272_v4 }
  0x23   : > { %v222_v23 = vadd.f32 %v677_v8, %v221_v19  ;;  %v244_v25 = vadd.f32 %v243_v21, %v237_v16  ;;  %825 = vmatprep.subr.bf16.mxu0 (!%p662_p8), %v969_v54  ;;  %849 = vmatprep.subr.bf16.mxu1 (!%p662_p8), %v969_v54  ;;  %v275_v8 = vld [vmem:[%s1154_s1 + $0x68] sm:$0xff] (!%p662_p8)  ;;  %v844_v12 = vpack.c.bf16 (!%p662_p8), %v277_v11, %v276_v10  ;;  %v427_v16 = vld [vmem:[%s1155_s2 + $0x10] sm:$0xff] (!%p662_p8) }
  0x24   : > { %v841_v9 = vpack.c.bf16 (!%p662_p8), %v275_v8, %v274_v7 }
  0x25   : > { %v223_v26 = vadd.f32 %v678_v14, %v222_v23  ;;  %v245_v28 = vadd.f32 %v244_v25, %v238_v20  ;;  %v426_v14 = vld [vmem:[%s1155_s2 + $0x8] sm:$0xff] (!%p662_p8) }
  0x26   : > { %827 = vmatpush3.bf16.msra.mxu0 (!%p662_p8), %v826_v58  ;;  %851 = vmatpush3.bf16.msra.mxu1 (!%p662_p8), %v826_v58  ;;  %v871_v15 = vpack.c.bf16 (!%p662_p8), %v426_v14, %v425_v13 }
  0x27   : > { %v224_v29 = vadd.f32 %v681_v18, %v223_v26  ;;  %v246_v31 = vadd.f32 %v245_v28, %v239_v24  ;;  %828 = vmatprep.subr.bf16.mxu0 (!%p662_p8), %v969_v54  ;;  %852 = vmatprep.subr.bf16.mxu1 (!%p662_p8), %v969_v54  ;;  %v874_v18 = vpack.c.bf16 (!%p662_p8), %v428_v17, %v427_v16 }
  0x29   : > { %v225_v32 = vadd.f32 %v682_v22, %v224_v29  ;;  %v247_v33 = vadd.f32 %v246_v31, %v240_v27 }
  0x2a   : > { %830 = vmatpush3.bf16.msra.mxu0 (!%p662_p8), %v829_v61  ;;  %854 = vmatpush3.bf16.msra.mxu1 (!%p662_p8), %v829_v61 }
  0x2b   : > { %v226_v34 = vrot.slane %v225_v32, 4  ;;  %v248_v35 = vadd.f32 %v247_v33, %v241_v30  ;;  %831 = vmatprep.subr.bf16.mxu0 (!%p662_p8), %v969_v54  ;;  %855 = vmatprep.subr.bf16.mxu1 (!%p662_p8), %v969_v54 }
  0x2d   : > { %v227_v36 = vadd.f32 %v226_v34, %v225_v32  ;;  %v249_v37 = vrot.slane %v248_v35, 4 }
  0x2e   : > { %833 = vmatpush3.bf16.msra.mxu0 (!%p662_p8), %v832_v0  ;;  %857 = vmatpush3.bf16.msra.mxu1 (!%p662_p8), %v832_v0 }
  0x2f   : > { %v228_v38 = vrot.slane %v227_v36, 2  ;;  %v250_v39 = vadd.f32 %v249_v37, %v248_v35  ;;  %834 = vmatprep.subr.bf16.mxu0 (!%p662_p8), %v969_v54  ;;  %858 = vmatprep.subr.bf16.mxu1 (!%p662_p8), %v969_v54 }
  0x31   : > { %v229_v40 = vadd.f32 %v228_v38, %v227_v36  ;;  %v251_v41 = vrot.slane %v250_v39, 2 }
  0x32   : > { %836 = vmatpush3.bf16.msra.mxu0 (!%p662_p8), %v835_v3  ;;  %860 = vmatpush3.bf16.msra.mxu1 (!%p662_p8), %v835_v3 }
  0x33   : > { %v230_v42 = vrot.slane %v229_v40, 1  ;;  %v252_v43 = vadd.f32 %v251_v41, %v250_v39  ;;  %837 = vmatprep.subr.bf16.mxu0 (!%p662_p8), %v969_v54  ;;  %861 = vmatprep.subr.bf16.mxu1 (!%p662_p8), %v969_v54 }
  0x35   : > { %v231_v45 = vadd.f32 %v230_v42, %v229_v40  ;;  %v253_v46 = vrot.slane %v252_v43, 1  ;;  %261 = sbr.rel (%p662_p8) target bundleno = 511 (0x1ff), region = 40 }
  0x36   : > { %839 = vmatpush3.bf16.msra.mxu0 (!%p662_p8), %v838_v6  ;;  %863 = vmatpush3.bf16.msra.mxu1 (!%p662_p8), %v838_v6 }
  0x37   : > { %v1037_v48 = vadd.f32 %v231_v45, %v218_v44  ;;  %v254_v49 = vadd.f32 %v253_v46, %v252_v43  ;;  %840 = vmatprep.subr.bf16.mxu0 (!%p662_p8), %v969_v54  ;;  %864 = vmatprep.subr.bf16.mxu1 (!%p662_p8), %v969_v54 }
  0x39   : > { %256 = vst [vmem:[%s1028_s25] sm:$0x1] %v1037_v48  ;;  %v1041_v50 = vadd.f32 %v254_v49, %v233_v47 }
  0x3a   : > { %842 = vmatpush3.bf16.msra.mxu0 (!%p662_p8), %v841_v9  ;;  %866 = vmatpush3.bf16.msra.mxu1 (!%p662_p8), %v841_v9 }
  0x3b   : > { %257 = vst [vmem:[%s1028_s25 + $0x1] sm:$0x1] %v1041_v50  ;;  %843 = vmatprep.subr.bf16.mxu0 (!%p662_p8), %v969_v54  ;;  %867 = vmatprep.subr.bf16.mxu1 (!%p662_p8), %v969_v54 }
  0x3e   : > { %845 = vmatpush3.bf16.msra.mxu0 %v844_v12  ;;  %869 = vmatpush3.bf16.msra.mxu1 %v844_v12 }
  0x3f   : > { %870 = vmatprep.subr.bf16.mxu0 %v969_v54  ;;  %876 = vmatprep.subr.bf16.mxu1 %v969_v54 }
  0x41   : > { %763 = vmatmul.mubr.f32.vlgmr.msra.gmra.mrb[0].mxu0 %v1037_v48  ;;  %798 = vmatmul.mubr.f32.vlgmr.msra.gmra.mrb[0].mxu1 %v1041_v50 }
  0x42   : > { %872 = vmatpush3.bf16.msra.mxu0 %v871_v15  ;;  %808 = vmatprep.mubr.msk.f32.mxu0 %vm970_vm0, %v971_v57 }
  0x43   : > { %873 = vmatprep.subr.bf16.mxu0 %v969_v54  ;;  %878 = vmatpush3.bf16.msra.mxu1 %v871_v15 }
  0x44   : > { %879 = vmatprep.subr.bf16.mxu1 %v969_v54  ;;  %819 = vmatprep.mubr.msk.f32.mxu1 %vm970_vm0, %v971_v57 }
  0x46   : > { %875 = vmatpush3.bf16.msra.mxu0 %v874_v18 }
  0x47   : > { %881 = vmatpush3.bf16.msra.mxu1 %v874_v18 }
 0x114   : > { %v344_v19 = vpop.f32.mrb[0].mxu0  ;;  %v414_v20 = vpop.f32.mrb[0].mxu1 }
 0x115   : > { %v418_v21 = vmul.f32 0.0009765625, %v344_v19  ;;  %v764_v22 = vpop.f32.mrb[1].mxu0  ;;  %v419_v23 = vmul.f32 0.0009765625, %v414_v20  ;;  %v799_v24 = vpop.f32.mrb[1].mxu1 }
 0x117   : > { %v420_v25 = vmul.f32 %v418_v21, %v418_v21  ;;  %809 = vmatmul.mubr.msk.f32.vlgmr.msra.gmra.mrb[2].mxu0 %vm429_vm1, %v418_v21 }
 0x119   : > { %v421_v26 = vsub.f32 %v419_v23, %v420_v25 }
 0x11b   : > { %v422_v27 = vmax.f32 %v421_v26, 0.0 }
 0x11d   : > { %v423_v28 = vadd.f32 1e-06, %v422_v27 }
 0x11f   : > { %926 = vrsqrt.f32 %v423_v28 }
 0x129   : > { %v927_v29 = vpop.eup %926 }
 0x12a   : > { %820 = vmatmul.mubr.msk.f32.vlgmr.msra.gmra.mrb[2].mxu1 %vm429_vm1, %v927_v29 }
 0x1ea   : > { %v499_v30 = vpop.f32.mrb[2].mxu0 }
 0x1eb   : > { %503 = vst [vmem:[%s1028_s25] sm:$0x1] %v499_v30  ;;  %v810_v31 = vpop.f32.mrb[3].mxu0 }
 0x1fd   : > { %v577_v32 = vpop.f32.mrb[2].mxu1 }
 0x1fe   : > { %581 = vst [vmem:[%s1028_s25 + $0x1] sm:$0x1] %v577_v32  ;;  %v821_v33 = vpop.f32.mrb[3].mxu1 }
 0x1ff PF: > { %s13_s16 = sadd.s32 1, %s966_s16   ;;  %s1157_s12 = smov %s958_s14 }
 0x200   : > { %p10_p9 = scmp.ge.s32.totalorder %s13_s16, 10   ;;  %s1158_s13 = smov %s962_s15 }
 0x201   : > { %s1159_s14 = smov %s1162_s17  ;;  %s1160_s15 = smov %s1166_s18 }
 0x202   :  { %12 = sbr.rel (!%p10_p9) target bundleno = 3 (0x3), region = 70 }

// kernel: resnet_block_2d.10
= control target key start
LH: loop header
LB: loop body
LE: loop exit
PB: predicated region body
PF: predicated region fallthrough
CT: control target
= control target key end

     0   :  { %v148_v0 = vmov 0.0   ;;  %vm149_vm0 = vmmov 0   ;;  %vm64_vm1 = vcmask 523264   ;;  %s191_s1 = inlined_call_operand.vmem [shape: bf16[64,128], index: 1, kind: input, shape index: {}]   ;;  %s192_s0 = inlined_call_operand.vmem [shape: bf16[2,64], index: 0, kind: input, shape index: {}]   ;;  %s193_s2 = inlined_call_operand.vmem [shape: f32[1,128], index: 2, kind: input, shape index: {}]   ;;  %s194_s3 = inlined_call_operand.vmem [shape: bf16[2,128], index: 3, kind: output, shape index: {}]  }
   0x1   :  { %126 = vmatprep.subr.bf16.mxu0 %v148_v0  ;;  %v140_v1 = vld [vmem:[%s191_s1] sm:$0xff]   ;;  %134 = vmatprep.mubr.msk.bf16.mxu0 %vm149_vm0, %v148_v0  ;;  %v141_v2 = vld [vmem:[%s191_s1 + $0x8] sm:$0xff]   ;;  %v142_v5 = vld [vmem:[%s191_s1 + $0x10] sm:$0xff]  }
   0x2   :  { %127 = vmatpush3.bf16.msra.mxu0 %v140_v1  ;;  %v15_v3 = vld [vmem:[%s192_s0] sm:$0x1]  ;;  %v143_v7 = vld [vmem:[%s191_s1 + $0x18] sm:$0xff]  }
   0x3   :  { %128 = vmatprep.subr.bf16.mxu0 %v148_v0  ;;  %v16_v4 = vunpack.c.l.bf16 %v15_v3  ;;  %v115_v13 = vld [vmem:[%s193_s2] ss:$0 sm:$0xff] }
   0x5   :  { %v114_v6 = vmul.f32 -1.442695, %v16_v4 }
   0x6   :  { %129 = vmatpush3.bf16.msra.mxu0 %v141_v2 }
   0x7   :  { %130 = vmatprep.subr.bf16.mxu0 %v148_v0  ;;  %144 = vpow2.f32 %v114_v6 }
   0xa   :  { %131 = vmatpush3.bf16.msra.mxu0 %v142_v5 }
   0xb   :  { %132 = vmatprep.subr.bf16.mxu0 %v148_v0 }
   0xe   :  { %133 = vmatpush3.bf16.msra.mxu0 %v143_v7 }
  0x11   :  { %v145_v8 = vpop.eup %144 }
  0x12   :  { %v20_v9 = vadd.f32 1.0, %v145_v8 }
  0x14   :  { %146 = vrcp.f32 %v20_v9 }
  0x1e   :  { %v147_v10 = vpop.eup %146 }
  0x1f   :  { %v23_v11 = vmul.f32 %v147_v10, %v16_v4 }
  0x21   :  { %v24_v12 = vpack.c.bf16 %v23_v11, %v23_v11 }
  0x23   :  { %135 = vmatmul.mubr.msk.bf16.vlgmr.msra.gmra.mrb[0].mxu0 %vm64_vm1, %v24_v12 }
  0xf6   :  { %v102_v14 = vpop.f32.mrb[0].mxu0 }
  0xf7   :  { %v103_v15 = vadd.f32 %v115_v13, %v102_v14  ;;  %v136_v16 = vpop.f32.mrb[1].mxu0 }
  0xf8   :  { %v105_v17 = vpop.f32.mrb[2].mxu0 }
  0xf9   :  { %v108_v18 = vpack.c.bf16 %v103_v15, %v103_v15  ;;  %v137_v19 = vpop.f32.mrb[3].mxu0 }
  0xfb   :  { %109 = vst [vmem:[%s194_s3] sm:$0x1] %v108_v18 }

// kernel: resnet_block_2d.11
= control target key start
LH: loop header
LB: loop body
LE: loop exit
PB: predicated region body
PF: predicated region fallthrough
CT: control target
= control target key end

     0   :  { %s1063_s15 = smov 0   ;;  %s1065_s16 = smov 0   ;;  %s1227_s0 = inlined_call_operand.vmem [shape: bf16[2,256,128], index: 0, kind: input, shape index: {}]   ;;  %s1228_s1 = inlined_call_operand.vmem [shape: f32[2,1,128], index: 1, kind: input, shape index: {}]   ;;  %s1229_s2 = inlined_call_operand.vmem [shape: f32[128,32], index: 2, kind: input, shape index: {}]   ;;  %s1230_s3 = inlined_call_operand.vmem [shape: f32[32,128], index: 3, kind: input, shape index: {}]   ;;  %s1231_s4 = inlined_call_operand.vmem [shape: f32[2,2,128], index: 4, kind: output, shape index: {}]  }
   0x1   :  { %s1067_s17 = smov 0   ;;  %s1069_s18 = smov 0  }
   0x2   :  { %s1071_s19 = smov 0  }
   0x3 LB: > { %s23_s20 = sadd.s32 1, %s1024_s17  ;;  %s26_s21 = sadd.s32 1, %s1028_s18  ;;  %s1032_s19 = sphi %s1071_s19, %s14_s19   ;;  %s1028_s18 = sphi %s1069_s18, %s1235_s18   ;;  %s1024_s17 = sphi %s1067_s17, %s1234_s17   ;;  %s1020_s16 = sphi %s1065_s16, %s1233_s16   ;;  %s1016_s15 = sphi %s1063_s15, %s1232_s15  }
   0x4   : > { %p24_p0 = scmp.ge.s32.totalorder %s23_s20, 4  ;;  %p721_p1 = scmp.ge.s32.totalorder %s1032_s19, 1 }
   0x5   : > { %p189_p2 = scmp.lt.s32.totalorder %s1032_s19, 9 }
   0x6   : > { %s1237_s20 = smov (%p24_p0, %s23_s20), 0  ;;  %s1239_s21 = smov (!%p24_p0, %s26_s21), %s1028_s18 }
   0x7   : > { %p190_p3 = pnand %p721_p1, %p189_p2  ;;  %p28_p4 = scmp.ge.s32.totalorder %s1239_s21, 2 }
   0x8   : > { %s722_s22 = sshll.u32 (!%p190_p3), %s1016_s15, 3  ;;  %p222_p5 = scmp.lt.s32.totalorder (!%p190_p3), %s1020_s16, 1 }
   0x9   : > { %s1241_s21 = smov (%p28_p4, %s1239_s21), 0  ;;  %193 = sbr.rel (%p190_p3) target bundleno = 514 (0x202), region = 36 }
   0xa   : > { %p224_p6 = scmp.lt.s32.totalorder (!%p190_p3), %s722_s22, 31  ;;  %p726_p7 = scmp.ne.s32.totalorder (!%p190_p3), %s1016_s15, 0 }
  0x10   : > { %s1243_s16 = smov (!%p222_p5, %s1020_s16), 1  ;;  %s1245_s22 = smov (!%p224_p6, %s722_s22), 31 }
  0x11   : > { %s723_s23 = sshll.u32 %s1243_s16, 5  ;;  %s233_s26 = scalar_lea.vmem %s1228_s1, %s1243_s16  ;;  %v1034_v0 = vmov (!%p726_p7), 0.0  }
  0x12   : > { %s227_s27 = sadd.s32 %s723_s23, %s1245_s22  ;;  %s725_s28 = sshll.u32 %s1243_s16, 1 }
  0x13   : > { %s724_s29 = sshll.u32 %s227_s27, 2  ;;  %s1102_s6 = scalar_lea.vmem %s1231_s4, %s725_s28 }
  0x14   : > { %s229_s9 = scalar_lea.vmem %s1227_s0, %s724_s29  ;;  %241 = sbr.rel (%p726_p7) target bundleno = 27 (0x1b), region = 40  ;;  %242 = vst [vmem:[%s1102_s6] sm:$0x3] (!%p726_p7), %v1034_v0 }
  0x1b PF: > { %v734_v1 = vld [vmem:[%s229_s9] sm:$0xff]   ;;  %v749_v2 = vld [vmem:[%s229_s9 + $0x8] sm:$0xff]   ;;  %v750_v3 = vld [vmem:[%s229_s9 + $0x10] sm:$0xff]   ;;  %p728_p8 = scmp.ne.s32.totalorder %s1016_s15, 3 }
  0x1c   : > { %v735_v4 = vunpack.c.l.bf16 %v734_v1  ;;  %v736_v5 = vunpack.c.h.bf16 %v734_v1  ;;  %v739_v6 = vunpack.c.l.bf16 %v749_v2  ;;  %v740_v7 = vunpack.c.h.bf16 %v749_v2  ;;  %v751_v8 = vld [vmem:[%s229_s9 + $0x18] sm:$0xff]   ;;  %v727_v9 = vld [vmem:[%s233_s26] ss:$0 sm:$0xff]  ;;  %v289_v56 = vld [vmem:[%s1102_s6 + $0x1] sm:$0x1] }
  0x1d   : > { %v743_v10 = vunpack.c.l.bf16 %v750_v3  ;;  %v744_v11 = vunpack.c.h.bf16 %v750_v3  ;;  %v747_v16 = vunpack.c.l.bf16 %v751_v8  ;;  %v748_v22 = vunpack.c.h.bf16 %v751_v8  ;;  %v274_v53 = vld [vmem:[%s1102_s6] sm:$0x1]  ;;  %v319_v61 = vld [vmem:[%s1229_s2 + $0x8] sm:$0xff] (!%p728_p8)  ;;  %v320_v62 = vld [vmem:[%s1229_s2 + $0x10] sm:$0xff] (!%p728_p8) }
  0x1e   : > { %v266_v12 = vadd.f32 %v735_v4, %v727_v9  ;;  %v267_v13 = vadd.f32 %v736_v5, %v727_v9  ;;  %v268_v14 = vadd.f32 %v739_v6, %v727_v9  ;;  %v269_v15 = vadd.f32 %v740_v7, %v727_v9  ;;  %v318_v60 = vld [vmem:[%s1229_s2] sm:$0xff] (!%p728_p8)  ;;  %v321_v1 = vld [vmem:[%s1229_s2 + $0x18] sm:$0xff] (!%p728_p8)  ;;  %v323_v5 = vld [vmem:[%s1229_s2 + $0x28] sm:$0xff] (!%p728_p8) }
  0x1f   : > { %v270_v17 = vadd.f32 %v743_v10, %v727_v9  ;;  %v271_v23 = vadd.f32 %v744_v11, %v727_v9  ;;  %v272_v27 = vadd.f32 %v747_v16, %v727_v9  ;;  %v273_v31 = vadd.f32 %v748_v22, %v727_v9  ;;  %v322_v4 = vld [vmem:[%s1229_s2 + $0x20] sm:$0xff] (!%p728_p8)  ;;  %v324_v7 = vld [vmem:[%s1229_s2 + $0x30] sm:$0xff] (!%p728_p8)  ;;  %v325_v8 = vld [vmem:[%s1229_s2 + $0x38] sm:$0xff] (!%p728_p8) }
  0x20   : > { %v275_v18 = vadd.f32 %v267_v13, %v266_v12  ;;  %v290_v19 = vmul.f32 %v266_v12, %v266_v12  ;;  %v291_v20 = vmul.f32 %v267_v13, %v267_v13  ;;  %v292_v21 = vmul.f32 %v268_v14, %v268_v14  ;;  %v326_v10 = vld [vmem:[%s1229_s2 + $0x40] sm:$0xff] (!%p728_p8)  ;;  %v327_v11 = vld [vmem:[%s1229_s2 + $0x48] sm:$0xff] (!%p728_p8)  ;;  %v328_v13 = vld [vmem:[%s1229_s2 + $0x50] sm:$0xff] (!%p728_p8) }
  0x21   : > { %v293_v25 = vmul.f32 %v269_v15, %v269_v15  ;;  %v294_v29 = vmul.f32 %v270_v17, %v270_v17  ;;  %v295_v33 = vmul.f32 %v271_v23, %v271_v23  ;;  %v296_v36 = vmul.f32 %v272_v27, %v272_v27  ;;  %v330_v16 = vld [vmem:[%s1229_s2 + $0x60] sm:$0xff] (!%p728_p8) }
  0x22   : > { %v276_v24 = vadd.f32 %v275_v18, %v268_v14  ;;  %v298_v26 = vadd.f32 %v291_v20, %v290_v19  ;;  %v297_v39 = vmul.f32 %v273_v31, %v273_v31  ;;  %v1035_v63 = vmov (!%p728_p8), 0.0|0.0   ;;  %v329_v14 = vld [vmem:[%s1229_s2 + $0x58] sm:$0xff] (!%p728_p8)  ;;  %v332_v19 = vld [vmem:[%s1229_s2 + $0x70] sm:$0xff] (!%p728_p8)  ;;  %v481_v22 = vld [vmem:[%s1230_s3] sm:$0xff] (!%p728_p8) }
  0x23   : > { %888 = vmatprep.subr.bf16.mxu0 (!%p728_p8), %v1035_v63  ;;  %v889_v0 = vpack.c.bf16 (!%p728_p8), %v319_v61, %v318_v60  ;;  %912 = vmatprep.subr.bf16.mxu1 (!%p728_p8), %v1035_v63  ;;  %vm1036_vm0 = vmmov (!%p728_p8), 0   ;;  %v1037_v2 = vmov (!%p728_p8), 0.0   ;;  %v892_v3 = vpack.c.bf16 (!%p728_p8), %v321_v1, %v320_v62  ;;  %v333_v20 = vld [vmem:[%s1229_s2 + $0x78] sm:$0xff] (!%p728_p8) }
  0x24   : > { %v277_v28 = vadd.f32 %v276_v24, %v269_v15  ;;  %v299_v30 = vadd.f32 %v298_v26, %v292_v21  ;;  %828 = vmatprep.mubr.msk.f32.mxu0 (!%p728_p8), %vm1036_vm0, %v1037_v2  ;;  %863 = vmatprep.mubr.msk.f32.mxu1 (!%p728_p8), %vm1036_vm0, %v1037_v2  ;;  %v895_v6 = vpack.c.bf16 (!%p728_p8), %v323_v5, %v322_v4  ;;  %v484_v26 = vld [vmem:[%s1230_s3 + $0x18] sm:$0xff] (!%p728_p8)  ;;  %vm485_vm1 = vcmask (!%p728_p8), 261120  }
  0x25   : > { %890 = vmatpush3.bf16.msra.mxu0 (!%p728_p8), %v889_v0  ;;  %914 = vmatpush3.bf16.msra.mxu1 (!%p728_p8), %v889_v0  ;;  %v898_v9 = vpack.c.bf16 (!%p728_p8), %v325_v8, %v324_v7  ;;  %v901_v12 = vpack.c.bf16 (!%p728_p8), %v327_v11, %v326_v10  ;;  %v904_v15 = vpack.c.bf16 (!%p728_p8), %v329_v14, %v328_v13 }
  0x26   : > { %v278_v32 = vadd.f32 %v277_v28, %v270_v17  ;;  %v300_v34 = vadd.f32 %v299_v30, %v293_v25  ;;  %891 = vmatprep.subr.bf16.mxu0 (!%p728_p8), %v1035_v63  ;;  %915 = vmatprep.subr.bf16.mxu1 (!%p728_p8), %v1035_v63  ;;  %v331_v17 = vld [vmem:[%s1229_s2 + $0x68] sm:$0xff] (!%p728_p8)  ;;  %v910_v21 = vpack.c.bf16 (!%p728_p8), %v333_v20, %v332_v19  ;;  %v483_v25 = vld [vmem:[%s1230_s3 + $0x10] sm:$0xff] (!%p728_p8) }
  0x27   : > { %v907_v18 = vpack.c.bf16 (!%p728_p8), %v331_v17, %v330_v16 }
  0x28   : > { %v279_v35 = vadd.f32 %v278_v32, %v271_v23  ;;  %v301_v37 = vadd.f32 %v300_v34, %v294_v29  ;;  %v482_v23 = vld [vmem:[%s1230_s3 + $0x8] sm:$0xff] (!%p728_p8) }
  0x29   : > { %893 = vmatpush3.bf16.msra.mxu0 (!%p728_p8), %v892_v3  ;;  %917 = vmatpush3.bf16.msra.mxu1 (!%p728_p8), %v892_v3  ;;  %v937_v24 = vpack.c.bf16 (!%p728_p8), %v482_v23, %v481_v22 }
  0x2a   : > { %v280_v38 = vadd.f32 %v279_v35, %v272_v27  ;;  %v302_v40 = vadd.f32 %v301_v37, %v295_v33  ;;  %894 = vmatprep.subr.bf16.mxu0 (!%p728_p8), %v1035_v63  ;;  %918 = vmatprep.subr.bf16.mxu1 (!%p728_p8), %v1035_v63  ;;  %v940_v27 = vpack.c.bf16 (!%p728_p8), %v484_v26, %v483_v25 }
  0x2c   : > { %v281_v41 = vadd.f32 %v280_v38, %v273_v31  ;;  %v303_v42 = vadd.f32 %v302_v40, %v296_v36 }
  0x2d   : > { %896 = vmatpush3.bf16.msra.mxu0 (!%p728_p8), %v895_v6  ;;  %920 = vmatpush3.bf16.msra.mxu1 (!%p728_p8), %v895_v6 }
  0x2e   : > { %v282_v43 = vrot.slane %v281_v41, 4  ;;  %v304_v44 = vadd.f32 %v303_v42, %v297_v39  ;;  %897 = vmatprep.subr.bf16.mxu0 (!%p728_p8), %v1035_v63  ;;  %921 = vmatprep.subr.bf16.mxu1 (!%p728_p8), %v1035_v63 }
  0x30   : > { %v283_v45 = vadd.f32 %v282_v43, %v281_v41  ;;  %v305_v46 = vrot.slane %v304_v44, 4 }
  0x31   : > { %899 = vmatpush3.bf16.msra.mxu0 (!%p728_p8), %v898_v9  ;;  %923 = vmatpush3.bf16.msra.mxu1 (!%p728_p8), %v898_v9 }
  0x32   : > { %v284_v47 = vrot.slane %v283_v45, 2  ;;  %v306_v48 = vadd.f32 %v305_v46, %v304_v44  ;;  %900 = vmatprep.subr.bf16.mxu0 (!%p728_p8), %v1035_v63  ;;  %924 = vmatprep.subr.bf16.mxu1 (!%p728_p8), %v1035_v63 }
  0x34   : > { %v285_v49 = vadd.f32 %v284_v47, %v283_v45  ;;  %v307_v50 = vrot.slane %v306_v48, 2 }
  0x35   : > { %902 = vmatpush3.bf16.msra.mxu0 (!%p728_p8), %v901_v12  ;;  %926 = vmatpush3.bf16.msra.mxu1 (!%p728_p8), %v901_v12 }
  0x36   : > { %v286_v51 = vrot.slane %v285_v49, 1  ;;  %v308_v52 = vadd.f32 %v307_v50, %v306_v48  ;;  %903 = vmatprep.subr.bf16.mxu0 (!%p728_p8), %v1035_v63  ;;  %927 = vmatprep.subr.bf16.mxu1 (!%p728_p8), %v1035_v63 }
  0x38   : > { %v287_v54 = vadd.f32 %v286_v51, %v285_v49  ;;  %v309_v55 = vrot.slane %v308_v52, 1  ;;  %317 = sbr.rel (%p728_p8) target bundleno = 514 (0x202), region = 44 }
  0x39   : > { %905 = vmatpush3.bf16.msra.mxu0 (!%p728_p8), %v904_v15  ;;  %929 = vmatpush3.bf16.msra.mxu1 (!%p728_p8), %v904_v15 }
  0x3a   : > { %v1111_v57 = vadd.f32 %v287_v54, %v274_v53  ;;  %v310_v58 = vadd.f32 %v309_v55, %v308_v52  ;;  %906 = vmatprep.subr.bf16.mxu0 (!%p728_p8), %v1035_v63  ;;  %930 = vmatprep.subr.bf16.mxu1 (!%p728_p8), %v1035_v63 }
  0x3c   : > { %312 = vst [vmem:[%s1102_s6] sm:$0x1] %v1111_v57  ;;  %v1115_v59 = vadd.f32 %v310_v58, %v289_v56 }
  0x3d   : > { %908 = vmatpush3.bf16.msra.mxu0 (!%p728_p8), %v907_v18  ;;  %932 = vmatpush3.bf16.msra.mxu1 (!%p728_p8), %v907_v18 }
  0x3e   : > { %313 = vst [vmem:[%s1102_s6 + $0x1] sm:$0x1] %v1115_v59  ;;  %909 = vmatprep.subr.bf16.mxu0 (!%p728_p8), %v1035_v63  ;;  %933 = vmatprep.subr.bf16.mxu1 (!%p728_p8), %v1035_v63 }
  0x41   : > { %911 = vmatpush3.bf16.msra.mxu0 %v910_v21  ;;  %935 = vmatpush3.bf16.msra.mxu1 %v910_v21 }
  0x42   : > { %936 = vmatprep.subr.bf16.mxu0 %v1035_v63  ;;  %942 = vmatprep.subr.bf16.mxu1 %v1035_v63 }
  0x44   : > { %829 = vmatmul.mubr.f32.vlgmr.msra.gmra.mrb[0].mxu0 %v1111_v57  ;;  %864 = vmatmul.mubr.f32.vlgmr.msra.gmra.mrb[0].mxu1 %v1115_v59 }
  0x45   : > { %938 = vmatpush3.bf16.msra.mxu0 %v937_v24  ;;  %874 = vmatprep.mubr.msk.f32.mxu0 %vm1036_vm0, %v1037_v2 }
  0x46   : > { %939 = vmatprep.subr.bf16.mxu0 %v1035_v63  ;;  %944 = vmatpush3.bf16.msra.mxu1 %v937_v24 }
  0x47   : > { %945 = vmatprep.subr.bf16.mxu1 %v1035_v63  ;;  %885 = vmatprep.mubr.msk.f32.mxu1 %vm1036_vm0, %v1037_v2 }
  0x49   : > { %941 = vmatpush3.bf16.msra.mxu0 %v940_v27 }
  0x4a   : > { %947 = vmatpush3.bf16.msra.mxu1 %v940_v27 }
 0x117   : > { %v400_v28 = vpop.f32.mrb[0].mxu0  ;;  %v470_v29 = vpop.f32.mrb[0].mxu1 }
 0x118   : > { %v474_v30 = vmul.f32 0.0009765625, %v400_v28  ;;  %v830_v31 = vpop.f32.mrb[1].mxu0  ;;  %v475_v32 = vmul.f32 0.0009765625, %v470_v29  ;;  %v865_v33 = vpop.f32.mrb[1].mxu1 }
 0x11a   : > { %v476_v34 = vmul.f32 %v474_v30, %v474_v30  ;;  %875 = vmatmul.mubr.msk.f32.vlgmr.msra.gmra.mrb[2].mxu0 %vm485_vm1, %v474_v30 }
 0x11c   : > { %v477_v35 = vsub.f32 %v475_v32, %v476_v34 }
 0x11e   : > { %v478_v36 = vmax.f32 %v477_v35, 0.0 }
 0x120   : > { %v479_v37 = vadd.f32 1e-06, %v478_v36 }
 0x122   : > { %992 = vrsqrt.f32 %v479_v37 }
 0x12c   : > { %v993_v38 = vpop.eup %992 }
 0x12d   : > { %886 = vmatmul.mubr.msk.f32.vlgmr.msra.gmra.mrb[2].mxu1 %vm485_vm1, %v993_v38 }
 0x1ed   : > { %v555_v39 = vpop.f32.mrb[2].mxu0 }
 0x1ee   : > { %559 = vst [vmem:[%s1102_s6] sm:$0x1] %v555_v39  ;;  %v876_v40 = vpop.f32.mrb[3].mxu0 }
 0x200   : > { %v633_v41 = vpop.f32.mrb[2].mxu1 }
 0x201   : > { %637 = vst [vmem:[%s1102_s6 + $0x1] sm:$0x1] %v633_v41  ;;  %v887_v42 = vpop.f32.mrb[3].mxu1 }
 0x202 PF: > { %s14_s19 = sadd.s32 1, %s1032_s19   ;;  %s1232_s15 = smov %s1024_s17 }
 0x203   : > { %p11_p9 = scmp.ge.s32.totalorder %s14_s19, 10   ;;  %s1233_s16 = smov %s1028_s18 }
 0x204   : > { %s1234_s17 = smov %s1237_s20  ;;  %s1235_s18 = smov %s1241_s21 }
 0x205   :  { %13 = sbr.rel (!%p11_p9) target bundleno = 3 (0x3), region = 77 }

// kernel: resnet_block_2d.12
= control target key start
LH: loop header
LB: loop body
LE: loop exit
PB: predicated region body
PF: predicated region fallthrough
CT: control target
= control target key end

     0   :  { %s801_s18 = smov 0   ;;  %s803_s19 = smov 0   ;;  %s871_s0 = inlined_call_operand.vmem [shape: bf16[2,256,128], index: 0, kind: input, shape index: {}]   ;;  %s872_s1 = inlined_call_operand.vmem [shape: f32[2,1,128], index: 1, kind: input, shape index: {}]   ;;  %s873_s2 = inlined_call_operand.vmem [shape: f32[2,2,128], index: 2, kind: input, shape index: {}]   ;;  %s874_s3 = inlined_call_operand.vmem [shape: f32[1,128], index: 3, kind: input, shape index: {}]   ;;  %s875_s4 = inlined_call_operand.vmem [shape: f32[1,128], index: 4, kind: input, shape index: {}]   ;;  %s876_s5 = inlined_call_operand.vmem [shape: bf16[2,256,128], index: 5, kind: output, shape index: {}]  }
   0x1   :  { %s805_s20 = smov 0   ;;  %s807_s21 = smov 0  }
   0x2   :  { %s809_s22 = smov 0  }
   0x3 LB: > { %s24_s23 = sadd.s32 1, %s761_s20  ;;  %s27_s24 = sadd.s32 1, %s765_s21  ;;  %s769_s22 = sphi %s809_s22, %s15_s22   ;;  %s765_s21 = sphi %s807_s21, %s880_s21   ;;  %s761_s20 = sphi %s805_s20, %s879_s20   ;;  %s757_s19 = sphi %s803_s19, %s878_s19   ;;  %s753_s18 = sphi %s801_s18, %s877_s18  }
   0x4   : > { %p25_p0 = scmp.ge.s32.totalorder %s24_s23, 4  ;;  %p580_p1 = scmp.ge.s32.totalorder %s769_s22, 1 }
   0x5   : > { %p225_p2 = scmp.lt.s32.totalorder %s769_s22, 9 }
   0x6   : > { %s882_s23 = smov (%p25_p0, %s24_s23), 0  ;;  %s884_s24 = smov (!%p25_p0, %s27_s24), %s765_s21 }
   0x7   : > { %p226_p3 = pnand %p580_p1, %p225_p2  ;;  %p29_p4 = scmp.ge.s32.totalorder %s884_s24, 2 }
   0x8   : > { %s581_s25 = sshll.u32 (!%p226_p3), %s753_s18, 3  ;;  %p269_p5 = scmp.lt.s32.totalorder (!%p226_p3), %s757_s19, 1  ;;  %v342_v0 = vlaneseq (!%p226_p3)  ;;  %v340_v2 = vld [vmem:[%s874_s3] sm:$0x1] (!%p226_p3) }
   0x9   : > { %s886_s24 = smov (%p29_p4, %s884_s24), 0  ;;  %229 = sbr.rel (%p226_p3) target bundleno = 70 (0x46), region = 40 }
   0xa   : > { %p271_p6 = scmp.lt.s32.totalorder (!%p226_p3), %s581_s25, 31  ;;  %v343_v1 = vshrl.u32 (!%p226_p3), %v342_v0, 7  ;;  %v590_v32 = vld [vmem:[%s875_s4] ss:$0 sm:$0xff] (!%p226_p3) }
   0xc   : > { %v344_v5 = vsub.s32 (!%p226_p3), 0, %v343_v1 }
  0x10   : > { %s888_s19 = smov (!%p269_p5, %s757_s19), 1  ;;  %s890_s25 = smov (!%p271_p6, %s581_s25), 31 }
  0x11   : > { %s582_s26 = sshll.u32 %s888_s19, 5  ;;  %s280_s29 = scalar_lea.vmem %s872_s1, %s888_s19 }
  0x12   : > { %s834_s30 = sadd.s32 %s582_s26, %s890_s25  ;;  %s584_s6 = sshll.u32 %s888_s19, 1  ;;  %v588_v3 = vld [vmem:[%s280_s29] ss:$0 sm:$0xff] }
  0x13   : > { %s583_s9 = sshll.u32 %s834_s30, 2  ;;  %s284_s12 = scalar_lea.vmem %s873_s2, %s584_s6 }
  0x14   : > { %s276_s15 = scalar_lea.vmem %s871_s0, %s583_s9  ;;  %v327_v4 = vld [vmem:[%s284_s12 + $0x1] sm:$0x1]  ;;  %v589_v19 = vld [vmem:[%s284_s12] ss:$0 sm:$0xff]  ;;  %s293_s25 = scalar_lea.vmem %s876_s5, %s583_s9 }
  0x15   : > { %v618_v6 = vld [vmem:[%s276_s15] sm:$0xff]   ;;  %v653_v7 = vld [vmem:[%s276_s15 + $0x8] sm:$0xff]   ;;  %v654_v8 = vld [vmem:[%s276_s15 + $0x10] sm:$0xff]   ;;  %v341_v9 = vmul.f32 %v340_v2, %v327_v4 }
  0x16   : > { %v619_v10 = vunpack.c.l.bf16 %v618_v6  ;;  %v620_v11 = vunpack.c.h.bf16 %v618_v6  ;;  %v623_v12 = vunpack.c.l.bf16 %v653_v7  ;;  %v624_v13 = vunpack.c.h.bf16 %v653_v7  ;;  %v655_v14 = vld [vmem:[%s276_s15 + $0x18] sm:$0xff]  }
  0x17   : > { %v627_v15 = vunpack.c.l.bf16 %v654_v8  ;;  %v628_v16 = vunpack.c.h.bf16 %v654_v8  ;;  %v631_v17 = vunpack.c.l.bf16 %v655_v14  ;;  %v632_v18 = vunpack.c.h.bf16 %v655_v14 }
  0x18   : > { %v318_v20 = vadd.f32 %v619_v10, %v588_v3  ;;  %v319_v21 = vadd.f32 %v620_v11, %v588_v3  ;;  %v345_v22 = vrot.slane %v341_v9, %v344_v5  ;;  %v320_v23 = vadd.f32 %v623_v12, %v588_v3 }
  0x19   : > { %v321_v24 = vadd.f32 %v624_v13, %v588_v3  ;;  %v322_v25 = vadd.f32 %v627_v15, %v588_v3  ;;  %v323_v26 = vadd.f32 %v628_v16, %v588_v3  ;;  %v324_v27 = vadd.f32 %v631_v17, %v588_v3 }
  0x1a   : > { %v332_v28 = vsub.f32 %v318_v20, %v589_v19  ;;  %v333_v29 = vsub.f32 %v319_v21, %v589_v19  ;;  %v334_v30 = vsub.f32 %v320_v23, %v589_v19  ;;  %v325_v31 = vadd.f32 %v632_v18, %v588_v3 }
  0x1b   : > { %v335_v33 = vsub.f32 %v321_v24, %v589_v19  ;;  %v336_v34 = vsub.f32 %v322_v25, %v589_v19  ;;  %v337_v35 = vsub.f32 %v323_v26, %v589_v19  ;;  %v338_v36 = vsub.f32 %v324_v27, %v589_v19 }
  0x1c   : > { %v346_v37 = vmul.f32 %v345_v22, %v332_v28  ;;  %v347_v38 = vmul.f32 %v345_v22, %v333_v29  ;;  %v348_v39 = vmul.f32 %v345_v22, %v334_v30  ;;  %v339_v40 = vsub.f32 %v325_v31, %v589_v19 }
  0x1d   : > { %v349_v41 = vmul.f32 %v345_v22, %v335_v33  ;;  %v350_v42 = vmul.f32 %v345_v22, %v336_v34  ;;  %v351_v43 = vmul.f32 %v345_v22, %v337_v35  ;;  %v352_v44 = vmul.f32 %v345_v22, %v338_v36 }
  0x1e   : > { %v361_v45 = vadd.f32 %v590_v32, %v346_v37  ;;  %v362_v46 = vadd.f32 %v590_v32, %v347_v38  ;;  %v363_v47 = vadd.f32 %v590_v32, %v348_v39  ;;  %v353_v48 = vmul.f32 %v345_v22, %v339_v40 }
  0x1f   : > { %v364_v49 = vadd.f32 %v590_v32, %v349_v41  ;;  %v365_v50 = vadd.f32 %v590_v32, %v350_v42  ;;  %v366_v51 = vadd.f32 %v590_v32, %v351_v43  ;;  %v367_v55 = vadd.f32 %v590_v32, %v352_v44 }
  0x20   : > { %v591_v52 = vmul.f32 -1.442695, %v361_v45  ;;  %v592_v53 = vmul.f32 -1.442695, %v362_v46  ;;  %v593_v54 = vmul.f32 -1.442695, %v363_v47  ;;  %v368_v57 = vadd.f32 %v590_v32, %v353_v48 }
  0x21   : > { %v594_v56 = vmul.f32 -1.442695, %v364_v49  ;;  %v595_v58 = vmul.f32 -1.442695, %v365_v50  ;;  %v596_v59 = vmul.f32 -1.442695, %v366_v51 }
  0x22   : > { %699 = vpow2.f32 %v591_v52  ;;  %v597_v60 = vmul.f32 -1.442695, %v367_v55  ;;  %v598_v61 = vmul.f32 -1.442695, %v368_v57 }
  0x23   : > { %701 = vpow2.f32 %v592_v53 }
  0x24   : > { %703 = vpow2.f32 %v593_v54 }
  0x25   : > { %705 = vpow2.f32 %v594_v56 }
  0x26   : > { %707 = vpow2.f32 %v595_v58 }
  0x27   : > { %709 = vpow2.f32 %v596_v59 }
  0x28   : > { %711 = vpow2.f32 %v597_v60 }
  0x29   : > { %713 = vpow2.f32 %v598_v61 }
  0x2c   : > { %v700_v62 = vpop.eup %699 }
  0x2d   : > { %v702_v63 = vpop.eup %701  ;;  %v393_v0 = vadd.f32 1.0, %v700_v62 }
  0x2e   : > { %v704_v1 = vpop.eup %703  ;;  %v394_v2 = vadd.f32 1.0, %v702_v63 }
  0x2f   : > { %v706_v3 = vpop.eup %705  ;;  %715 = vrcp.f32 %v393_v0  ;;  %v395_v4 = vadd.f32 1.0, %v704_v1 }
  0x30   : > { %v708_v5 = vpop.eup %707  ;;  %717 = vrcp.f32 %v394_v2  ;;  %v396_v6 = vadd.f32 1.0, %v706_v3 }
  0x31   : > { %v710_v7 = vpop.eup %709  ;;  %719 = vrcp.f32 %v395_v4  ;;  %v397_v8 = vadd.f32 1.0, %v708_v5 }
  0x32   : > { %v712_v9 = vpop.eup %711  ;;  %721 = vrcp.f32 %v396_v6  ;;  %v398_v10 = vadd.f32 1.0, %v710_v7 }
  0x33   : > { %v714_v11 = vpop.eup %713  ;;  %723 = vrcp.f32 %v397_v8  ;;  %v399_v12 = vadd.f32 1.0, %v712_v9 }
  0x34   : > { %725 = vrcp.f32 %v398_v10  ;;  %v400_v13 = vadd.f32 1.0, %v714_v11 }
  0x35   : > { %727 = vrcp.f32 %v399_v12 }
  0x36   : > { %729 = vrcp.f32 %v400_v13 }
  0x39   : > { %v716_v14 = vpop.eup %715 }
  0x3a   : > { %v718_v15 = vpop.eup %717  ;;  %v417_v16 = vmul.f32 %v716_v14, %v361_v45 }
  0x3b   : > { %v720_v17 = vpop.eup %719  ;;  %v418_v18 = vmul.f32 %v718_v15, %v362_v46 }
  0x3c   : > { %v722_v19 = vpop.eup %721  ;;  %v419_v20 = vmul.f32 %v720_v17, %v363_v47 }
  0x3d   : > { %v724_v21 = vpop.eup %723  ;;  %v636_v22 = vpack.c.bf16 %v418_v18, %v417_v16  ;;  %v420_v23 = vmul.f32 %v722_v19, %v364_v49 }
  0x3e   : > { %v726_v24 = vpop.eup %725  ;;  %v421_v25 = vmul.f32 %v724_v21, %v365_v50 }
  0x3f   : > { %v728_v26 = vpop.eup %727  ;;  %637 = vst [vmem:[%s293_s25] sm:$0xff] %v636_v22   ;;  %v641_v27 = vpack.c.bf16 %v420_v23, %v419_v20  ;;  %v422_v28 = vmul.f32 %v726_v24, %v366_v51 }
  0x40   : > { %v730_v29 = vpop.eup %729  ;;  %v423_v30 = vmul.f32 %v728_v26, %v367_v55 }
  0x41   : > { %656 = vst [vmem:[%s293_s25 + $0x8] sm:$0xff] %v641_v27   ;;  %v646_v31 = vpack.c.bf16 %v422_v28, %v421_v25  ;;  %v424_v32 = vmul.f32 %v730_v29, %v368_v57 }
  0x43   : > { %657 = vst [vmem:[%s293_s25 + $0x10] sm:$0xff] %v646_v31   ;;  %v651_v33 = vpack.c.bf16 %v424_v32, %v423_v30 }
  0x45   : > { %658 = vst [vmem:[%s293_s25 + $0x18] sm:$0xff] %v651_v33  }
  0x46 PF: > { %s15_s22 = sadd.s32 1, %s769_s22   ;;  %s877_s18 = smov %s761_s20 }
  0x47   : > { %p12_p7 = scmp.ge.s32.totalorder %s15_s22, 10   ;;  %s878_s19 = smov %s765_s21 }
  0x48   : > { %s879_s20 = smov %s882_s23  ;;  %s880_s21 = smov %s886_s24 }
  0x49   :  { %14 = sbr.rel (!%p12_p7) target bundleno = 3 (0x3), region = 76 }

// kernel: resnet_block_2d.9
= control target key start
LH: loop header
LB: loop body
LE: loop exit
PB: predicated region body
PF: predicated region fallthrough
CT: control target
= control target key end

     0   :  { %s3380_s12 = smov 0   ;;  %s3382_s13 = smov 0   ;;  %s4106_s0 = inlined_call_operand.vmem [shape: bf16[2,2,10,18,128], index: 0, kind: input, shape index: {}]   ;;  %s4107_s1 = inlined_call_operand.vmem [shape: bf16[3,384,128], index: 1, kind: input, shape index: {}]   ;;  %s4108_s2 = inlined_call_operand.vmem [shape: f32[1,128], index: 2, kind: input, shape index: {}]   ;;  %s4109_s3 = inlined_call_operand.vmem [shape: bf16[2,2,128,128], index: 3, kind: output, shape index: {}]  }
   0x1   :  { %s3384_s14 = smov 0   ;;  %s3386_s15 = smov 0  }
   0x2   :  { %s3388_s16 = smov 0  }
   0x3 LB: > { %s25_s17 = sadd.s32 1, %s3350_s14  ;;  %s28_s18 = sadd.s32 1, %s3354_s15  ;;  %s3358_s16 = sphi %s3388_s16, %s13_s16   ;;  %s3354_s15 = sphi %s3386_s15, %s4113_s15   ;;  %s3350_s14 = sphi %s3384_s14, %s4112_s14   ;;  %s3346_s13 = sphi %s3382_s13, %s4111_s13   ;;  %s3342_s12 = sphi %s3380_s12, %s4110_s12  }
   0x4   : > { %p26_p0 = scmp.ge.s32.totalorder %s25_s17, 2  ;;  %p2375_p1 = scmp.ge.s32.totalorder %s3358_s16, 1 }
   0x5   : > { %p183_p2 = scmp.lt.s32.totalorder %s3358_s16, 5 }
   0x6   : > { %s4115_s17 = smov (%p26_p0, %s25_s17), 0  ;;  %s4117_s18 = smov (!%p26_p0, %s28_s18), %s3354_s15 }
   0x7   : > { %p184_p3 = pnand %p2375_p1, %p183_p2  ;;  %p30_p4 = scmp.ge.s32.totalorder %s4117_s18, 2 }
   0x8   : > { %v3200_v0 = vld [vmem:[%s4107_s1 + $0x100] sm:$0xff] (!%p184_p3)   ;;  %v3203_v3 = vld [vmem:[%s4107_s1 + $0x108] sm:$0xff] (!%p184_p3)   ;;  %p225_p5 = scmp.lt.s32.totalorder (!%p184_p3), %s3346_s13, 1  ;;  %p227_p6 = scmp.lt.s32.totalorder (!%p184_p3), %s3342_s12, 1  ;;  %v3206_v6 = vld [vmem:[%s4107_s1 + $0x110] sm:$0xff] (!%p184_p3)   ;;  %vm455_vm0 = vcmask (!%p184_p3), 1046528  }
   0x9   : > { %s4119_s18 = smov (%p30_p4, %s4117_s18), 0  ;;  %187 = sbr.rel (%p184_p3) target bundleno = 403 (0x193), region = 32 }
   0xa   : > { %v3201_v1 = vld [vmem:[%s4107_s1 + $0x140] sm:$0xff] (!%p184_p3)   ;;  %2726 = vmatprep.subr.bf16.mxu0 (!%p184_p3), %v3200_v0  ;;  %v3204_v4 = vld [vmem:[%s4107_s1 + $0x148] sm:$0xff] (!%p184_p3)   ;;  %v3207_v7 = vld [vmem:[%s4107_s1 + $0x150] sm:$0xff] (!%p184_p3)   ;;  %vm350_vm1 = vsmask.f32 (!%p184_p3), 7424 }
   0xb   : > { %v3202_v2 = vld [vmem:[%s4107_s1 + $0xc0] sm:$0xff] (!%p184_p3)   ;;  %2966 = vmatprep.subr.bf16.mxu1 (!%p184_p3), %v3201_v1  ;;  %v3205_v5 = vld [vmem:[%s4107_s1 + $0xc8] sm:$0xff] (!%p184_p3)   ;;  %v3208_v8 = vld [vmem:[%s4107_s1 + $0xd0] sm:$0xff] (!%p184_p3)  }
   0xc   : > { %2727 = vmatpush3.bf16.msra.mxu0 (!%p184_p3), %v3202_v2  ;;  %2967 = vmatpush3.bf16.msra.mxu1 (!%p184_p3), %v3201_v1  ;;  %v3209_v9 = vld [vmem:[%s4107_s1 + $0x118] sm:$0xff] (!%p184_p3)   ;;  %v3212_v12 = vld [vmem:[%s4107_s1 + $0x120] sm:$0xff] (!%p184_p3)   ;;  %v3215_v15 = vld [vmem:[%s4107_s1 + $0x128] sm:$0xff] (!%p184_p3)  }
   0xd   : > { %2728 = vmatprep.subr.bf16.mxu0 (!%p184_p3), %v3203_v3  ;;  %2968 = vmatprep.subr.bf16.mxu1 (!%p184_p3), %v3204_v4  ;;  %v3210_v10 = vld [vmem:[%s4107_s1 + $0x158] sm:$0xff] (!%p184_p3)   ;;  %v3213_v13 = vld [vmem:[%s4107_s1 + $0x160] sm:$0xff] (!%p184_p3)   ;;  %v3216_v16 = vld [vmem:[%s4107_s1 + $0x168] sm:$0xff] (!%p184_p3)  }
   0xe   : > { %v3211_v11 = vld [vmem:[%s4107_s1 + $0xd8] sm:$0xff] (!%p184_p3)   ;;  %v3214_v14 = vld [vmem:[%s4107_s1 + $0xe0] sm:$0xff] (!%p184_p3)   ;;  %v3217_v17 = vld [vmem:[%s4107_s1 + $0xe8] sm:$0xff] (!%p184_p3)  }
   0xf   : > { %v3218_v18 = vld [vmem:[%s4107_s1 + $0x130] sm:$0xff] (!%p184_p3)   ;;  %v3221_v21 = vld [vmem:[%s4107_s1 + $0x138] sm:$0xff] (!%p184_p3)   ;;  %v3228_v31 = vld [vmem:[%s4107_s1 + $0x40] sm:$0xff] (!%p184_p3)  }
  0x10   : > { %s4121_s13 = smov (!%p225_p5, %s3346_s13), 1  ;;  %2729 = vmatpush3.bf16.msra.mxu0 %v3205_v5  ;;  %2969 = vmatpush3.bf16.msra.mxu1 %v3204_v4  ;;  %s4123_s12 = smov (!%p227_p6, %s3342_s12), 1  ;;  %v3219_v19 = vld [vmem:[%s4107_s1 + $0x170] sm:$0xff]   ;;  %v3222_v22 = vld [vmem:[%s4107_s1 + $0x178] sm:$0xff]   ;;  %v3229_v37 = vld [vmem:[%s4107_s1 + $0x1c0] sm:$0xff]  }
  0x11   : > { %2730 = vmatprep.subr.bf16.mxu0 %v3206_v6  ;;  %2970 = vmatprep.subr.bf16.mxu1 %v3207_v7  ;;  %s3159_s23 = smul.u32 60, %s4121_s13  ;;  %v3220_v20 = vld [vmem:[%s4107_s1 + $0xf0] sm:$0xff]   ;;  %v3223_v25 = vld [vmem:[%s4107_s1 + $0xf8] sm:$0xff]   ;;  %v3230_v40 = vld [vmem:[%s4107_s1] sm:$0xff]   ;;  %s2378_s8 = sshll.u32 %s4121_s13, 5 }
  0x12   : > { %s3158_s26 = smul.u32 30, %s4123_s12  ;;  %v3231_v43 = vld [vmem:[%s4107_s1 + $0x180] sm:$0xff]   ;;  %v3232_v46 = vld [vmem:[%s4107_s1 + $0x48] sm:$0xff]   ;;  %v3238_v61 = vld [vmem:[%s4107_s1 + $0x50] sm:$0xff]  }
  0x13   : > { %v3233_v48 = vld [vmem:[%s4107_s1 + $0x8] sm:$0xff]   ;;  %v3240_v1 = vld [vmem:[%s4107_s1 + $0x10] sm:$0xff]   ;;  %v3242_v6 = vld [vmem:[%s4107_s1 + $0x58] sm:$0xff]  }
  0x14   : > { %2731 = vmatpush3.bf16.msra.mxu0 %v3208_v8  ;;  %2971 = vmatpush3.bf16.msra.mxu1 %v3207_v7  ;;  %s231_s6 = sadd.s32 %s3159_s23, %s3158_s26  ;;  %v3239_v0 = vld [vmem:[%s4107_s1 + $0x1c8] sm:$0xff]   ;;  %v3243_v8 = vld [vmem:[%s4107_s1 + $0x18] sm:$0xff]  }
  0x15   : > { %2732 = vmatprep.subr.bf16.mxu0 %v3209_v9  ;;  %2972 = vmatprep.subr.bf16.mxu1 %v3210_v10  ;;  %s2376_s11 = sshll.u32 %s231_s6, 2  ;;  %v3241_v4 = vld [vmem:[%s4107_s1 + $0x188] sm:$0xff]  }
  0x16   : > { %s3490_s27 = scalar_lea.vmem %s4106_s0, %s2376_s11 }
  0x17   : > { %v3224_v23 = vld [vmem:[%s3490_s27 + $0xc] sm:$0xff]   ;;  %v3225_v24 = vld [vmem:[%s3490_s27 + $0x14] ss:$0 sps:$4 sm:$0x11]   ;;  %v3226_v30 = vld [vmem:[%s3490_s27 + $0x18] sm:$0xff]  }
  0x18   : > { %2733 = vmatpush3.bf16.msra.mxu0 %v3211_v11  ;;  %2973 = vmatpush3.bf16.msra.mxu1 %v3210_v10  ;;  %v634_v26 = vshrl.u32 %v3224_v23, 16  ;;  %v636_v27 = vshll.u32 %v3224_v23, 16  ;;  %v641_v28 = vshll.u32 %v3225_v24, 16  ;;  %v737_v29 = vrot.slane %v3224_v23, 1  ;;  %v3234_v51 = vld [vmem:[%s3490_s27 + $0x24] sm:$0xff]   ;;  %v3529_v56 = vld [vmem:[%s3490_s27 + $0x30] sm:$0xff]  }
  0x19   : > { %2734 = vmatprep.subr.bf16.mxu0 %v3212_v12  ;;  %2974 = vmatprep.subr.bf16.mxu1 %v3213_v13  ;;  %v738_v32 = vrot.slane %v3225_v24, 1  ;;  %v3227_v33 = vld [vmem:[%s3490_s27 + $0x20] ss:$0 sps:$4 sm:$0x11]   ;;  %v740_v36 = vrot.slane %v3226_v30, 1  ;;  %v646_v44 = vshrl.u32 %v3226_v30, 16 }
  0x1a   : > { %v638_v34 = vrot.slane %v636_v27, 1  ;;  %v643_v35 = vrot.slane %v641_v28, 1  ;;  %v741_v39 = vrot.slane %v3227_v33, 1  ;;  %v648_v47 = vshll.u32 %v3226_v30, 16  ;;  %v3555_v11 = vld [vmem:[%s3490_s27 + $0x3c] sm:$0xff]   ;;  %v3252_v28 = vld [vmem:[%s4107_s1 + $0x68] sm:$0xff]  }
  0x1b   : > { %v739_v38 = vsel %vm455_vm0, %v737_v29, %v738_v32  ;;  %v653_v49 = vshll.u32 %v3227_v33, 16  ;;  %v3235_v53 = vld [vmem:[%s3490_s27 + $0x2c] ss:$0 sps:$4 sm:$0x11]   ;;  %v743_v55 = vrot.slane %v3234_v51, 1  ;;  %v746_v60 = vrot.slane %v3529_v56, 1 }
  0x1c   : > { %2735 = vmatpush3.bf16.msra.mxu0 %v3214_v14  ;;  %2975 = vmatpush3.bf16.msra.mxu1 %v3213_v13  ;;  %v639_v41 = vor.u32 %v638_v34, %v634_v26  ;;  %v742_v42 = vsel %vm455_vm0, %v740_v36, %v741_v39  ;;  %v650_v50 = vrot.slane %v648_v47, 1  ;;  %v744_v57 = vrot.slane %v3235_v53, 1  ;;  %v3237_v58 = vld [vmem:[%s3490_s27 + $0x38] ss:$0 sps:$4 sm:$0x11]   ;;  %v3561_v14 = vld [vmem:[%s3490_s27 + $0x48] sm:$0xff]  }
  0x1d   : > { %2736 = vmatprep.subr.bf16.mxu0 %v3215_v15  ;;  %2976 = vmatprep.subr.bf16.mxu1 %v3216_v16  ;;  %v655_v52 = vrot.slane %v653_v49, 1  ;;  %v747_v63 = vrot.slane %v3237_v58, 1  ;;  %v658_v2 = vshrl.u32 %v3234_v51, 16  ;;  %v660_v5 = vshll.u32 %v3234_v51, 16  ;;  %v3250_v24 = vld [vmem:[%s4107_s1 + $0x20] sm:$0xff]   ;;  %v3251_v26 = vld [vmem:[%s4107_s1 + $0x190] sm:$0xff]  }
  0x1e   : > { %2982 = vmatprep.mubr.bf16.mxu1 %v739_v38  ;;  %v644_v45 = vsel %vm350_vm1, %v639_v41, %v643_v35  ;;  %v651_v54 = vor.u32 %v650_v50, %v646_v44  ;;  %v745_v62 = vsel %vm455_vm0, %v743_v55, %v744_v57  ;;  %v665_v7 = vshll.u32 %v3235_v53, 16  ;;  %v3558_v13 = vld [vmem:[%s3490_s27 + $0x44] ss:$0 sps:$4 sm:$0x11]   ;;  %v3594_v33 = vld [vmem:[%s3490_s27 + $0x54] sm:$0xff]  }
  0x1f   : > { %994 = vmatprep.mubr.bf16.mxu0 %v644_v45  ;;  %v748_v3 = vsel %vm455_vm0, %v746_v60, %v747_v63  ;;  %v662_v9 = vrot.slane %v660_v5, 1  ;;  %v749_v15 = vrot.slane %v3555_v11, 1  ;;  %v670_v27 = vshrl.u32 %v3529_v56, 16  ;;  %v3597_v35 = vld [vmem:[%s3490_s27 + $0x5c] ss:$0 sps:$4 sm:$0x11]  }
  0x20   : > { %2737 = vmatpush3.bf16.msra.mxu0 %v3217_v17  ;;  %2977 = vmatpush3.bf16.msra.mxu1 %v3216_v16  ;;  %v656_v59 = vsel %vm350_vm1, %v651_v54, %v655_v52  ;;  %v667_v10 = vrot.slane %v665_v7, 1  ;;  %v3248_v16 = vld [vmem:[%s4107_s1 + $0x60] sm:$0xff]   ;;  %v672_v29 = vshll.u32 %v3529_v56, 16  ;;  %v756_v39 = vrot.slane %v3597_v35, 1  ;;  %v3260_v47 = vld [vmem:[%s4107_s1 + $0x30] sm:$0xff]   ;;  %v3261_v50 = vld [vmem:[%s4107_s1 + $0x198] sm:$0xff]  }
  0x21   : > { %2738 = vmatprep.subr.bf16.mxu0 %v3218_v18  ;;  %2978 = vmatprep.subr.bf16.mxu1 %v3219_v19  ;;  %v663_v12 = vor.u32 %v662_v9, %v658_v2  ;;  %v750_v18 = vrot.slane %v3558_v13, 1  ;;  %v3601_v38 = vld [vmem:[%s3490_s27 + $0x60] sm:$0xff]   ;;  %v3262_v52 = vld [vmem:[%s4107_s1 + $0x78] sm:$0xff]   ;;  %v689_v53 = vshll.u32 %v3558_v13, 16  ;;  %v696_v5 = vshll.u32 %v3561_v14, 16  ;;  %v3657_v7 = vld [vmem:[%s3490_s27 + $0xc] sm:$0xff]  }
  0x22   : > { %v674_v32 = vrot.slane %v672_v29, 1  ;;  %v3263_v54 = vld [vmem:[%s4107_s1 + $0x38] sm:$0xff]   ;;  %v3635_v57 = vld [vmem:[%s3490_s27] sm:$0xff]   ;;  %v364_v13 = vshrl.u32 %v3657_v7, 16 }
  0x23   : > { %v668_v17 = vsel %vm350_vm1, %v663_v12, %v667_v10  ;;  %v3266_v60 = vld [vmem:[%s4107_s1 + $0x80] sm:$0xff]   ;;  %v698_v10 = vrot.slane %v696_v5, 1  ;;  %v3682_v29 = vld [vmem:[%s3490_s27 + $0x18] sm:$0xff]  }
  0x24   : > { %2739 = vmatpush3.bf16.msra.mxu0 %v3220_v20  ;;  %2979 = vmatpush3.bf16.msra.mxu1 %v3219_v19  ;;  %v3570_v19 = vld [vmem:[%s3490_s27 + $0x50] ss:$0 sps:$4 sm:$0x11]   ;;  %v752_v20 = vrot.slane %v3561_v14, 1  ;;  %v675_v36 = vor.u32 %v674_v32, %v670_v27  ;;  %v3734_v5 = vld [vmem:[%s3490_s27 + $0x18] sm:$0xff]  }
  0x25   : > { %2740 = vmatprep.subr.bf16.mxu0 %v3221_v21  ;;  %2980 = vmatprep.subr.bf16.mxu1 %v3222_v22  ;;  %v3249_v21 = vld [vmem:[%s4107_s1 + $0x1d0] sm:$0xff]   ;;  %v3685_v32 = vld [vmem:[%s3490_s27 + $0x20] ss:$0 sps:$4 sm:$0x11]  }
  0x28   : > { %2741 = vmatpush3.bf16.msra.mxu0 %v3223_v25  ;;  %2981 = vmatpush3.bf16.msra.mxu1 %v3222_v22  ;;  %v751_v22 = vsel %vm455_vm0, %v749_v15, %v750_v18  ;;  %v3271_v15 = vld [vmem:[%s4107_s1 + $0x88] sm:$0xff]   ;;  %v366_v18 = vshll.u32 %v3657_v7, 16 }
  0x29   : > { %2806 = vmatprep.subr.bf16.mxu1 %v3228_v31  ;;  %2886 = vmatprep.subr.bf16.mxu0 %v3229_v37  ;;  %v677_v31 = vshll.u32 %v3237_v58, 16  ;;  %v755_v37 = vrot.slane %v3594_v33, 1 }
  0x2b   : > { %995 = vmatmul.mubr.bf16.vlgmr.msra.gmra.mrb[0].mxu0 %v3224_v23  ;;  %2983 = vmatmul.mubr.bf16.vlgmr.msra.gmra.mrb[0].mxu1 %v742_v42  ;;  %v753_v23 = vrot.slane %v3570_v19, 1  ;;  %v679_v34 = vrot.slane %v677_v31, 1  ;;  %v758_v42 = vrot.slane %v3601_v38, 1  ;;  %v757_v44 = vsel %vm455_vm0, %v755_v37, %v756_v39 }
  0x2c   : > { %2807 = vmatpush3.bf16.msra.mxu1 %v3230_v40  ;;  %2887 = vmatpush3.bf16.msra.mxu0 %v3231_v43  ;;  %v3605_v40 = vld [vmem:[%s3490_s27 + $0x68] ss:$0 sps:$4 sm:$0x11]   ;;  %v3258_v43 = vld [vmem:[%s4107_s1 + $0x70] sm:$0xff]   ;;  %v378_v37 = vshll.u32 %v3682_v29, 16 }
  0x2d   : > { %2808 = vmatprep.subr.bf16.mxu1 %v3232_v46  ;;  %1002 = vmatprep.mubr.bf16.mxu0 %v656_v59  ;;  %v754_v25 = vsel %vm455_vm0, %v752_v20, %v753_v23  ;;  %v680_v41 = vsel %vm350_vm1, %v675_v36, %v679_v34  ;;  %v759_v45 = vrot.slane %v3605_v40, 1  ;;  %v3259_v46 = vld [vmem:[%s4107_s1 + $0x1d8] sm:$0xff]   ;;  %v3638_v59 = vld [vmem:[%s3490_s27 + $0x8] ss:$0 sps:$4 sm:$0x11]   ;;  %v368_v20 = vrot.slane %v366_v18, 1 }
  0x2e   : > { %2986 = vmatprep.mubr.bf16.mxu1 %v745_v62  ;;  %2888 = vmatprep.subr.bf16.mxu0 %v3239_v0  ;;  %v354_v62 = vshll.u32 %v3635_v57, 16  ;;  %v359_v0 = vshll.u32 %v3638_v59, 16  ;;  %v3273_v23 = vld [vmem:[%s4107_s1 + $0x1a8] sm:$0xff]   ;;  %v3276_v34 = vld [vmem:[%s4107_s1 + $0x90] sm:$0xff]  }
  0x2f   : > { %v760_v49 = vsel %vm455_vm0, %v758_v42, %v759_v45  ;;  %v369_v27 = vor.u32 %v368_v20, %v364_v13  ;;  %v3277_v42 = vld [vmem:[%s4107_s1 + $0x1f0] sm:$0xff]   ;;  %v1592_v13 = vshrl.u32 %v3734_v5, 16 }
  0x30   : > { %2809 = vmatpush3.bf16.msra.mxu1 %v3233_v48  ;;  %2889 = vmatpush3.bf16.msra.mxu0 %v3241_v4  ;;  %v682_v48 = vshrl.u32 %v3555_v11, 16  ;;  %v356_v2 = vrot.slane %v354_v62, 1  ;;  %v694_v4 = vshrl.u32 %v3561_v14, 16 }
  0x31   : > { %2810 = vmatprep.subr.bf16.mxu1 %v3238_v61  ;;  %2890 = vmatprep.subr.bf16.mxu0 %v3249_v21  ;;  %v352_v61 = vshrl.u32 %v3635_v57, 16 }
  0x33   : > { %1003 = vmatmul.mubr.bf16.gmra.mrb[4].mxu0 %v3226_v30  ;;  %2987 = vmatmul.mubr.bf16.gmra.mrb[4].mxu1 %v748_v3  ;;  %v3253_v30 = vld [vmem:[%s4107_s1 + $0x28] sm:$0xff]   ;;  %v3268_v3 = vld [vmem:[%s4107_s1 + $0x1a0] sm:$0xff]   ;;  %v357_v9 = vor.u32 %v356_v2, %v352_v61 }
  0x34   : > { %2811 = vmatpush3.bf16.msra.mxu1 %v3240_v1  ;;  %1010 = vmatprep.mubr.bf16.mxu0 %v668_v17  ;;  %v3267_v1 = vld [vmem:[%s4107_s1 + $0x1e0] sm:$0xff]   ;;  %v3668_v17 = vld [vmem:[%s3490_s27 + $0x14] ss:$0 sps:$4 sm:$0x11]  }
  0x35   : > { %2812 = vmatprep.subr.bf16.mxu1 %v3242_v6  ;;  %2990 = vmatprep.mubr.bf16.mxu1 %v751_v22  ;;  %v701_v6 = vshll.u32 %v3570_v19, 16  ;;  %v699_v19 = vor.u32 %v698_v10, %v694_v4  ;;  %v371_v21 = vshll.u32 %v3668_v17, 16  ;;  %v3731_v4 = vld [vmem:[%s3490_s27 + $0x38] ss:$0 sps:$4 sm:$0x11]  }
  0x36   : > { %2891 = vmatpush3.bf16.msra.mxu0 %v3251_v26  ;;  %v713_v26 = vshll.u32 %v3597_v35, 16  ;;  %v376_v35 = vshrl.u32 %v3682_v29, 16  ;;  %v3741_v10 = vld [vmem:[%s3490_s27 + $0x20] ss:$0 sps:$4 sm:$0x11]  }
  0x37   : > { %2892 = vmatprep.subr.bf16.mxu0 %v3259_v46  ;;  %v703_v12 = vrot.slane %v701_v6, 1  ;;  %v718_v46 = vshrl.u32 %v3601_v38, 16 }
  0x38   : > { %2813 = vmatpush3.bf16.msra.mxu1 %v3243_v8  ;;  %v361_v8 = vrot.slane %v359_v0, 1  ;;  %v715_v31 = vrot.slane %v713_v26, 1  ;;  %v3764_v26 = vld [vmem:[%s3490_s27 + $0x24] sm:$0xff]  }
  0x39   : > { %2814 = vmatprep.subr.bf16.mxu1 %v3248_v16  ;;  %v3272_v16 = vld [vmem:[%s4107_s1 + $0x1e8] sm:$0xff]   ;;  %v704_v22 = vsel %vm350_vm1, %v699_v19, %v703_v12 }
  0x3a   : > { %2893 = vmatpush3.bf16.msra.mxu0 %v3261_v50  ;;  %v725_v50 = vshll.u32 %v3605_v40, 16  ;;  %v3282_v40 = vld [vmem:[%s4107_s1 + $0x1f8] sm:$0xff]  }
  0x3b   : > { %1011 = vmatmul.mubr.bf16.gmra.mrb[8].mxu0 %v3234_v51  ;;  %2991 = vmatmul.mubr.bf16.gmra.mrb[8].mxu1 %v754_v25  ;;  %v684_v51 = vshll.u32 %v3555_v11, 16  ;;  %v708_v25 = vshll.u32 %v3594_v33, 16 }
  0x3c   : > { %2815 = vmatpush3.bf16.msra.mxu1 %v3250_v24  ;;  %1018 = vmatprep.mubr.bf16.mxu0 %v680_v41  ;;  %v706_v24 = vshrl.u32 %v3594_v33, 16  ;;  %v383_v41 = vshll.u32 %v3685_v32, 16 }
  0x3d   : > { %2816 = vmatprep.subr.bf16.mxu1 %v3252_v28  ;;  %2994 = vmatprep.mubr.bf16.mxu1 %v757_v44  ;;  %v686_v55 = vrot.slane %v684_v51, 1  ;;  %v373_v28 = vrot.slane %v371_v21, 1  ;;  %v3281_v51 = vld [vmem:[%s4107_s1 + $0x98] sm:$0xff]   ;;  %v3753_v21 = vld [vmem:[%s4107_s1 + $0x200] sm:$0xff]  }
  0x3e   : > { %2894 = vmatprep.subr.bf16.mxu0 %v3267_v1  ;;  %v385_v45 = vrot.slane %v383_v41, 1 }
  0x3f   : > { %v687_v58 = vor.u32 %v686_v55, %v682_v48  ;;  %2895 = vmatpush3.bf16.msra.mxu0 %v3268_v3  ;;  %v374_v36 = vsel %vm350_vm1, %v369_v27, %v373_v28  ;;  %v3705_v48 = vld [vmem:[%s3490_s27 + $0x24] sm:$0xff]   ;;  %v3728_v3 = vld [vmem:[%s3490_s27 + $0x30] sm:$0xff]  }
  0x40   : > { %2817 = vmatpush3.bf16.msra.mxu1 %v3253_v30  ;;  %2896 = vmatprep.subr.bf16.mxu0 %v3272_v16  ;;  %v710_v30 = vrot.slane %v708_v25, 1  ;;  %v390_v55 = vshll.u32 %v3705_v48, 16  ;;  %v400_v6 = vshrl.u32 %v3728_v3, 16  ;;  %v3288_v16 = vld [vmem:[%s4107_s1 + $0xa0] sm:$0xff]  }
  0x41   : > { %2818 = vmatprep.subr.bf16.mxu1 %v3258_v43  ;;  %v380_v43 = vrot.slane %v378_v37, 1  ;;  %v3761_v25 = vld [vmem:[%s3490_s27 + $0x44] ss:$0 sps:$4 sm:$0x11]  }
  0x42   : > { %v711_v39 = vor.u32 %v710_v30, %v706_v24  ;;  %v392_v61 = vrot.slane %v390_v55, 1 }
  0x43   : > { %1019 = vmatmul.mubr.bf16.gmra.mrb[12].mxu0 %v3529_v56  ;;  %2995 = vmatmul.mubr.bf16.gmra.mrb[12].mxu1 %v760_v49  ;;  %v691_v56 = vrot.slane %v689_v53, 1  ;;  %v381_v49 = vor.u32 %v380_v43, %v376_v35  ;;  %v3713_v53 = vld [vmem:[%s3490_s27 + $0x2c] ss:$0 sps:$4 sm:$0x11]   ;;  %v1606_v35 = vshll.u32 %v3764_v26, 16 }
  0x44   : > { %2819 = vmatpush3.bf16.msra.mxu1 %v3260_v47  ;;  %2897 = vmatpush3.bf16.msra.mxu0 %v3273_v23  ;;  %v716_v44 = vsel %vm350_vm1, %v711_v39, %v715_v31  ;;  %v720_v47 = vshll.u32 %v3601_v38, 16  ;;  %v395_v62 = vshll.u32 %v3713_v53, 16  ;;  %v3757_v23 = vld [vmem:[%s3490_s27 + $0x3c] sm:$0xff]   ;;  %v3294_v39 = vld [vmem:[%s4107_s1 + $0xa8] sm:$0xff]  }
  0x45   : > { %2820 = vmatprep.subr.bf16.mxu1 %v3262_v52  ;;  %v692_v63 = vsel %vm350_vm1, %v687_v58, %v691_v56  ;;  %2898 = vmatprep.subr.bf16.mxu0 %v3277_v42  ;;  %v386_v56 = vsel %vm350_vm1, %v381_v49, %v385_v45  ;;  %v727_v58 = vrot.slane %v725_v50, 1  ;;  %v412_v28 = vshrl.u32 %v3757_v23, 16  ;;  %v3791_v49 = vld [vmem:[%s3490_s27 + $0x50] ss:$0 sps:$4 sm:$0x11]  }
  0x46   : > { %1026 = vmatprep.mubr.bf16.mxu0 %v692_v63  ;;  %v722_v52 = vrot.slane %v720_v47, 1  ;;  %v3283_v63 = vld [vmem:[%s4107_s1 + $0x1b8] sm:$0xff]   ;;  %v397_v2 = vrot.slane %v395_v62, 1  ;;  %v414_v30 = vshll.u32 %v3757_v23, 16  ;;  %v1608_v42 = vrot.slane %v1606_v35, 1  ;;  %v3787_v47 = vld [vmem:[%s3490_s27 + $0x48] sm:$0xff]  }
  0x47   : > { %v3794_v50 = vld [vmem:[%s3490_s27 + $0x30] sm:$0xff]   ;;  %v431_v55 = vshll.u32 %v3791_v49, 16 }
  0x48   : > { %2821 = vmatpush3.bf16.msra.mxu1 %v3263_v54  ;;  %v388_v54 = vshrl.u32 %v3705_v48, 16  ;;  %v416_v37 = vrot.slane %v414_v30, 1  ;;  %v3300_v62 = vld [vmem:[%s4107_s1 + $0xb0] sm:$0xff]  }
  0x49   : > { %2998 = vmatprep.subr.bf16.mxu1 %v3266_v60 }
  0x4a   : > { %v393_v1 = vor.u32 %v392_v61, %v388_v54  ;;  %v426_v54 = vshll.u32 %v3787_v47, 16 }
  0x4b   : > { %1027 = vmatmul.mubr.bf16.gmra.mrb[16].mxu0 %v3555_v11  ;;  %v362_v11 = vsel %vm350_vm1, %v357_v9, %v361_v8  ;;  %v402_v8 = vshll.u32 %v3728_v3, 16  ;;  %v407_v9 = vshll.u32 %v3731_v4, 16 }
  0x4c   : > { %1332 = vmatprep.mubr.bf16.mxu1 %v362_v11  ;;  %1034 = vmatprep.mubr.bf16.mxu0 %v704_v22  ;;  %v1599_v11 = vshll.u32 %v3741_v10, 16  ;;  %v428_v61 = vrot.slane %v426_v54, 1  ;;  %v3871_v54 = vld [vmem:[%s3490_s27 + $0x54] sm:$0xff]  }
  0x4d   : > { %1333 = vmatmul.mubr.bf16.vlgmr.msra.gmra.mrb[16].mxu1 %v3635_v57  ;;  %v404_v12 = vrot.slane %v402_v8, 1  ;;  %v409_v18 = vrot.slane %v407_v9, 1  ;;  %v3820_v8 = vld [vmem:[%s3490_s27 + $0x54] sm:$0xff]   ;;  %v3823_v9 = vld [vmem:[%s3490_s27 + $0x5c] ss:$0 sps:$4 sm:$0x11]  }
  0x4e   : > { %2999 = vmatpush3.bf16.msra.mxu1 %v3266_v60  ;;  %1340 = vmatprep.mubr.bf16.mxu1 %v374_v36  ;;  %v723_v60 = vor.u32 %v722_v52, %v718_v46  ;;  %v1601_v22 = vrot.slane %v1599_v11, 1  ;;  %v1604_v36 = vshrl.u32 %v3764_v26, 16  ;;  %v424_v52 = vshrl.u32 %v3787_v47, 16 }
  0x4f   : > { %3000 = vmatprep.subr.bf16.mxu1 %v3271_v15  ;;  %v405_v19 = vor.u32 %v404_v12, %v400_v6  ;;  %v3826_v12 = vld [vmem:[%s3490_s27 + $0x3c] sm:$0xff]  }
  0x50   : > { %v728_v0 = vsel %vm350_vm1, %v723_v60, %v727_v58  ;;  %v1609_v45 = vor.u32 %v1608_v42, %v1604_v36  ;;  %v1616_v58 = vshrl.u32 %v3794_v50, 16  ;;  %v1628_v11 = vshrl.u32 %v3826_v12, 16  ;;  %v3851_v36 = vld [vmem:[%s3490_s27 + $0x48] sm:$0xff]  }
  0x51   : > { %v410_v27 = vsel %vm350_vm1, %v405_v19, %v409_v18  ;;  %v3833_v18 = vld [vmem:[%s3490_s27 + $0x44] ss:$0 sps:$4 sm:$0x11]   ;;  %v1630_v19 = vshll.u32 %v3826_v12, 16  ;;  %v1642_v42 = vshll.u32 %v3851_v36, 16 }
  0x52   : > { %3001 = vmatpush3.bf16.msra.mxu1 %v3271_v15  ;;  %v1594_v15 = vshll.u32 %v3734_v5, 16 }
  0x53   : > { %1035 = vmatmul.mubr.bf16.gmra.mrb[20].mxu0 %v3561_v14  ;;  %v3278_v14 = vld [vmem:[%s4107_s1 + $0x1b0] sm:$0xff]   ;;  %3002 = vmatprep.subr.bf16.mxu1 %v3276_v34 }
  0x54   : > { %1042 = vmatprep.mubr.bf16.mxu0 %v716_v44  ;;  %2899 = vmatpush3.bf16.msra.mxu0 %v3278_v14  ;;  %v1596_v20 = vrot.slane %v1594_v15, 1  ;;  %v3784_v14 = vld [vmem:[%s4107_s1 + $0x208] sm:$0xff]   ;;  %v417_v44 = vor.u32 %v416_v37, %v412_v28 }
  0x55   : > { %1341 = vmatmul.mubr.bf16.gmra.mrb[20].mxu1 %v3657_v7  ;;  %2900 = vmatprep.subr.bf16.mxu0 %v3282_v40  ;;  %v1618_v40 = vshll.u32 %v3794_v50, 16 }
  0x56   : > { %3003 = vmatpush3.bf16.msra.mxu1 %v3276_v34  ;;  %1348 = vmatprep.mubr.bf16.mxu1 %v386_v56  ;;  %v1597_v24 = vor.u32 %v1596_v20, %v1592_v13  ;;  %v3772_v34 = vld [vmem:[%s3490_s27 + $0x2c] ss:$0 sps:$4 sm:$0x11]   ;;  %v3803_v56 = vld [vmem:[%s3490_s27 + $0x38] ss:$0 sps:$4 sm:$0x11]   ;;  %v429_v13 = vor.u32 %v428_v61, %v424_v52 }
  0x57   : > { %3004 = vmatprep.subr.bf16.mxu1 %v3281_v51  ;;  %v1611_v43 = vshll.u32 %v3772_v34, 16  ;;  %v436_v20 = vshrl.u32 %v3820_v8, 16  ;;  %v1644_v52 = vrot.slane %v1642_v42, 1  ;;  %v3929_v42 = vld [vmem:[%s3490_s27 + $0x6c] sm:$0xff]  }
  0x58   : > { %2901 = vmatpush3.bf16.msra.mxu0 %v3283_v63  ;;  %v1602_v31 = vsel %vm350_vm1, %v1597_v24, %v1601_v22  ;;  %v433_v63 = vrot.slane %v431_v55, 1  ;;  %v443_v22 = vshll.u32 %v3823_v9, 16  ;;  %v1635_v24 = vshll.u32 %v3833_v18, 16  ;;  %v3875_v55 = vld [vmem:[%s3490_s27 + $0x5c] ss:$0 sps:$4 sm:$0x11]  }
  0x59   : > { %3030 = vmatprep.subr.bf16.mxu0 %v3753_v21  ;;  %v1613_v46 = vrot.slane %v1611_v43, 1 }
  0x5a   : > { %3005 = vmatpush3.bf16.msra.mxu1 %v3281_v51  ;;  %v434_v28 = vsel %vm350_vm1, %v429_v13, %v433_v63  ;;  %v1637_v35 = vrot.slane %v1635_v24, 1  ;;  %v1652_v63 = vshrl.u32 %v3871_v54, 16  ;;  %v456_v13 = vrot.slane %v3635_v57, 1 }
  0x5b   : > { %1043 = vmatmul.mubr.bf16.gmra.mrb[24].mxu0 %v3594_v33  ;;  %v398_v33 = vsel %vm350_vm1, %v393_v1, %v397_v2  ;;  %3006 = vmatprep.subr.bf16.mxu1 %v3288_v16  ;;  %v1614_v51 = vsel %vm350_vm1, %v1609_v45, %v1613_v46  ;;  %v1623_v1 = vshll.u32 %v3803_v56, 16  ;;  %v3815_v2 = vld [vmem:[%s4107_s1 + $0x210] sm:$0xff]   ;;  %v1695_v24 = vrot.slane %v3734_v5, 1 }
  0x5c   : > { %1050 = vmatprep.mubr.bf16.mxu0 %v728_v0  ;;  %v1620_v0 = vrot.slane %v1618_v40, 1 }
  0x5d   : > { %1349 = vmatmul.mubr.bf16.gmra.mrb[24].mxu1 %v3682_v29  ;;  %v1625_v6 = vrot.slane %v1623_v1, 1 }
  0x5e   : > { %1356 = vmatprep.mubr.bf16.mxu1 %v398_v33  ;;  %3007 = vmatpush3.bf16.msra.mxu1 %v3288_v16  ;;  %v1621_v33 = vor.u32 %v1620_v0, %v1616_v58  ;;  %v438_v16 = vshll.u32 %v3820_v8, 16  ;;  %v1659_v0 = vshll.u32 %v3875_v55, 16 }
  0x5f   : > { %3008 = vmatprep.subr.bf16.mxu1 %v3294_v39 }
  0x60   : > { %v1626_v15 = vsel %vm350_vm1, %v1621_v33, %v1625_v6  ;;  %v440_v30 = vrot.slane %v438_v16, 1  ;;  %v3891_v6 = vld [vmem:[%s3490_s27 + $0x60] sm:$0xff]   ;;  %v3899_v16 = vld [vmem:[%s4107_s1 + $0x230] sm:$0xff]  }
  0x61   : > { %v1666_v57 = vshll.u32 %v3891_v6, 16 }
  0x62   : > { %3009 = vmatpush3.bf16.msra.mxu1 %v3294_v39  ;;  %v3856_v39 = vld [vmem:[%s3490_s27 + $0x50] ss:$0 sps:$4 sm:$0x11]   ;;  %v441_v43 = vor.u32 %v440_v30, %v436_v20  ;;  %v1661_v20 = vrot.slane %v1659_v0, 1  ;;  %v460_v30 = vrot.slane %v3668_v17, 1  ;;  %v462_v17 = vrot.slane %v3682_v29, 1 }
  0x63   : > { %1051 = vmatmul.mubr.bf16.gmra.mrb[28].mxu0 %v3601_v38  ;;  %v419_v38 = vshll.u32 %v3761_v25, 16  ;;  %3010 = vmatprep.subr.bf16.mxu1 %v3300_v62  ;;  %v1647_v46 = vshll.u32 %v3856_v39, 16  ;;  %v468_v0 = vrot.slane %v3728_v3, 1 }
  0x64   : > { %1952 = vmatprep.mubr.bf16.mxu0 %v1602_v31  ;;  %v1632_v31 = vrot.slane %v1630_v19, 1 }
  0x65   : > { %1357 = vmatmul.mubr.bf16.gmra.mrb[28].mxu1 %v3705_v48  ;;  %v421_v41 = vrot.slane %v419_v38, 1  ;;  %v3848_v38 = vld [vmem:[%s4107_s1 + $0x218] sm:$0xff]   ;;  %v1649_v40 = vrot.slane %v1647_v46, 1  ;;  %v3940_v46 = vld [vmem:[%s3490_s27 + $0x74] ss:$0 sps:$4 sm:$0x11]  }
  0x66   : > { %1364 = vmatprep.mubr.bf16.mxu1 %v410_v27  ;;  %3011 = vmatpush3.bf16.msra.mxu1 %v3300_v62  ;;  %v3306_v27 = vld [vmem:[%s4107_s1 + $0xb8] sm:$0xff]   ;;  %v1633_v37 = vor.u32 %v1632_v31, %v1628_v11  ;;  %v3883_v62 = vld [vmem:[%s4107_s1 + $0x228] sm:$0xff]  }
  0x67   : > { %v422_v60 = vsel %vm350_vm1, %v417_v44, %v421_v41  ;;  %3012 = vmatprep.subr.bf16.mxu1 %v3306_v27  ;;  %v1640_v41 = vshrl.u32 %v3851_v36, 16  ;;  %v445_v44 = vrot.slane %v443_v22, 1  ;;  %v3903_v11 = vld [vmem:[%s3490_s27 + $0x68] ss:$0 sps:$4 sm:$0x11]   ;;  %v3912_v22 = vld [vmem:[%s4107_s1 + $0x238] sm:$0xff]  }
  0x68   : > { %v1638_v45 = vsel %vm350_vm1, %v1633_v37, %v1637_v35  ;;  %v1698_v35 = vrot.slane %v3764_v26, 1  ;;  %v1699_v37 = vrot.slane %v3772_v34, 1  ;;  %s2377_s27 = sshll.u32 %s4123_s12, 4 }
  0x69   : > { %v1645_v58 = vor.u32 %v1644_v52, %v1640_v41  ;;  %v446_v61 = vsel %vm350_vm1, %v441_v43, %v445_v44  ;;  %v1671_v41 = vshll.u32 %v3903_v11, 16  ;;  %v463_v43 = vrot.slane %v3685_v32, 1  ;;  %s250_s9 = sadd.s32 %s2378_s8, %s2377_s27 }
  0x6a   : > { %3013 = vmatpush3.bf16.msra.mxu1 %v3306_v27  ;;  %v1696_v27 = vrot.slane %v3741_v10, 1  ;;  %v1664_v10 = vshrl.u32 %v3891_v6, 16  ;;  %v1678_v52 = vshll.u32 %v3929_v42, 16  ;;  %v465_v32 = vrot.slane %v3705_v48, 1  ;;  %s2379_s19 = sshll.u32 %s250_s9, 2 }
  0x6b   : > { %1953 = vmatmul.mubr.bf16.vlgmr.msra.gmra.mrb[32].mxu0 %v3734_v5  ;;  %3062 = vmatprep.subr.bf16.mxu1 %v3753_v21  ;;  %v1650_v1 = vsel %vm350_vm1, %v1645_v58, %v1649_v40  ;;  %v464_v29 = vsel %vm455_vm0, %v462_v17, %v463_v43  ;;  %v466_v58 = vrot.slane %v3713_v53, 1  ;;  %s4077_s20 = scalar_lea.vmem %s4109_s3, %s2379_s19 }
  0x6c   : > { %3031 = vmatpush3.bf16.msra.mxu0 %v3753_v21  ;;  %1960 = vmatprep.mubr.bf16.mxu0 %v1614_v51  ;;  %v3867_v51 = vld [vmem:[%s4107_s1 + $0x220] sm:$0xff]   ;;  %v3921_v31 = vsel %vm455_vm0, %v1695_v24, %v1696_v27 }
  0x6d   : > { %3032 = vmatprep.subr.bf16.mxu0 %v3784_v14  ;;  %1365 = vmatmul.mubr.bf16.gmra.mrb[32].mxu1 %v3728_v3  ;;  %v467_v48 = vsel %vm455_vm0, %v465_v32, %v466_v58  ;;  %v471_v3 = vrot.slane %v3757_v23, 1 }
  0x6e   : > { %1372 = vmatprep.mubr.bf16.mxu1 %v422_v60  ;;  %v1654_v60 = vshll.u32 %v3871_v54, 16 }
  0x70   : > { %3033 = vmatpush3.bf16.msra.mxu0 %v3784_v14  ;;  %v1656_v33 = vrot.slane %v1654_v60, 1  ;;  %v1676_v60 = vshrl.u32 %v3929_v42, 16 }
  0x71   : > { %3034 = vmatprep.subr.bf16.mxu0 %v3815_v2 }
  0x72   : > { %v1657_v19 = vor.u32 %v1656_v33, %v1652_v63  ;;  %v1683_v63 = vshll.u32 %v3940_v46, 16 }
  0x73   : > { %1961 = vmatmul.mubr.bf16.gmra.mrb[36].mxu0 %v3764_v26  ;;  %v3935_v26 = vsel %vm455_vm0, %v1698_v35, %v1699_v37 }
  0x74   : > { %1968 = vmatprep.mubr.bf16.mxu0 %v1626_v15  ;;  %3035 = vmatpush3.bf16.msra.mxu0 %v3815_v2  ;;  %v457_v15 = vrot.slane %v3638_v59, 1  ;;  %v1662_v5 = vsel %vm350_vm1, %v1657_v19, %v1661_v20  ;;  %v1704_v20 = vrot.slane %v3826_v12, 1 }
  0x75   : > { %1373 = vmatmul.mubr.bf16.gmra.mrb[36].mxu1 %v3757_v23  ;;  %3036 = vmatprep.subr.bf16.mxu0 %v3848_v38 }
  0x76   : > { %1380 = vmatprep.mubr.bf16.mxu1 %v434_v28  ;;  %v458_v59 = vsel %vm455_vm0, %v456_v13, %v457_v15  ;;  %v459_v28 = vrot.slane %v3657_v7, 1  ;;  %v1668_v7 = vrot.slane %v1666_v57, 1  ;;  %v475_v15 = vrot.slane %v3791_v49, 1 }
  0x77   : > { %v1707_v49 = vrot.slane %v3851_v36, 1 }
  0x78   : > { %3037 = vmatpush3.bf16.msra.mxu0 %v3848_v38  ;;  %v461_v34 = vsel %vm455_vm0, %v459_v28, %v460_v30  ;;  %v1669_v44 = vor.u32 %v1668_v7, %v1664_v10 }
  0x79   : > { %3038 = vmatprep.subr.bf16.mxu0 %v3867_v51 }
  0x7b   : > { %1969 = vmatmul.mubr.bf16.gmra.mrb[40].mxu0 %v3794_v50 }
  0x7c   : > { %1976 = vmatprep.mubr.bf16.mxu0 %v1638_v45  ;;  %3039 = vmatpush3.bf16.msra.mxu0 %v3867_v51  ;;  %v1673_v45 = vrot.slane %v1671_v41, 1 }
  0x7d   : > { %1381 = vmatmul.mubr.bf16.gmra.mrb[40].mxu1 %v3787_v47  ;;  %3040 = vmatprep.subr.bf16.mxu0 %v3883_v62 }
  0x7e   : > { %1388 = vmatprep.mubr.bf16.mxu1 %v446_v61  ;;  %v1674_v40 = vsel %vm350_vm1, %v1669_v44, %v1673_v45  ;;  %v1680_v61 = vrot.slane %v1678_v52, 1 }
  0x80   : > { %3041 = vmatpush3.bf16.msra.mxu0 %v3883_v62  ;;  %v1681_v53 = vor.u32 %v1680_v61, %v1676_v60 }
  0x81   : > { %3042 = vmatprep.subr.bf16.mxu0 %v3899_v16 }
  0x83   : > { %1977 = vmatmul.mubr.bf16.gmra.mrb[44].mxu0 %v3826_v12 }
  0x84   : > { %1984 = vmatprep.mubr.bf16.mxu0 %v1650_v1  ;;  %3043 = vmatpush3.bf16.msra.mxu0 %v3899_v16  ;;  %v469_v1 = vrot.slane %v3731_v4, 1  ;;  %v472_v4 = vrot.slane %v3761_v25, 1  ;;  %v477_v25 = vrot.slane %v3820_v8, 1 }
  0x85   : > { %1389 = vmatmul.mubr.bf16.gmra.mrb[44].mxu1 %v3820_v8  ;;  %3044 = vmatprep.subr.bf16.mxu0 %v3912_v22  ;;  %v1702_v8 = vrot.slane %v3803_v56, 1  ;;  %v1714_v56 = vrot.slane %v3903_v11, 1  ;;  %v1717_v11 = vrot.slane %v3940_v46, 1 }
  0x86   : > { %3014 = vmatprep.mubr.bf16.mxu1 %v458_v59  ;;  %v470_v33 = vsel %vm455_vm0, %v468_v0, %v469_v1 }
  0x88   : > { %3045 = vmatpush3.bf16.msra.mxu0 %v3912_v22 }
  0x8b   : > { %1985 = vmatmul.mubr.bf16.gmra.mrb[48].mxu0 %v3851_v36  ;;  %v1710_v36 = vrot.slane %v3871_v54, 1 }
  0x8c   : > { %1992 = vmatprep.mubr.bf16.mxu0 %v1662_v5 }
  0x8d   : > { %3015 = vmatmul.mubr.bf16.vlgmr.msra.gmra.mrb[0].mxu1 %v461_v34 }
  0x8e   : > { %3070 = vmatpush3.bf16.msra.mxu1 %v3753_v21  ;;  %3018 = vmatprep.mubr.bf16.mxu1 %v464_v29  ;;  %v1685_v21 = vrot.slane %v1683_v63, 1 }
  0x8f   : > { %3063 = vmatprep.subr.bf16.mxu1 %v3784_v14 }
  0x90   : > { %v1686_v13 = vsel %vm350_vm1, %v1681_v53, %v1685_v21 }
  0x92   : > { %3071 = vmatpush3.bf16.msra.mxu1 %v3784_v14  ;;  %v474_v14 = vrot.slane %v3787_v47, 1  ;;  %v478_v47 = vrot.slane %v3823_v9, 1 }
  0x93   : > { %1993 = vmatmul.mubr.bf16.gmra.mrb[52].mxu0 %v3871_v54  ;;  %3064 = vmatprep.subr.bf16.mxu1 %v3815_v2 }
  0x94   : > { %2000 = vmatprep.mubr.bf16.mxu0 %v1674_v40  ;;  %v476_v23 = vsel %vm455_vm0, %v474_v14, %v475_v15  ;;  %v479_v19 = vsel %vm455_vm0, %v477_v25, %v478_v47 }
  0x95   : > { %3019 = vmatmul.mubr.bf16.gmra.mrb[4].mxu1 %v467_v48 }
  0x96   : > { %3072 = vmatpush3.bf16.msra.mxu1 %v3815_v2  ;;  %3022 = vmatprep.mubr.bf16.mxu1 %v470_v33  ;;  %v473_v2 = vsel %vm455_vm0, %v471_v3, %v472_v4 }
  0x97   : > { %3065 = vmatprep.subr.bf16.mxu1 %v3848_v38 }
  0x9a   : > { %3073 = vmatpush3.bf16.msra.mxu1 %v3848_v38  ;;  %v1708_v38 = vrot.slane %v3856_v39, 1  ;;  %v1711_v39 = vrot.slane %v3875_v55, 1 }
  0x9b   : > { %2001 = vmatmul.mubr.bf16.gmra.mrb[56].mxu0 %v3891_v6  ;;  %3066 = vmatprep.subr.bf16.mxu1 %v3867_v51 }
  0x9c   : > { %2008 = vmatprep.mubr.bf16.mxu0 %v1686_v13  ;;  %v1709_v9 = vsel %vm455_vm0, %v1707_v49, %v1708_v38  ;;  %v1712_v54 = vsel %vm455_vm0, %v1710_v36, %v1711_v39 }
  0x9d   : > { %3023 = vmatmul.mubr.bf16.gmra.mrb[8].mxu1 %v473_v2 }
  0x9e   : > { %3074 = vmatpush3.bf16.msra.mxu1 %v3867_v51  ;;  %3026 = vmatprep.mubr.bf16.mxu1 %v476_v23  ;;  %v1701_v51 = vrot.slane %v3794_v50, 1  ;;  %v1713_v50 = vrot.slane %v3891_v6, 1  ;;  %v1716_v6 = vrot.slane %v3929_v42, 1 }
  0x9f   : > { %3067 = vmatprep.subr.bf16.mxu1 %v3883_v62 }
  0xa0   : > { %v1715_v55 = vsel %vm455_vm0, %v1713_v50, %v1714_v56  ;;  %v1718_v59 = vsel %vm455_vm0, %v1716_v6, %v1717_v11 }
  0xa2   : > { %3075 = vmatpush3.bf16.msra.mxu1 %v3883_v62  ;;  %v1703_v62 = vsel %vm455_vm0, %v1701_v51, %v1702_v8 }
  0xa3   : > { %2009 = vmatmul.mubr.bf16.gmra.mrb[60].mxu0 %v3929_v42  ;;  %3068 = vmatprep.subr.bf16.mxu1 %v3899_v16 }
  0xa4   : > { %3046 = vmatprep.mubr.bf16.mxu0 %v3921_v31 }
  0xa5   : > { %3027 = vmatmul.mubr.bf16.gmra.mrb[12].mxu1 %v479_v19 }
  0xa6   : > { %3076 = vmatpush3.bf16.msra.mxu1 %v3899_v16  ;;  %3054 = vmatprep.mubr.bf16.mxu1 %v1709_v9  ;;  %v1705_v16 = vrot.slane %v3833_v18, 1 }
  0xa7   : > { %3069 = vmatprep.subr.bf16.mxu1 %v3912_v22 }
  0xa8   : > { %v1706_v57 = vsel %vm455_vm0, %v1704_v20, %v1705_v16 }
  0xaa   : > { %3077 = vmatpush3.bf16.msra.mxu1 %v3912_v22 }
  0xab   : > { %3047 = vmatmul.mubr.bf16.vlgmr.msra.gmra.mrb[64].mxu0 %v3935_v26 }
  0xac   : > { %3050 = vmatprep.mubr.bf16.mxu0 %v1703_v62 }
  0xad   : > { %3055 = vmatmul.mubr.bf16.vlgmr.msra.gmra.mrb[8].mxu1 %v1712_v54 }
  0xae   : > { %3058 = vmatprep.mubr.bf16.mxu1 %v1715_v55 }
  0xb3   : > { %3051 = vmatmul.mubr.bf16.gmra.mrb[68].mxu0 %v1706_v57 }
  0xb5   : > { %3059 = vmatmul.mubr.bf16.gmra.mrb[12].mxu1 %v1718_v59 }
  0xfe   : > { %v2742_v12 = vpop.f32.mrb[0].mxu0 }
  0xff   : > { %v2743_v18 = vpop.f32.mrb[1].mxu0 }
 0x100   : > { %v2744_v24 = vadd.f32 %v2743_v18, %v2742_v12  ;;  %v2745_v22 = vpop.f32.mrb[2].mxu0 }
 0x101   : > { %v2746_v27 = vpop.f32.mrb[3].mxu0 }
 0x102   : > { %v2747_v28 = vadd.f32 %v2746_v27, %v2745_v22 }
 0x106   : > { %v2748_v30 = vpop.f32.mrb[4].mxu0 }
 0x107   : > { %v2749_v31 = vpop.f32.mrb[5].mxu0 }
 0x108   : > { %v2750_v35 = vadd.f32 %v2749_v31, %v2748_v30  ;;  %v2751_v37 = vpop.f32.mrb[6].mxu0 }
 0x109   : > { %v2752_v5 = vpop.f32.mrb[7].mxu0 }
 0x10a   : > { %v2753_v10 = vadd.f32 %v2752_v5, %v2751_v37 }
 0x10e   : > { %v2754_v7 = vpop.f32.mrb[8].mxu0 }
 0x10f   : > { %v2755_v41 = vpop.f32.mrb[9].mxu0 }
 0x110   : > { %v2756_v42 = vadd.f32 %v2755_v41, %v2754_v7  ;;  %v2757_v17 = vpop.f32.mrb[10].mxu0 }
 0x111   : > { %v2758_v43 = vpop.f32.mrb[11].mxu0 }
 0x112   : > { %v2759_v26 = vadd.f32 %v2758_v43, %v2757_v17 }
 0x116   : > { %v2760_v34 = vpop.f32.mrb[12].mxu0 }
 0x117   : > { %v2761_v44 = vpop.f32.mrb[13].mxu0 }
 0x118   : > { %v2762_v45 = vadd.f32 %v2761_v44, %v2760_v34  ;;  %v2763_v46 = vpop.f32.mrb[14].mxu0 }
 0x119   : > { %v2764_v52 = vpop.f32.mrb[15].mxu0 }
 0x11a   : > { %v2765_v29 = vadd.f32 %v2764_v52, %v2763_v46 }
 0x11e   : > { %v2766_v32 = vpop.f32.mrb[16].mxu0 }
 0x11f   : > { %v2767_v58 = vpop.f32.mrb[17].mxu0 }
 0x120   : > { %v4001_v40 = vadd.f32 %v2767_v58, %v2766_v32  ;;  %v2769_v60 = vpop.f32.mrb[18].mxu0  ;;  %v2822_v0 = vpop.f32.mrb[16].mxu1 }
 0x121   : > { %v2770_v61 = vpop.f32.mrb[19].mxu0  ;;  %v2823_v1 = vpop.f32.mrb[17].mxu1 }
 0x122   : > { %v4003_v63 = vadd.f32 %v2770_v61, %v2769_v60  ;;  %v2824_v48 = vadd.f32 %v2823_v1, %v2822_v0  ;;  %v2825_v53 = vpop.f32.mrb[18].mxu1 }
 0x123   : > { %v2826_v21 = vpop.f32.mrb[19].mxu1 }
 0x124   : > { %v2827_v3 = vadd.f32 %v2826_v21, %v2825_v53  ;;  %v4005_v13 = vadd.f32 %v2824_v48, %v2744_v24 }
 0x126   : > { %v2772_v33 = vpop.f32.mrb[20].mxu0  ;;  %v4009_v23 = vadd.f32 %v2827_v3, %v2747_v28 }
 0x127   : > { %v2773_v4 = vpop.f32.mrb[21].mxu0 }
 0x128   : > { %v4007_v14 = vadd.f32 %v2773_v4, %v2772_v33  ;;  %v2775_v15 = vpop.f32.mrb[22].mxu0  ;;  %v2828_v47 = vpop.f32.mrb[20].mxu1 }
 0x129   : > { %v2776_v2 = vpop.f32.mrb[23].mxu0  ;;  %v2829_v49 = vpop.f32.mrb[21].mxu1 }
 0x12a   : > { %v4011_v25 = vadd.f32 %v2776_v2, %v2775_v15  ;;  %v2830_v38 = vadd.f32 %v2829_v49, %v2828_v47  ;;  %v2831_v19 = vpop.f32.mrb[22].mxu1 }
 0x12b   : > { %v2832_v51 = vpop.f32.mrb[23].mxu1 }
 0x12c   : > { %v2833_v9 = vadd.f32 %v2832_v51, %v2831_v19  ;;  %v4013_v39 = vadd.f32 %v2830_v38, %v2750_v35 }
 0x12e   : > { %v2778_v8 = vpop.f32.mrb[24].mxu0  ;;  %v4017_v20 = vadd.f32 %v2833_v9, %v2753_v10 }
 0x12f   : > { %v2779_v36 = vpop.f32.mrb[25].mxu0 }
 0x130   : > { %v4015_v62 = vadd.f32 %v2779_v36, %v2778_v8  ;;  %v2781_v50 = vpop.f32.mrb[26].mxu0  ;;  %v2834_v54 = vpop.f32.mrb[24].mxu1 }
 0x131   : > { %v2782_v56 = vpop.f32.mrb[27].mxu0  ;;  %v2835_v55 = vpop.f32.mrb[25].mxu1 }
 0x132   : > { %v4019_v16 = vadd.f32 %v2782_v56, %v2781_v50  ;;  %v2836_v57 = vadd.f32 %v2835_v55, %v2834_v54  ;;  %v2837_v6 = vpop.f32.mrb[26].mxu1 }
 0x133   : > { %v2838_v11 = vpop.f32.mrb[27].mxu1 }
 0x134   : > { %v2839_v12 = vadd.f32 %v2838_v11, %v2837_v6  ;;  %v4021_v24 = vadd.f32 %v2836_v57, %v2756_v42 }
 0x136   : > { %v2784_v59 = vpop.f32.mrb[28].mxu0  ;;  %v4025_v30 = vadd.f32 %v2839_v12, %v2759_v26 }
 0x137   : > { %v2785_v18 = vpop.f32.mrb[29].mxu0 }
 0x138   : > { %v4023_v22 = vadd.f32 %v2785_v18, %v2784_v59  ;;  %v2787_v27 = vpop.f32.mrb[30].mxu0  ;;  %v2840_v35 = vpop.f32.mrb[28].mxu1 }
 0x139   : > { %v2788_v28 = vpop.f32.mrb[31].mxu0  ;;  %v2841_v37 = vpop.f32.mrb[29].mxu1 }
 0x13a   : > { %v4027_v31 = vadd.f32 %v2788_v28, %v2787_v27  ;;  %v2842_v5 = vadd.f32 %v2841_v37, %v2840_v35  ;;  %v2843_v10 = vpop.f32.mrb[30].mxu1 }
 0x13b   : > { %v2844_v7 = vpop.f32.mrb[31].mxu1 }
 0x13c   : > { %v2845_v17 = vadd.f32 %v2844_v7, %v2843_v10  ;;  %v4029_v34 = vadd.f32 %v2842_v5, %v2762_v45 }
 0x13e   : > { %v2902_v41 = vpop.f32.mrb[32].mxu0  ;;  %v4033_v52 = vadd.f32 %v2845_v17, %v2765_v29 }
 0x13f   : > { %v2903_v43 = vpop.f32.mrb[33].mxu0 }
 0x140   : > { %v4031_v42 = vadd.f32 %v2903_v43, %v2902_v41  ;;  %v2905_v44 = vpop.f32.mrb[34].mxu0  ;;  %v2846_v32 = vpop.f32.mrb[32].mxu1 }
 0x141   : > { %v2906_v46 = vpop.f32.mrb[35].mxu0  ;;  %v2847_v58 = vpop.f32.mrb[33].mxu1 }
 0x142   : > { %v4035_v26 = vadd.f32 %v2906_v46, %v2905_v44  ;;  %v2848_v60 = vadd.f32 %v2847_v58, %v2846_v32  ;;  %v2849_v61 = vpop.f32.mrb[34].mxu1 }
 0x143   : > { %v2850_v0 = vpop.f32.mrb[35].mxu1 }
 0x144   : > { %v3113_v48 = vadd.f32 %v2848_v60, %v4001_v40  ;;  %v2851_v53 = vadd.f32 %v2850_v0, %v2849_v61 }
 0x146   : > { %v2908_v1 = vpop.f32.mrb[36].mxu0  ;;  %v3119_v3 = vadd.f32 %v2851_v53, %v4003_v63 }
 0x147   : > { %v2909_v21 = vpop.f32.mrb[37].mxu0 }
 0x148   : > { %v2910_v45 = vadd.f32 %v2909_v21, %v2908_v1  ;;  %v2911_v33 = vpop.f32.mrb[38].mxu0  ;;  %v2852_v29 = vpop.f32.mrb[36].mxu1 }
 0x149   : > { %v2912_v4 = vpop.f32.mrb[39].mxu0  ;;  %v2853_v2 = vpop.f32.mrb[37].mxu1 }
 0x14a   : > { %v2913_v15 = vadd.f32 %v2912_v4, %v2911_v33  ;;  %v2854_v47 = vadd.f32 %v2853_v2, %v2852_v29  ;;  %v2855_v49 = vpop.f32.mrb[38].mxu1 }
 0x14b   : > { %v2856_v38 = vpop.f32.mrb[39].mxu1 }
 0x14c   : > { %v3110_v51 = vadd.f32 %v2854_v47, %v4007_v14  ;;  %v2857_v8 = vadd.f32 %v2856_v38, %v2855_v49 }
 0x14e   : > { %v2914_v19 = vpop.f32.mrb[40].mxu0  ;;  %v3116_v50 = vadd.f32 %v2857_v8, %v4011_v25 }
 0x14f   : > { %v2915_v9 = vpop.f32.mrb[41].mxu0 }
 0x150   : > { %v4040_v36 = vadd.f32 %v2915_v9, %v2914_v19  ;;  %v2917_v40 = vpop.f32.mrb[42].mxu0  ;;  %v2858_v63 = vpop.f32.mrb[40].mxu1 }
 0x151   : > { %v2918_v56 = vpop.f32.mrb[43].mxu0  ;;  %v2859_v55 = vpop.f32.mrb[41].mxu1 }
 0x152   : > { %v4043_v54 = vadd.f32 %v2918_v56, %v2917_v40  ;;  %v2860_v57 = vadd.f32 %v2859_v55, %v2858_v63  ;;  %v2861_v6 = vpop.f32.mrb[42].mxu1 }
 0x153   : > { %v2862_v11 = vpop.f32.mrb[43].mxu1 }
 0x154   : > { %v3125_v12 = vadd.f32 %v2860_v57, %v4015_v62  ;;  %v2863_v18 = vadd.f32 %v2862_v11, %v2861_v6 }
 0x156   : > { %v2920_v59 = vpop.f32.mrb[44].mxu0  ;;  %v3131_v35 = vadd.f32 %v2863_v18, %v4019_v16 }
 0x157   : > { %v2921_v14 = vpop.f32.mrb[45].mxu0 }
 0x158   : > { %v2922_v27 = vadd.f32 %v2921_v14, %v2920_v59  ;;  %v2923_v28 = vpop.f32.mrb[46].mxu0  ;;  %v2864_v25 = vpop.f32.mrb[44].mxu1 }
 0x159   : > { %v2924_v37 = vpop.f32.mrb[47].mxu0  ;;  %v2865_v10 = vpop.f32.mrb[45].mxu1 }
 0x15a   : > { %v2925_v5 = vadd.f32 %v2924_v37, %v2923_v28  ;;  %v2866_v7 = vadd.f32 %v2865_v10, %v2864_v25  ;;  %v2867_v41 = vpop.f32.mrb[46].mxu1 }
 0x15b   : > { %v2868_v17 = vpop.f32.mrb[47].mxu1 }
 0x15c   : > { %v3122_v44 = vadd.f32 %v2866_v7, %v4023_v22  ;;  %v2869_v46 = vadd.f32 %v2868_v17, %v2867_v41 }
 0x15e   : > { %v2926_v43 = vpop.f32.mrb[48].mxu0  ;;  %v3128_v60 = vadd.f32 %v2869_v46, %v4027_v31 }
 0x15f   : > { %v2927_v32 = vpop.f32.mrb[49].mxu0 }
 0x160   : > { %v2928_v58 = vadd.f32 %v2927_v32, %v2926_v43  ;;  %v2929_v62 = vpop.f32.mrb[50].mxu0  ;;  %v3016_v16 = vpop.f32.mrb[0].mxu1 }
 0x161   : > { %v2930_v61 = vpop.f32.mrb[51].mxu0  ;;  %v3079_v53 = vadd.f32 %v4013_v39, %v3016_v16  ;;  %v1431_v21 = vpop.f32.mrb[1].mxu1 }
 0x162   : > { %v2931_v0 = vadd.f32 %v2930_v61, %v2929_v62  ;;  %v4049_v1 = vadd.f32 %v3113_v48, %v2928_v58  ;;  %v3083_v4 = vadd.f32 %v4005_v13, %v1431_v21  ;;  %v3017_v29 = vpop.f32.mrb[2].mxu1 }
 0x163   : > { %v3087_v22 = vadd.f32 %v4017_v20, %v3017_v29  ;;  %v1434_v2 = vpop.f32.mrb[3].mxu1  ;;  %v3080_v49 = vadd.f32 %v3079_v53, %v2910_v45 }
 0x164   : > { %v4052_v33 = vadd.f32 %v3119_v3, %v2931_v0  ;;  %v3091_v31 = vadd.f32 %v4009_v23, %v1434_v2  ;;  %v3084_v48 = vadd.f32 %v3083_v4, %v4031_v42 }
 0x165   : > { %v3088_v9 = vadd.f32 %v3087_v22, %v2913_v15 }
 0x166   : > { %v2932_v47 = vpop.f32.mrb[52].mxu0  ;;  %v3092_v3 = vadd.f32 %v3091_v31, %v4035_v26 }
 0x167   : > { %v2933_v38 = vpop.f32.mrb[53].mxu0 }
 0x168   : > { %v2934_v19 = vadd.f32 %v2933_v38, %v2932_v47  ;;  %v2935_v8 = vpop.f32.mrb[54].mxu0  ;;  %v3020_v13 = vpop.f32.mrb[4].mxu1 }
 0x169   : > { %v2936_v39 = vpop.f32.mrb[55].mxu0  ;;  %v3095_v63 = vadd.f32 %v4029_v34, %v3020_v13  ;;  %v1447_v20 = vpop.f32.mrb[5].mxu1 }
 0x16a   : > { %v2937_v40 = vadd.f32 %v2936_v39, %v2935_v8  ;;  %v3111_v56 = vadd.f32 %v3110_v51, %v2934_v19  ;;  %v3099_v45 = vadd.f32 %v4021_v24, %v1447_v20  ;;  %v3021_v57 = vpop.f32.mrb[6].mxu1 }
 0x16b   : > { %v3103_v23 = vadd.f32 %v4033_v52, %v3021_v57  ;;  %v1450_v6 = vpop.f32.mrb[7].mxu1  ;;  %v3096_v11 = vadd.f32 %v3095_v63, %v2922_v27 }
 0x16c   : > { %v3117_v55 = vadd.f32 %v3116_v50, %v2937_v40  ;;  %v3107_v15 = vadd.f32 %v4025_v30, %v1450_v6  ;;  %v3100_v26 = vadd.f32 %v3099_v45, %v4040_v36 }
 0x16d   : > { %v3104_v34 = vadd.f32 %v3103_v23, %v2925_v5 }
 0x16e   : > { %v2938_v42 = vpop.f32.mrb[56].mxu0  ;;  %v3108_v50 = vadd.f32 %v3107_v15, %v4043_v54  ;;  %v2644_v54 = vld [vmem:[%s4108_s2] ss:$0 sm:$0xff] }
 0x16f   : > { %v2939_v59 = vpop.f32.mrb[57].mxu0 }
 0x170   : > { %v2940_v51 = vadd.f32 %v2939_v59, %v2938_v42  ;;  %v2941_v18 = vpop.f32.mrb[58].mxu0 }
 0x171   : > { %v2942_v14 = vpop.f32.mrb[59].mxu0 }
 0x172   : > { %v2943_v24 = vadd.f32 %v2942_v14, %v2941_v18  ;;  %v4065_v28 = vadd.f32 %v3125_v12, %v2940_v51 }
 0x174   : > { %v4067_v52 = vadd.f32 %v3131_v35, %v2943_v24 }
 0x176   : > { %v2944_v37 = vpop.f32.mrb[60].mxu0 }
 0x177   : > { %v2945_v27 = vpop.f32.mrb[61].mxu0 }
 0x178   : > { %v2946_v25 = vadd.f32 %v2945_v27, %v2944_v37  ;;  %v2947_v30 = vpop.f32.mrb[62].mxu0 }
 0x179   : > { %v2948_v10 = vpop.f32.mrb[63].mxu0 }
 0x17a   : > { %v2949_v7 = vadd.f32 %v2948_v10, %v2947_v30  ;;  %v3123_v36 = vadd.f32 %v3122_v44, %v2946_v25 }
 0x17c   : > { %v3129_v41 = vadd.f32 %v3128_v60, %v2949_v7 }
 0x17e   : > { %v3048_v17 = vpop.f32.mrb[64].mxu0 }
 0x17f   : > { %v3081_v5 = vadd.f32 %v3080_v49, %v3048_v17  ;;  %v2051_v43 = vpop.f32.mrb[65].mxu0 }
 0x180   : > { %v3085_v12 = vadd.f32 %v3084_v48, %v2051_v43  ;;  %v3049_v35 = vpop.f32.mrb[66].mxu0  ;;  %v3056_v61 = vpop.f32.mrb[8].mxu1 }
 0x181   : > { %v3089_v46 = vadd.f32 %v3088_v9, %v3049_v35  ;;  %v2054_v32 = vpop.f32.mrb[67].mxu0  ;;  %v2139_v62 = vadd.f32 %v3081_v5, %v2644_v54  ;;  %v3112_v0 = vadd.f32 %v3111_v56, %v3056_v61  ;;  %v2083_v60 = vpop.f32.mrb[9].mxu1 }
 0x182   : > { %v3093_v58 = vadd.f32 %v3092_v3, %v2054_v32  ;;  %v2137_v16 = vadd.f32 %v3085_v12, %v2644_v54  ;;  %v3115_v21 = vadd.f32 %v4049_v1, %v2083_v60  ;;  %v3057_v29 = vpop.f32.mrb[10].mxu1 }
 0x183   : > { %v2140_v44 = vadd.f32 %v3089_v46, %v2644_v54  ;;  %v3118_v22 = vadd.f32 %v3117_v55, %v3057_v29  ;;  %v2086_v47 = vpop.f32.mrb[11].mxu1  ;;  %v2147_v19 = vadd.f32 %v3112_v0, %v2644_v54 }
 0x184   : > { %v2138_v53 = vadd.f32 %v3093_v58, %v2644_v54  ;;  %v3121_v31 = vadd.f32 %v4052_v33, %v2086_v47  ;;  %v2145_v3 = vadd.f32 %v3115_v21, %v2644_v54 }
 0x185   : > { %v2687_v4 = vpack.c.bf16 %v2140_v44, %v2139_v62  ;;  %v2148_v8 = vadd.f32 %v3118_v22, %v2644_v54 }
 0x186   : > { %v2682_v2 = vpack.c.bf16 %v2138_v53, %v2137_v16  ;;  %v3052_v49 = vpop.f32.mrb[68].mxu0  ;;  %v2146_v1 = vadd.f32 %v3121_v31, %v2644_v54 }
 0x187   : > { %2719 = vst [vmem:[%s4077_s20 + $0x8] sm:$0xff] %v2687_v4   ;;  %v3097_v38 = vadd.f32 %v3096_v11, %v3052_v49  ;;  %v2067_v48 = vpop.f32.mrb[69].mxu0  ;;  %v2707_v13 = vpack.c.bf16 %v2148_v8, %v2147_v19 }
 0x188   : > { %2683 = vst [vmem:[%s4077_s20] sm:$0xff] %v2682_v2   ;;  %v3101_v9 = vadd.f32 %v3100_v26, %v2067_v48  ;;  %v3053_v39 = vpop.f32.mrb[70].mxu0  ;;  %v2702_v20 = vpack.c.bf16 %v2146_v1, %v2145_v3  ;;  %v3060_v45 = vpop.f32.mrb[12].mxu1 }
 0x189   : > { %v3105_v40 = vadd.f32 %v3104_v34, %v3053_v39  ;;  %v2070_v56 = vpop.f32.mrb[71].mxu0  ;;  %v2143_v55 = vadd.f32 %v3097_v38, %v2644_v54  ;;  %2723 = vst [vmem:[%s4077_s20 + $0x28] sm:$0xff] %v2707_v13   ;;  %v3124_v57 = vadd.f32 %v3123_v36, %v3060_v45  ;;  %v2099_v6 = vpop.f32.mrb[13].mxu1 }
 0x18a   : > { %v3109_v63 = vadd.f32 %v3108_v50, %v2070_v56  ;;  %v2141_v23 = vadd.f32 %v3101_v9, %v2644_v54  ;;  %2722 = vst [vmem:[%s4077_s20 + $0x20] sm:$0xff] %v2702_v20   ;;  %v3127_v11 = vadd.f32 %v4065_v28, %v2099_v6  ;;  %v3061_v59 = vpop.f32.mrb[14].mxu1 }
 0x18b   : > { %v2144_v33 = vadd.f32 %v3105_v40, %v2644_v54  ;;  %v3130_v26 = vadd.f32 %v3129_v41, %v3061_v59  ;;  %v2102_v18 = vpop.f32.mrb[15].mxu1  ;;  %v2151_v14 = vadd.f32 %v3124_v57, %v2644_v54 }
 0x18c   : > { %v2142_v42 = vadd.f32 %v3109_v63, %v2644_v54  ;;  %v3133_v34 = vadd.f32 %v4067_v52, %v2102_v18  ;;  %v2149_v24 = vadd.f32 %v3127_v11, %v2644_v54 }
 0x18d   : > { %v2697_v15 = vpack.c.bf16 %v2144_v33, %v2143_v55  ;;  %v2152_v50 = vadd.f32 %v3130_v26, %v2644_v54 }
 0x18e   : > { %v2692_v51 = vpack.c.bf16 %v2142_v42, %v2141_v23  ;;  %v2150_v37 = vadd.f32 %v3133_v34, %v2644_v54 }
 0x18f   : > { %2721 = vst [vmem:[%s4077_s20 + $0x18] sm:$0xff] %v2697_v15   ;;  %v2717_v27 = vpack.c.bf16 %v2152_v50, %v2151_v14 }
 0x190   : > { %2720 = vst [vmem:[%s4077_s20 + $0x10] sm:$0xff] %v2692_v51   ;;  %v2712_v25 = vpack.c.bf16 %v2150_v37, %v2149_v24 }
 0x191   : > { %2725 = vst [vmem:[%s4077_s20 + $0x38] sm:$0xff] %v2717_v27  }
 0x192   : > { %2724 = vst [vmem:[%s4077_s20 + $0x30] sm:$0xff] %v2712_v25  }
 0x193 PF: > { %s13_s16 = sadd.s32 1, %s3358_s16   ;;  %s4110_s12 = smov %s3350_s14 }
 0x194   : > { %p10_p7 = scmp.ge.s32.totalorder %s13_s16, 6   ;;  %s4111_s13 = smov %s3354_s15 }
 0x195   : > { %s4112_s14 = smov %s4115_s17  ;;  %s4113_s15 = smov %s4119_s18 }
 0x196   :  { %12 = sbr.rel (!%p10_p7) target bundleno = 3 (0x3), region = 72 }

// kernel: resnet_block_2d.13
= control target key start
LH: loop header
LB: loop body
LE: loop exit
PB: predicated region body
PF: predicated region fallthrough
CT: control target
= control target key end

     0   :  { %s3571_s15 = smov 0   ;;  %s3573_s16 = smov 0   ;;  %s4376_s0 = inlined_call_operand.vmem [shape: bf16[2,2,10,18,128], index: 0, kind: input, shape index: {}]   ;;  %s4377_s1 = inlined_call_operand.vmem [shape: bf16[3,384,128], index: 1, kind: input, shape index: {}]   ;;  %s4378_s2 = inlined_call_operand.vmem [shape: f32[1,128], index: 2, kind: input, shape index: {}]   ;;  %s4379_s3 = inlined_call_operand.vmem [shape: bf16[2,2,128,128], index: 3, kind: input, shape index: {}]   ;;  %s4380_s4 = inlined_call_operand.vmem [shape: bf16[2,2,128,128], index: 4, kind: output, shape index: {}]  }
   0x1   :  { %s3575_s17 = smov 0   ;;  %s3577_s18 = smov 0  }
   0x2   :  { %s3579_s19 = smov 0  }
   0x3 LB: > { %s26_s20 = sadd.s32 1, %s3536_s17  ;;  %s29_s21 = sadd.s32 1, %s3540_s18  ;;  %s3544_s19 = sphi %s3579_s19, %s14_s19   ;;  %s3540_s18 = sphi %s3577_s18, %s4384_s18   ;;  %s3536_s17 = sphi %s3575_s17, %s4383_s17   ;;  %s3532_s16 = sphi %s3573_s16, %s4382_s16   ;;  %s3528_s15 = sphi %s3571_s15, %s4381_s15  }
   0x4   : > { %p27_p0 = scmp.ge.s32.totalorder %s26_s20, 2  ;;  %p2519_p1 = scmp.ge.s32.totalorder %s3544_s19, 1 }
   0x5   : > { %p229_p2 = scmp.lt.s32.totalorder %s3544_s19, 5 }
   0x6   : > { %s4386_s20 = smov (%p27_p0, %s26_s20), 0  ;;  %s4388_s21 = smov (!%p27_p0, %s29_s21), %s3540_s18 }
   0x7   : > { %p230_p3 = pnand %p2519_p1, %p229_p2  ;;  %p31_p4 = scmp.ge.s32.totalorder %s4388_s21, 2 }
   0x8   : > { %v3386_v0 = vld [vmem:[%s4377_s1 + $0x100] sm:$0xff] (!%p230_p3)   ;;  %v3389_v3 = vld [vmem:[%s4377_s1 + $0x108] sm:$0xff] (!%p230_p3)   ;;  %p285_p5 = scmp.lt.s32.totalorder (!%p230_p3), %s3532_s16, 1  ;;  %p287_p6 = scmp.lt.s32.totalorder (!%p230_p3), %s3528_s15, 1  ;;  %v3392_v6 = vld [vmem:[%s4377_s1 + $0x110] sm:$0xff] (!%p230_p3)   ;;  %vm527_vm0 = vcmask (!%p230_p3), 1046528  }
   0x9   : > { %s4390_s21 = smov (%p31_p4, %s4388_s21), 0  ;;  %233 = sbr.rel (%p230_p3) target bundleno = 405 (0x195), region = 36 }
   0xa   : > { %v3387_v1 = vld [vmem:[%s4377_s1 + $0x140] sm:$0xff] (!%p230_p3)   ;;  %2912 = vmatprep.subr.bf16.mxu0 (!%p230_p3), %v3386_v0  ;;  %v3390_v4 = vld [vmem:[%s4377_s1 + $0x148] sm:$0xff] (!%p230_p3)   ;;  %v3393_v7 = vld [vmem:[%s4377_s1 + $0x150] sm:$0xff] (!%p230_p3)   ;;  %vm422_vm1 = vsmask.f32 (!%p230_p3), 7424 }
   0xb   : > { %v3388_v2 = vld [vmem:[%s4377_s1 + $0xc0] sm:$0xff] (!%p230_p3)   ;;  %3152 = vmatprep.subr.bf16.mxu1 (!%p230_p3), %v3387_v1  ;;  %v3391_v5 = vld [vmem:[%s4377_s1 + $0xc8] sm:$0xff] (!%p230_p3)   ;;  %v3394_v8 = vld [vmem:[%s4377_s1 + $0xd0] sm:$0xff] (!%p230_p3)  }
   0xc   : > { %2913 = vmatpush3.bf16.msra.mxu0 (!%p230_p3), %v3388_v2  ;;  %3153 = vmatpush3.bf16.msra.mxu1 (!%p230_p3), %v3387_v1  ;;  %v3395_v9 = vld [vmem:[%s4377_s1 + $0x118] sm:$0xff] (!%p230_p3)   ;;  %v3398_v12 = vld [vmem:[%s4377_s1 + $0x120] sm:$0xff] (!%p230_p3)   ;;  %v3401_v15 = vld [vmem:[%s4377_s1 + $0x128] sm:$0xff] (!%p230_p3)  }
   0xd   : > { %2914 = vmatprep.subr.bf16.mxu0 (!%p230_p3), %v3389_v3  ;;  %3154 = vmatprep.subr.bf16.mxu1 (!%p230_p3), %v3390_v4  ;;  %v3396_v10 = vld [vmem:[%s4377_s1 + $0x158] sm:$0xff] (!%p230_p3)   ;;  %v3399_v13 = vld [vmem:[%s4377_s1 + $0x160] sm:$0xff] (!%p230_p3)   ;;  %v3402_v16 = vld [vmem:[%s4377_s1 + $0x168] sm:$0xff] (!%p230_p3)  }
   0xe   : > { %v3397_v11 = vld [vmem:[%s4377_s1 + $0xd8] sm:$0xff] (!%p230_p3)   ;;  %v3400_v14 = vld [vmem:[%s4377_s1 + $0xe0] sm:$0xff] (!%p230_p3)   ;;  %v3403_v17 = vld [vmem:[%s4377_s1 + $0xe8] sm:$0xff] (!%p230_p3)  }
   0xf   : > { %v3404_v18 = vld [vmem:[%s4377_s1 + $0x130] sm:$0xff] (!%p230_p3)   ;;  %v3407_v21 = vld [vmem:[%s4377_s1 + $0x138] sm:$0xff] (!%p230_p3)   ;;  %v3414_v31 = vld [vmem:[%s4377_s1 + $0x40] sm:$0xff] (!%p230_p3)  }
  0x10   : > { %s4392_s16 = smov (!%p285_p5, %s3532_s16), 1  ;;  %2915 = vmatpush3.bf16.msra.mxu0 %v3391_v5  ;;  %3155 = vmatpush3.bf16.msra.mxu1 %v3390_v4  ;;  %s4394_s15 = smov (!%p287_p6, %s3528_s15), 1  ;;  %v3405_v19 = vld [vmem:[%s4377_s1 + $0x170] sm:$0xff]   ;;  %v3408_v22 = vld [vmem:[%s4377_s1 + $0x178] sm:$0xff]   ;;  %v3415_v37 = vld [vmem:[%s4377_s1 + $0x1c0] sm:$0xff]  }
  0x11   : > { %2916 = vmatprep.subr.bf16.mxu0 %v3392_v6  ;;  %3156 = vmatprep.subr.bf16.mxu1 %v3393_v7  ;;  %s3345_s27 = smul.u32 60, %s4392_s16  ;;  %v3406_v20 = vld [vmem:[%s4377_s1 + $0xf0] sm:$0xff]   ;;  %v3409_v25 = vld [vmem:[%s4377_s1 + $0xf8] sm:$0xff]   ;;  %v3416_v40 = vld [vmem:[%s4377_s1] sm:$0xff]   ;;  %s2522_s26 = sshll.u32 %s4392_s16, 5 }
  0x12   : > { %s3344_s30 = smul.u32 30, %s4394_s15  ;;  %v3417_v43 = vld [vmem:[%s4377_s1 + $0x180] sm:$0xff]   ;;  %v3418_v46 = vld [vmem:[%s4377_s1 + $0x48] sm:$0xff]   ;;  %v3424_v61 = vld [vmem:[%s4377_s1 + $0x50] sm:$0xff]  }
  0x13   : > { %v3419_v48 = vld [vmem:[%s4377_s1 + $0x8] sm:$0xff]   ;;  %v3426_v1 = vld [vmem:[%s4377_s1 + $0x10] sm:$0xff]   ;;  %v3428_v6 = vld [vmem:[%s4377_s1 + $0x58] sm:$0xff]  }
  0x14   : > { %2917 = vmatpush3.bf16.msra.mxu0 %v3394_v8  ;;  %3157 = vmatpush3.bf16.msra.mxu1 %v3393_v7  ;;  %s291_s11 = sadd.s32 %s3345_s27, %s3344_s30  ;;  %v3425_v0 = vld [vmem:[%s4377_s1 + $0x1c8] sm:$0xff]   ;;  %v3429_v8 = vld [vmem:[%s4377_s1 + $0x18] sm:$0xff]  }
  0x15   : > { %2918 = vmatprep.subr.bf16.mxu0 %v3395_v9  ;;  %3158 = vmatprep.subr.bf16.mxu1 %v3396_v10  ;;  %s2520_s23 = sshll.u32 %s291_s11, 2  ;;  %v3427_v4 = vld [vmem:[%s4377_s1 + $0x188] sm:$0xff]  }
  0x16   : > { %s3681_s6 = scalar_lea.vmem %s4376_s0, %s2520_s23 }
  0x17   : > { %v3410_v23 = vld [vmem:[%s3681_s6 + $0xc] sm:$0xff]   ;;  %v3411_v24 = vld [vmem:[%s3681_s6 + $0x14] ss:$0 sps:$4 sm:$0x11]   ;;  %v3412_v30 = vld [vmem:[%s3681_s6 + $0x18] sm:$0xff]  }
  0x18   : > { %2919 = vmatpush3.bf16.msra.mxu0 %v3397_v11  ;;  %3159 = vmatpush3.bf16.msra.mxu1 %v3396_v10  ;;  %v706_v26 = vshrl.u32 %v3410_v23, 16  ;;  %v708_v27 = vshll.u32 %v3410_v23, 16  ;;  %v713_v28 = vshll.u32 %v3411_v24, 16  ;;  %v809_v29 = vrot.slane %v3410_v23, 1  ;;  %v3420_v51 = vld [vmem:[%s3681_s6 + $0x24] sm:$0xff]   ;;  %v3720_v56 = vld [vmem:[%s3681_s6 + $0x30] sm:$0xff]  }
  0x19   : > { %2920 = vmatprep.subr.bf16.mxu0 %v3398_v12  ;;  %3160 = vmatprep.subr.bf16.mxu1 %v3399_v13  ;;  %v810_v32 = vrot.slane %v3411_v24, 1  ;;  %v3413_v33 = vld [vmem:[%s3681_s6 + $0x20] ss:$0 sps:$4 sm:$0x11]   ;;  %v812_v36 = vrot.slane %v3412_v30, 1  ;;  %v718_v44 = vshrl.u32 %v3412_v30, 16 }
  0x1a   : > { %v710_v34 = vrot.slane %v708_v27, 1  ;;  %v715_v35 = vrot.slane %v713_v28, 1  ;;  %v813_v39 = vrot.slane %v3413_v33, 1  ;;  %v720_v47 = vshll.u32 %v3412_v30, 16  ;;  %v3746_v11 = vld [vmem:[%s3681_s6 + $0x3c] sm:$0xff]   ;;  %v3438_v28 = vld [vmem:[%s4377_s1 + $0x68] sm:$0xff]  }
  0x1b   : > { %v811_v38 = vsel %vm527_vm0, %v809_v29, %v810_v32  ;;  %v725_v49 = vshll.u32 %v3413_v33, 16  ;;  %v3421_v53 = vld [vmem:[%s3681_s6 + $0x2c] ss:$0 sps:$4 sm:$0x11]   ;;  %v815_v55 = vrot.slane %v3420_v51, 1  ;;  %v818_v60 = vrot.slane %v3720_v56, 1 }
  0x1c   : > { %2921 = vmatpush3.bf16.msra.mxu0 %v3400_v14  ;;  %3161 = vmatpush3.bf16.msra.mxu1 %v3399_v13  ;;  %v711_v41 = vor.u32 %v710_v34, %v706_v26  ;;  %v814_v42 = vsel %vm527_vm0, %v812_v36, %v813_v39  ;;  %v722_v50 = vrot.slane %v720_v47, 1  ;;  %v816_v57 = vrot.slane %v3421_v53, 1  ;;  %v3423_v58 = vld [vmem:[%s3681_s6 + $0x38] ss:$0 sps:$4 sm:$0x11]   ;;  %v3752_v14 = vld [vmem:[%s3681_s6 + $0x48] sm:$0xff]  }
  0x1d   : > { %2922 = vmatprep.subr.bf16.mxu0 %v3401_v15  ;;  %3162 = vmatprep.subr.bf16.mxu1 %v3402_v16  ;;  %v727_v52 = vrot.slane %v725_v49, 1  ;;  %v819_v63 = vrot.slane %v3423_v58, 1  ;;  %v730_v2 = vshrl.u32 %v3420_v51, 16  ;;  %v732_v5 = vshll.u32 %v3420_v51, 16  ;;  %v3436_v24 = vld [vmem:[%s4377_s1 + $0x20] sm:$0xff]   ;;  %v3437_v26 = vld [vmem:[%s4377_s1 + $0x190] sm:$0xff]  }
  0x1e   : > { %3168 = vmatprep.mubr.bf16.mxu1 %v811_v38  ;;  %v716_v45 = vsel %vm422_vm1, %v711_v41, %v715_v35  ;;  %v723_v54 = vor.u32 %v722_v50, %v718_v44  ;;  %v817_v62 = vsel %vm527_vm0, %v815_v55, %v816_v57  ;;  %v737_v7 = vshll.u32 %v3421_v53, 16  ;;  %v3749_v13 = vld [vmem:[%s3681_s6 + $0x44] ss:$0 sps:$4 sm:$0x11]   ;;  %v3785_v33 = vld [vmem:[%s3681_s6 + $0x54] sm:$0xff]  }
  0x1f   : > { %1066 = vmatprep.mubr.bf16.mxu0 %v716_v45  ;;  %v820_v3 = vsel %vm527_vm0, %v818_v60, %v819_v63  ;;  %v734_v9 = vrot.slane %v732_v5, 1  ;;  %v821_v15 = vrot.slane %v3746_v11, 1  ;;  %v742_v27 = vshrl.u32 %v3720_v56, 16  ;;  %v3788_v35 = vld [vmem:[%s3681_s6 + $0x5c] ss:$0 sps:$4 sm:$0x11]  }
  0x20   : > { %2923 = vmatpush3.bf16.msra.mxu0 %v3403_v17  ;;  %3163 = vmatpush3.bf16.msra.mxu1 %v3402_v16  ;;  %v728_v59 = vsel %vm422_vm1, %v723_v54, %v727_v52  ;;  %v739_v10 = vrot.slane %v737_v7, 1  ;;  %v3434_v16 = vld [vmem:[%s4377_s1 + $0x60] sm:$0xff]   ;;  %v744_v29 = vshll.u32 %v3720_v56, 16  ;;  %v828_v39 = vrot.slane %v3788_v35, 1  ;;  %v3446_v47 = vld [vmem:[%s4377_s1 + $0x30] sm:$0xff]   ;;  %v3447_v50 = vld [vmem:[%s4377_s1 + $0x198] sm:$0xff]  }
  0x21   : > { %2924 = vmatprep.subr.bf16.mxu0 %v3404_v18  ;;  %3164 = vmatprep.subr.bf16.mxu1 %v3405_v19  ;;  %v735_v12 = vor.u32 %v734_v9, %v730_v2  ;;  %v822_v18 = vrot.slane %v3749_v13, 1  ;;  %v3792_v38 = vld [vmem:[%s3681_s6 + $0x60] sm:$0xff]   ;;  %v3448_v52 = vld [vmem:[%s4377_s1 + $0x78] sm:$0xff]   ;;  %v761_v53 = vshll.u32 %v3749_v13, 16  ;;  %v768_v5 = vshll.u32 %v3752_v14, 16  ;;  %v3848_v7 = vld [vmem:[%s3681_s6 + $0xc] sm:$0xff]  }
  0x22   : > { %v746_v32 = vrot.slane %v744_v29, 1  ;;  %v3449_v54 = vld [vmem:[%s4377_s1 + $0x38] sm:$0xff]   ;;  %v3826_v57 = vld [vmem:[%s3681_s6] sm:$0xff]   ;;  %v436_v13 = vshrl.u32 %v3848_v7, 16 }
  0x23   : > { %v740_v17 = vsel %vm422_vm1, %v735_v12, %v739_v10  ;;  %v3452_v60 = vld [vmem:[%s4377_s1 + $0x80] sm:$0xff]   ;;  %v770_v10 = vrot.slane %v768_v5, 1  ;;  %v3873_v29 = vld [vmem:[%s3681_s6 + $0x18] sm:$0xff]  }
  0x24   : > { %2925 = vmatpush3.bf16.msra.mxu0 %v3406_v20  ;;  %3165 = vmatpush3.bf16.msra.mxu1 %v3405_v19  ;;  %v3761_v19 = vld [vmem:[%s3681_s6 + $0x50] ss:$0 sps:$4 sm:$0x11]   ;;  %v824_v20 = vrot.slane %v3752_v14, 1  ;;  %v747_v36 = vor.u32 %v746_v32, %v742_v27  ;;  %v3925_v5 = vld [vmem:[%s3681_s6 + $0x18] sm:$0xff]  }
  0x25   : > { %2926 = vmatprep.subr.bf16.mxu0 %v3407_v21  ;;  %3166 = vmatprep.subr.bf16.mxu1 %v3408_v22  ;;  %v3435_v21 = vld [vmem:[%s4377_s1 + $0x1d0] sm:$0xff]   ;;  %v3876_v32 = vld [vmem:[%s3681_s6 + $0x20] ss:$0 sps:$4 sm:$0x11]  }
  0x28   : > { %2927 = vmatpush3.bf16.msra.mxu0 %v3409_v25  ;;  %3167 = vmatpush3.bf16.msra.mxu1 %v3408_v22  ;;  %v823_v22 = vsel %vm527_vm0, %v821_v15, %v822_v18  ;;  %v3457_v15 = vld [vmem:[%s4377_s1 + $0x88] sm:$0xff]   ;;  %v438_v18 = vshll.u32 %v3848_v7, 16 }
  0x29   : > { %2992 = vmatprep.subr.bf16.mxu1 %v3414_v31  ;;  %3072 = vmatprep.subr.bf16.mxu0 %v3415_v37  ;;  %v749_v31 = vshll.u32 %v3423_v58, 16  ;;  %v827_v37 = vrot.slane %v3785_v33, 1 }
  0x2b   : > { %1067 = vmatmul.mubr.bf16.vlgmr.msra.gmra.mrb[0].mxu0 %v3410_v23  ;;  %3169 = vmatmul.mubr.bf16.vlgmr.msra.gmra.mrb[0].mxu1 %v814_v42  ;;  %v825_v23 = vrot.slane %v3761_v19, 1  ;;  %v751_v34 = vrot.slane %v749_v31, 1  ;;  %v830_v42 = vrot.slane %v3792_v38, 1  ;;  %v829_v44 = vsel %vm527_vm0, %v827_v37, %v828_v39 }
  0x2c   : > { %2993 = vmatpush3.bf16.msra.mxu1 %v3416_v40  ;;  %3073 = vmatpush3.bf16.msra.mxu0 %v3417_v43  ;;  %v3796_v40 = vld [vmem:[%s3681_s6 + $0x68] ss:$0 sps:$4 sm:$0x11]   ;;  %v3444_v43 = vld [vmem:[%s4377_s1 + $0x70] sm:$0xff]   ;;  %v450_v37 = vshll.u32 %v3873_v29, 16 }
  0x2d   : > { %2994 = vmatprep.subr.bf16.mxu1 %v3418_v46  ;;  %1074 = vmatprep.mubr.bf16.mxu0 %v728_v59  ;;  %v826_v25 = vsel %vm527_vm0, %v824_v20, %v825_v23  ;;  %v752_v41 = vsel %vm422_vm1, %v747_v36, %v751_v34  ;;  %v831_v45 = vrot.slane %v3796_v40, 1  ;;  %v3445_v46 = vld [vmem:[%s4377_s1 + $0x1d8] sm:$0xff]   ;;  %v3829_v59 = vld [vmem:[%s3681_s6 + $0x8] ss:$0 sps:$4 sm:$0x11]   ;;  %v440_v20 = vrot.slane %v438_v18, 1 }
  0x2e   : > { %3172 = vmatprep.mubr.bf16.mxu1 %v817_v62  ;;  %3074 = vmatprep.subr.bf16.mxu0 %v3425_v0  ;;  %v426_v62 = vshll.u32 %v3826_v57, 16  ;;  %v431_v0 = vshll.u32 %v3829_v59, 16  ;;  %v3459_v23 = vld [vmem:[%s4377_s1 + $0x1a8] sm:$0xff]   ;;  %v3462_v34 = vld [vmem:[%s4377_s1 + $0x90] sm:$0xff]  }
  0x2f   : > { %v832_v49 = vsel %vm527_vm0, %v830_v42, %v831_v45  ;;  %v441_v27 = vor.u32 %v440_v20, %v436_v13  ;;  %v3463_v42 = vld [vmem:[%s4377_s1 + $0x1f0] sm:$0xff]   ;;  %v1664_v13 = vshrl.u32 %v3925_v5, 16 }
  0x30   : > { %2995 = vmatpush3.bf16.msra.mxu1 %v3419_v48  ;;  %3075 = vmatpush3.bf16.msra.mxu0 %v3427_v4  ;;  %v754_v48 = vshrl.u32 %v3746_v11, 16  ;;  %v428_v2 = vrot.slane %v426_v62, 1  ;;  %v766_v4 = vshrl.u32 %v3752_v14, 16 }
  0x31   : > { %2996 = vmatprep.subr.bf16.mxu1 %v3424_v61  ;;  %3076 = vmatprep.subr.bf16.mxu0 %v3435_v21  ;;  %v424_v61 = vshrl.u32 %v3826_v57, 16 }
  0x33   : > { %1075 = vmatmul.mubr.bf16.gmra.mrb[4].mxu0 %v3412_v30  ;;  %3173 = vmatmul.mubr.bf16.gmra.mrb[4].mxu1 %v820_v3  ;;  %v3439_v30 = vld [vmem:[%s4377_s1 + $0x28] sm:$0xff]   ;;  %v3454_v3 = vld [vmem:[%s4377_s1 + $0x1a0] sm:$0xff]   ;;  %v429_v9 = vor.u32 %v428_v2, %v424_v61 }
  0x34   : > { %2997 = vmatpush3.bf16.msra.mxu1 %v3426_v1  ;;  %1082 = vmatprep.mubr.bf16.mxu0 %v740_v17  ;;  %v3453_v1 = vld [vmem:[%s4377_s1 + $0x1e0] sm:$0xff]   ;;  %v3859_v17 = vld [vmem:[%s3681_s6 + $0x14] ss:$0 sps:$4 sm:$0x11]  }
  0x35   : > { %2998 = vmatprep.subr.bf16.mxu1 %v3428_v6  ;;  %3176 = vmatprep.mubr.bf16.mxu1 %v823_v22  ;;  %v773_v6 = vshll.u32 %v3761_v19, 16  ;;  %v771_v19 = vor.u32 %v770_v10, %v766_v4  ;;  %v443_v21 = vshll.u32 %v3859_v17, 16  ;;  %v3922_v4 = vld [vmem:[%s3681_s6 + $0x38] ss:$0 sps:$4 sm:$0x11]  }
  0x36   : > { %3077 = vmatpush3.bf16.msra.mxu0 %v3437_v26  ;;  %v785_v26 = vshll.u32 %v3788_v35, 16  ;;  %v448_v35 = vshrl.u32 %v3873_v29, 16  ;;  %v3932_v10 = vld [vmem:[%s3681_s6 + $0x20] ss:$0 sps:$4 sm:$0x11]  }
  0x37   : > { %3078 = vmatprep.subr.bf16.mxu0 %v3445_v46  ;;  %v775_v12 = vrot.slane %v773_v6, 1  ;;  %v790_v46 = vshrl.u32 %v3792_v38, 16 }
  0x38   : > { %2999 = vmatpush3.bf16.msra.mxu1 %v3429_v8  ;;  %v433_v8 = vrot.slane %v431_v0, 1  ;;  %v787_v31 = vrot.slane %v785_v26, 1  ;;  %v3955_v26 = vld [vmem:[%s3681_s6 + $0x24] sm:$0xff]  }
  0x39   : > { %3000 = vmatprep.subr.bf16.mxu1 %v3434_v16  ;;  %v3458_v16 = vld [vmem:[%s4377_s1 + $0x1e8] sm:$0xff]   ;;  %v776_v22 = vsel %vm422_vm1, %v771_v19, %v775_v12 }
  0x3a   : > { %3079 = vmatpush3.bf16.msra.mxu0 %v3447_v50  ;;  %v797_v50 = vshll.u32 %v3796_v40, 16  ;;  %v3468_v40 = vld [vmem:[%s4377_s1 + $0x1f8] sm:$0xff]  }
  0x3b   : > { %1083 = vmatmul.mubr.bf16.gmra.mrb[8].mxu0 %v3420_v51  ;;  %3177 = vmatmul.mubr.bf16.gmra.mrb[8].mxu1 %v826_v25  ;;  %v756_v51 = vshll.u32 %v3746_v11, 16  ;;  %v780_v25 = vshll.u32 %v3785_v33, 16 }
  0x3c   : > { %3001 = vmatpush3.bf16.msra.mxu1 %v3436_v24  ;;  %1090 = vmatprep.mubr.bf16.mxu0 %v752_v41  ;;  %v778_v24 = vshrl.u32 %v3785_v33, 16  ;;  %v455_v41 = vshll.u32 %v3876_v32, 16 }
  0x3d   : > { %3002 = vmatprep.subr.bf16.mxu1 %v3438_v28  ;;  %3180 = vmatprep.mubr.bf16.mxu1 %v829_v44  ;;  %v758_v55 = vrot.slane %v756_v51, 1  ;;  %v445_v28 = vrot.slane %v443_v21, 1  ;;  %v3467_v51 = vld [vmem:[%s4377_s1 + $0x98] sm:$0xff]   ;;  %v3944_v21 = vld [vmem:[%s4377_s1 + $0x200] sm:$0xff]  }
  0x3e   : > { %3080 = vmatprep.subr.bf16.mxu0 %v3453_v1  ;;  %v457_v45 = vrot.slane %v455_v41, 1 }
  0x3f   : > { %v759_v58 = vor.u32 %v758_v55, %v754_v48  ;;  %3081 = vmatpush3.bf16.msra.mxu0 %v3454_v3  ;;  %v446_v36 = vsel %vm422_vm1, %v441_v27, %v445_v28  ;;  %v3896_v48 = vld [vmem:[%s3681_s6 + $0x24] sm:$0xff]   ;;  %v3919_v3 = vld [vmem:[%s3681_s6 + $0x30] sm:$0xff]  }
  0x40   : > { %3003 = vmatpush3.bf16.msra.mxu1 %v3439_v30  ;;  %3082 = vmatprep.subr.bf16.mxu0 %v3458_v16  ;;  %v782_v30 = vrot.slane %v780_v25, 1  ;;  %v462_v55 = vshll.u32 %v3896_v48, 16  ;;  %v472_v6 = vshrl.u32 %v3919_v3, 16  ;;  %v3474_v16 = vld [vmem:[%s4377_s1 + $0xa0] sm:$0xff]  }
  0x41   : > { %3004 = vmatprep.subr.bf16.mxu1 %v3444_v43  ;;  %v452_v43 = vrot.slane %v450_v37, 1  ;;  %v3952_v25 = vld [vmem:[%s3681_s6 + $0x44] ss:$0 sps:$4 sm:$0x11]  }
  0x42   : > { %v783_v39 = vor.u32 %v782_v30, %v778_v24  ;;  %v464_v61 = vrot.slane %v462_v55, 1 }
  0x43   : > { %1091 = vmatmul.mubr.bf16.gmra.mrb[12].mxu0 %v3720_v56  ;;  %3181 = vmatmul.mubr.bf16.gmra.mrb[12].mxu1 %v832_v49  ;;  %v763_v56 = vrot.slane %v761_v53, 1  ;;  %v453_v49 = vor.u32 %v452_v43, %v448_v35  ;;  %v3904_v53 = vld [vmem:[%s3681_s6 + $0x2c] ss:$0 sps:$4 sm:$0x11]   ;;  %v1678_v35 = vshll.u32 %v3955_v26, 16 }
  0x44   : > { %3005 = vmatpush3.bf16.msra.mxu1 %v3446_v47  ;;  %3083 = vmatpush3.bf16.msra.mxu0 %v3459_v23  ;;  %v788_v44 = vsel %vm422_vm1, %v783_v39, %v787_v31  ;;  %v792_v47 = vshll.u32 %v3792_v38, 16  ;;  %v467_v62 = vshll.u32 %v3904_v53, 16  ;;  %v3948_v23 = vld [vmem:[%s3681_s6 + $0x3c] sm:$0xff]   ;;  %v3480_v39 = vld [vmem:[%s4377_s1 + $0xa8] sm:$0xff]  }
  0x45   : > { %3006 = vmatprep.subr.bf16.mxu1 %v3448_v52  ;;  %v764_v63 = vsel %vm422_vm1, %v759_v58, %v763_v56  ;;  %3084 = vmatprep.subr.bf16.mxu0 %v3463_v42  ;;  %v458_v56 = vsel %vm422_vm1, %v453_v49, %v457_v45  ;;  %v799_v58 = vrot.slane %v797_v50, 1  ;;  %v484_v28 = vshrl.u32 %v3948_v23, 16  ;;  %v3982_v49 = vld [vmem:[%s3681_s6 + $0x50] ss:$0 sps:$4 sm:$0x11]  }
  0x46   : > { %1098 = vmatprep.mubr.bf16.mxu0 %v764_v63  ;;  %v794_v52 = vrot.slane %v792_v47, 1  ;;  %v3469_v63 = vld [vmem:[%s4377_s1 + $0x1b8] sm:$0xff]   ;;  %v469_v2 = vrot.slane %v467_v62, 1  ;;  %v486_v30 = vshll.u32 %v3948_v23, 16  ;;  %v1680_v42 = vrot.slane %v1678_v35, 1  ;;  %v3978_v47 = vld [vmem:[%s3681_s6 + $0x48] sm:$0xff]  }
  0x47   : > { %v3985_v50 = vld [vmem:[%s3681_s6 + $0x30] sm:$0xff]   ;;  %v503_v55 = vshll.u32 %v3982_v49, 16 }
  0x48   : > { %3007 = vmatpush3.bf16.msra.mxu1 %v3449_v54  ;;  %v460_v54 = vshrl.u32 %v3896_v48, 16  ;;  %v488_v37 = vrot.slane %v486_v30, 1  ;;  %v3486_v62 = vld [vmem:[%s4377_s1 + $0xb0] sm:$0xff]  }
  0x49   : > { %3184 = vmatprep.subr.bf16.mxu1 %v3452_v60 }
  0x4a   : > { %v465_v1 = vor.u32 %v464_v61, %v460_v54  ;;  %v498_v54 = vshll.u32 %v3978_v47, 16 }
  0x4b   : > { %1099 = vmatmul.mubr.bf16.gmra.mrb[16].mxu0 %v3746_v11  ;;  %v434_v11 = vsel %vm422_vm1, %v429_v9, %v433_v8  ;;  %v474_v8 = vshll.u32 %v3919_v3, 16  ;;  %v479_v9 = vshll.u32 %v3922_v4, 16 }
  0x4c   : > { %1404 = vmatprep.mubr.bf16.mxu1 %v434_v11  ;;  %1106 = vmatprep.mubr.bf16.mxu0 %v776_v22  ;;  %v1671_v11 = vshll.u32 %v3932_v10, 16  ;;  %v500_v61 = vrot.slane %v498_v54, 1  ;;  %v4062_v54 = vld [vmem:[%s3681_s6 + $0x54] sm:$0xff]  }
  0x4d   : > { %1405 = vmatmul.mubr.bf16.vlgmr.msra.gmra.mrb[16].mxu1 %v3826_v57  ;;  %v476_v12 = vrot.slane %v474_v8, 1  ;;  %v481_v18 = vrot.slane %v479_v9, 1  ;;  %v4011_v8 = vld [vmem:[%s3681_s6 + $0x54] sm:$0xff]   ;;  %v4014_v9 = vld [vmem:[%s3681_s6 + $0x5c] ss:$0 sps:$4 sm:$0x11]  }
  0x4e   : > { %3185 = vmatpush3.bf16.msra.mxu1 %v3452_v60  ;;  %1412 = vmatprep.mubr.bf16.mxu1 %v446_v36  ;;  %v795_v60 = vor.u32 %v794_v52, %v790_v46  ;;  %v1673_v22 = vrot.slane %v1671_v11, 1  ;;  %v1676_v36 = vshrl.u32 %v3955_v26, 16  ;;  %v496_v52 = vshrl.u32 %v3978_v47, 16 }
  0x4f   : > { %3186 = vmatprep.subr.bf16.mxu1 %v3457_v15  ;;  %v477_v19 = vor.u32 %v476_v12, %v472_v6  ;;  %v4017_v12 = vld [vmem:[%s3681_s6 + $0x3c] sm:$0xff]  }
  0x50   : > { %v800_v0 = vsel %vm422_vm1, %v795_v60, %v799_v58  ;;  %v1681_v45 = vor.u32 %v1680_v42, %v1676_v36  ;;  %v1688_v58 = vshrl.u32 %v3985_v50, 16  ;;  %v1700_v11 = vshrl.u32 %v4017_v12, 16  ;;  %v4042_v36 = vld [vmem:[%s3681_s6 + $0x48] sm:$0xff]  }
  0x51   : > { %v482_v27 = vsel %vm422_vm1, %v477_v19, %v481_v18  ;;  %v4024_v18 = vld [vmem:[%s3681_s6 + $0x44] ss:$0 sps:$4 sm:$0x11]   ;;  %v1702_v19 = vshll.u32 %v4017_v12, 16  ;;  %v1714_v42 = vshll.u32 %v4042_v36, 16 }
  0x52   : > { %3187 = vmatpush3.bf16.msra.mxu1 %v3457_v15  ;;  %v1666_v15 = vshll.u32 %v3925_v5, 16 }
  0x53   : > { %1107 = vmatmul.mubr.bf16.gmra.mrb[20].mxu0 %v3752_v14  ;;  %v3464_v14 = vld [vmem:[%s4377_s1 + $0x1b0] sm:$0xff]   ;;  %3188 = vmatprep.subr.bf16.mxu1 %v3462_v34 }
  0x54   : > { %1114 = vmatprep.mubr.bf16.mxu0 %v788_v44  ;;  %3085 = vmatpush3.bf16.msra.mxu0 %v3464_v14  ;;  %v1668_v20 = vrot.slane %v1666_v15, 1  ;;  %v3975_v14 = vld [vmem:[%s4377_s1 + $0x208] sm:$0xff]   ;;  %v489_v44 = vor.u32 %v488_v37, %v484_v28 }
  0x55   : > { %1413 = vmatmul.mubr.bf16.gmra.mrb[20].mxu1 %v3848_v7  ;;  %3086 = vmatprep.subr.bf16.mxu0 %v3468_v40  ;;  %v1690_v40 = vshll.u32 %v3985_v50, 16 }
  0x56   : > { %3189 = vmatpush3.bf16.msra.mxu1 %v3462_v34  ;;  %1420 = vmatprep.mubr.bf16.mxu1 %v458_v56  ;;  %v1669_v24 = vor.u32 %v1668_v20, %v1664_v13  ;;  %v3963_v34 = vld [vmem:[%s3681_s6 + $0x2c] ss:$0 sps:$4 sm:$0x11]   ;;  %v3994_v56 = vld [vmem:[%s3681_s6 + $0x38] ss:$0 sps:$4 sm:$0x11]   ;;  %v501_v13 = vor.u32 %v500_v61, %v496_v52 }
  0x57   : > { %3190 = vmatprep.subr.bf16.mxu1 %v3467_v51  ;;  %v1683_v43 = vshll.u32 %v3963_v34, 16  ;;  %v508_v20 = vshrl.u32 %v4011_v8, 16  ;;  %v1716_v52 = vrot.slane %v1714_v42, 1  ;;  %v4120_v42 = vld [vmem:[%s3681_s6 + $0x6c] sm:$0xff]  }
  0x58   : > { %3087 = vmatpush3.bf16.msra.mxu0 %v3469_v63  ;;  %v1674_v31 = vsel %vm422_vm1, %v1669_v24, %v1673_v22  ;;  %v505_v63 = vrot.slane %v503_v55, 1  ;;  %v515_v22 = vshll.u32 %v4014_v9, 16  ;;  %v1707_v24 = vshll.u32 %v4024_v18, 16  ;;  %v4066_v55 = vld [vmem:[%s3681_s6 + $0x5c] ss:$0 sps:$4 sm:$0x11]  }
  0x59   : > { %3216 = vmatprep.subr.bf16.mxu0 %v3944_v21  ;;  %v1685_v46 = vrot.slane %v1683_v43, 1 }
  0x5a   : > { %3191 = vmatpush3.bf16.msra.mxu1 %v3467_v51  ;;  %v506_v28 = vsel %vm422_vm1, %v501_v13, %v505_v63  ;;  %v1709_v35 = vrot.slane %v1707_v24, 1  ;;  %v1724_v63 = vshrl.u32 %v4062_v54, 16  ;;  %v528_v13 = vrot.slane %v3826_v57, 1 }
  0x5b   : > { %1115 = vmatmul.mubr.bf16.gmra.mrb[24].mxu0 %v3785_v33  ;;  %v470_v33 = vsel %vm422_vm1, %v465_v1, %v469_v2  ;;  %3192 = vmatprep.subr.bf16.mxu1 %v3474_v16  ;;  %v1686_v51 = vsel %vm422_vm1, %v1681_v45, %v1685_v46  ;;  %v1695_v1 = vshll.u32 %v3994_v56, 16  ;;  %v4006_v2 = vld [vmem:[%s4377_s1 + $0x210] sm:$0xff]   ;;  %v1767_v24 = vrot.slane %v3925_v5, 1 }
  0x5c   : > { %1122 = vmatprep.mubr.bf16.mxu0 %v800_v0  ;;  %v1692_v0 = vrot.slane %v1690_v40, 1 }
  0x5d   : > { %1421 = vmatmul.mubr.bf16.gmra.mrb[24].mxu1 %v3873_v29  ;;  %v1697_v6 = vrot.slane %v1695_v1, 1 }
  0x5e   : > { %1428 = vmatprep.mubr.bf16.mxu1 %v470_v33  ;;  %3193 = vmatpush3.bf16.msra.mxu1 %v3474_v16  ;;  %v1693_v33 = vor.u32 %v1692_v0, %v1688_v58  ;;  %v510_v16 = vshll.u32 %v4011_v8, 16  ;;  %v1731_v0 = vshll.u32 %v4066_v55, 16 }
  0x5f   : > { %3194 = vmatprep.subr.bf16.mxu1 %v3480_v39 }
  0x60   : > { %v1698_v15 = vsel %vm422_vm1, %v1693_v33, %v1697_v6  ;;  %v512_v30 = vrot.slane %v510_v16, 1  ;;  %v4082_v6 = vld [vmem:[%s3681_s6 + $0x60] sm:$0xff]   ;;  %v4090_v16 = vld [vmem:[%s4377_s1 + $0x230] sm:$0xff]  }
  0x61   : > { %v1738_v57 = vshll.u32 %v4082_v6, 16 }
  0x62   : > { %3195 = vmatpush3.bf16.msra.mxu1 %v3480_v39  ;;  %v4047_v39 = vld [vmem:[%s3681_s6 + $0x50] ss:$0 sps:$4 sm:$0x11]   ;;  %v513_v43 = vor.u32 %v512_v30, %v508_v20  ;;  %v1733_v20 = vrot.slane %v1731_v0, 1  ;;  %v532_v30 = vrot.slane %v3859_v17, 1  ;;  %v534_v17 = vrot.slane %v3873_v29, 1 }
  0x63   : > { %1123 = vmatmul.mubr.bf16.gmra.mrb[28].mxu0 %v3792_v38  ;;  %v491_v38 = vshll.u32 %v3952_v25, 16  ;;  %3196 = vmatprep.subr.bf16.mxu1 %v3486_v62  ;;  %v1719_v46 = vshll.u32 %v4047_v39, 16  ;;  %v540_v0 = vrot.slane %v3919_v3, 1 }
  0x64   : > { %2024 = vmatprep.mubr.bf16.mxu0 %v1674_v31  ;;  %v1704_v31 = vrot.slane %v1702_v19, 1 }
  0x65   : > { %1429 = vmatmul.mubr.bf16.gmra.mrb[28].mxu1 %v3896_v48  ;;  %v493_v41 = vrot.slane %v491_v38, 1  ;;  %v4039_v38 = vld [vmem:[%s4377_s1 + $0x218] sm:$0xff]   ;;  %v1721_v40 = vrot.slane %v1719_v46, 1  ;;  %v4131_v46 = vld [vmem:[%s3681_s6 + $0x74] ss:$0 sps:$4 sm:$0x11]  }
  0x66   : > { %1436 = vmatprep.mubr.bf16.mxu1 %v482_v27  ;;  %3197 = vmatpush3.bf16.msra.mxu1 %v3486_v62  ;;  %v3492_v27 = vld [vmem:[%s4377_s1 + $0xb8] sm:$0xff]   ;;  %v1705_v37 = vor.u32 %v1704_v31, %v1700_v11  ;;  %v4074_v62 = vld [vmem:[%s4377_s1 + $0x228] sm:$0xff]  }
  0x67   : > { %v494_v60 = vsel %vm422_vm1, %v489_v44, %v493_v41  ;;  %3198 = vmatprep.subr.bf16.mxu1 %v3492_v27  ;;  %v1712_v41 = vshrl.u32 %v4042_v36, 16  ;;  %v517_v44 = vrot.slane %v515_v22, 1  ;;  %v4094_v11 = vld [vmem:[%s3681_s6 + $0x68] ss:$0 sps:$4 sm:$0x11]   ;;  %v4103_v22 = vld [vmem:[%s4377_s1 + $0x238] sm:$0xff]  }
  0x68   : > { %v1710_v45 = vsel %vm422_vm1, %v1705_v37, %v1709_v35  ;;  %v1770_v35 = vrot.slane %v3955_v26, 1  ;;  %v1771_v37 = vrot.slane %v3963_v34, 1  ;;  %s2521_s6 = sshll.u32 %s4394_s15, 4 }
  0x69   : > { %v1717_v58 = vor.u32 %v1716_v52, %v1712_v41  ;;  %v518_v61 = vsel %vm422_vm1, %v513_v43, %v517_v44  ;;  %v1743_v41 = vshll.u32 %v4094_v11, 16  ;;  %v535_v43 = vrot.slane %v3876_v32, 1  ;;  %s4275_s27 = sadd.s32 %s2522_s26, %s2521_s6 }
  0x6a   : > { %3199 = vmatpush3.bf16.msra.mxu1 %v3492_v27  ;;  %v1768_v27 = vrot.slane %v3932_v10, 1  ;;  %v1736_v10 = vshrl.u32 %v4082_v6, 16  ;;  %v1750_v52 = vshll.u32 %v4120_v42, 16  ;;  %v537_v32 = vrot.slane %v3896_v48, 1  ;;  %s2523_s28 = sshll.u32 %s4275_s27, 2 }
  0x6b   : > { %2025 = vmatmul.mubr.bf16.vlgmr.msra.gmra.mrb[32].mxu0 %v3925_v5  ;;  %3248 = vmatprep.subr.bf16.mxu1 %v3944_v21  ;;  %v1722_v1 = vsel %vm422_vm1, %v1717_v58, %v1721_v40  ;;  %v536_v29 = vsel %vm527_vm0, %v534_v17, %v535_v43  ;;  %v538_v58 = vrot.slane %v3904_v53, 1  ;;  %s4285_s29 = scalar_lea.vmem %s4379_s3, %s2523_s28  ;;  %s4324_s9 = scalar_lea.vmem %s4380_s4, %s2523_s28 }
  0x6c   : > { %3217 = vmatpush3.bf16.msra.mxu0 %v3944_v21  ;;  %2032 = vmatprep.mubr.bf16.mxu0 %v1686_v51  ;;  %v4058_v51 = vld [vmem:[%s4377_s1 + $0x220] sm:$0xff]   ;;  %v4112_v31 = vsel %vm527_vm0, %v1767_v24, %v1768_v27 }
  0x6d   : > { %3218 = vmatprep.subr.bf16.mxu0 %v3975_v14  ;;  %1437 = vmatmul.mubr.bf16.gmra.mrb[32].mxu1 %v3919_v3  ;;  %v539_v48 = vsel %vm527_vm0, %v537_v32, %v538_v58  ;;  %v543_v3 = vrot.slane %v3948_v23, 1 }
  0x6e   : > { %1444 = vmatprep.mubr.bf16.mxu1 %v494_v60  ;;  %v1726_v60 = vshll.u32 %v4062_v54, 16 }
  0x70   : > { %3219 = vmatpush3.bf16.msra.mxu0 %v3975_v14  ;;  %v1728_v33 = vrot.slane %v1726_v60, 1  ;;  %v1748_v60 = vshrl.u32 %v4120_v42, 16 }
  0x71   : > { %3220 = vmatprep.subr.bf16.mxu0 %v4006_v2 }
  0x72   : > { %v1729_v19 = vor.u32 %v1728_v33, %v1724_v63  ;;  %v1755_v63 = vshll.u32 %v4131_v46, 16 }
  0x73   : > { %2033 = vmatmul.mubr.bf16.gmra.mrb[36].mxu0 %v3955_v26  ;;  %v4126_v26 = vsel %vm527_vm0, %v1770_v35, %v1771_v37 }
  0x74   : > { %2040 = vmatprep.mubr.bf16.mxu0 %v1698_v15  ;;  %3221 = vmatpush3.bf16.msra.mxu0 %v4006_v2  ;;  %v529_v15 = vrot.slane %v3829_v59, 1  ;;  %v1734_v5 = vsel %vm422_vm1, %v1729_v19, %v1733_v20  ;;  %v1776_v20 = vrot.slane %v4017_v12, 1 }
  0x75   : > { %1445 = vmatmul.mubr.bf16.gmra.mrb[36].mxu1 %v3948_v23  ;;  %3222 = vmatprep.subr.bf16.mxu0 %v4039_v38 }
  0x76   : > { %1452 = vmatprep.mubr.bf16.mxu1 %v506_v28  ;;  %v530_v59 = vsel %vm527_vm0, %v528_v13, %v529_v15  ;;  %v531_v28 = vrot.slane %v3848_v7, 1  ;;  %v1740_v7 = vrot.slane %v1738_v57, 1  ;;  %v547_v15 = vrot.slane %v3982_v49, 1 }
  0x77   : > { %v1779_v49 = vrot.slane %v4042_v36, 1 }
  0x78   : > { %3223 = vmatpush3.bf16.msra.mxu0 %v4039_v38  ;;  %v533_v34 = vsel %vm527_vm0, %v531_v28, %v532_v30  ;;  %v1741_v44 = vor.u32 %v1740_v7, %v1736_v10 }
  0x79   : > { %3224 = vmatprep.subr.bf16.mxu0 %v4058_v51 }
  0x7b   : > { %2041 = vmatmul.mubr.bf16.gmra.mrb[40].mxu0 %v3985_v50 }
  0x7c   : > { %2048 = vmatprep.mubr.bf16.mxu0 %v1710_v45  ;;  %3225 = vmatpush3.bf16.msra.mxu0 %v4058_v51  ;;  %v1745_v45 = vrot.slane %v1743_v41, 1 }
  0x7d   : > { %1453 = vmatmul.mubr.bf16.gmra.mrb[40].mxu1 %v3978_v47  ;;  %3226 = vmatprep.subr.bf16.mxu0 %v4074_v62 }
  0x7e   : > { %1460 = vmatprep.mubr.bf16.mxu1 %v518_v61  ;;  %v1746_v40 = vsel %vm422_vm1, %v1741_v44, %v1745_v45  ;;  %v1752_v61 = vrot.slane %v1750_v52, 1 }
  0x80   : > { %3227 = vmatpush3.bf16.msra.mxu0 %v4074_v62  ;;  %v1753_v53 = vor.u32 %v1752_v61, %v1748_v60 }
  0x81   : > { %3228 = vmatprep.subr.bf16.mxu0 %v4090_v16 }
  0x83   : > { %2049 = vmatmul.mubr.bf16.gmra.mrb[44].mxu0 %v4017_v12 }
  0x84   : > { %2056 = vmatprep.mubr.bf16.mxu0 %v1722_v1  ;;  %3229 = vmatpush3.bf16.msra.mxu0 %v4090_v16  ;;  %v541_v1 = vrot.slane %v3922_v4, 1  ;;  %v544_v4 = vrot.slane %v3952_v25, 1  ;;  %v549_v25 = vrot.slane %v4011_v8, 1 }
  0x85   : > { %1461 = vmatmul.mubr.bf16.gmra.mrb[44].mxu1 %v4011_v8  ;;  %3230 = vmatprep.subr.bf16.mxu0 %v4103_v22  ;;  %v1774_v8 = vrot.slane %v3994_v56, 1  ;;  %v1786_v56 = vrot.slane %v4094_v11, 1  ;;  %v1789_v11 = vrot.slane %v4131_v46, 1 }
  0x86   : > { %3200 = vmatprep.mubr.bf16.mxu1 %v530_v59  ;;  %v542_v33 = vsel %vm527_vm0, %v540_v0, %v541_v1 }
  0x88   : > { %3231 = vmatpush3.bf16.msra.mxu0 %v4103_v22 }
  0x8b   : > { %2057 = vmatmul.mubr.bf16.gmra.mrb[48].mxu0 %v4042_v36  ;;  %v1782_v36 = vrot.slane %v4062_v54, 1 }
  0x8c   : > { %2064 = vmatprep.mubr.bf16.mxu0 %v1734_v5 }
  0x8d   : > { %3201 = vmatmul.mubr.bf16.vlgmr.msra.gmra.mrb[0].mxu1 %v533_v34 }
  0x8e   : > { %3256 = vmatpush3.bf16.msra.mxu1 %v3944_v21  ;;  %3204 = vmatprep.mubr.bf16.mxu1 %v536_v29  ;;  %v1757_v21 = vrot.slane %v1755_v63, 1 }
  0x8f   : > { %3249 = vmatprep.subr.bf16.mxu1 %v3975_v14 }
  0x90   : > { %v1758_v13 = vsel %vm422_vm1, %v1753_v53, %v1757_v21 }
  0x92   : > { %3257 = vmatpush3.bf16.msra.mxu1 %v3975_v14  ;;  %v546_v14 = vrot.slane %v3978_v47, 1  ;;  %v550_v47 = vrot.slane %v4014_v9, 1 }
  0x93   : > { %2065 = vmatmul.mubr.bf16.gmra.mrb[52].mxu0 %v4062_v54  ;;  %3250 = vmatprep.subr.bf16.mxu1 %v4006_v2 }
  0x94   : > { %2072 = vmatprep.mubr.bf16.mxu0 %v1746_v40  ;;  %v548_v23 = vsel %vm527_vm0, %v546_v14, %v547_v15  ;;  %v551_v19 = vsel %vm527_vm0, %v549_v25, %v550_v47 }
  0x95   : > { %3205 = vmatmul.mubr.bf16.gmra.mrb[4].mxu1 %v539_v48 }
  0x96   : > { %3258 = vmatpush3.bf16.msra.mxu1 %v4006_v2  ;;  %3208 = vmatprep.mubr.bf16.mxu1 %v542_v33  ;;  %v545_v2 = vsel %vm527_vm0, %v543_v3, %v544_v4 }
  0x97   : > { %3251 = vmatprep.subr.bf16.mxu1 %v4039_v38 }
  0x9a   : > { %3259 = vmatpush3.bf16.msra.mxu1 %v4039_v38  ;;  %v1780_v38 = vrot.slane %v4047_v39, 1  ;;  %v1783_v39 = vrot.slane %v4066_v55, 1 }
  0x9b   : > { %2073 = vmatmul.mubr.bf16.gmra.mrb[56].mxu0 %v4082_v6  ;;  %3252 = vmatprep.subr.bf16.mxu1 %v4058_v51 }
  0x9c   : > { %2080 = vmatprep.mubr.bf16.mxu0 %v1758_v13  ;;  %v1781_v9 = vsel %vm527_vm0, %v1779_v49, %v1780_v38  ;;  %v1784_v54 = vsel %vm527_vm0, %v1782_v36, %v1783_v39 }
  0x9d   : > { %3209 = vmatmul.mubr.bf16.gmra.mrb[8].mxu1 %v545_v2 }
  0x9e   : > { %3260 = vmatpush3.bf16.msra.mxu1 %v4058_v51  ;;  %3212 = vmatprep.mubr.bf16.mxu1 %v548_v23  ;;  %v1773_v51 = vrot.slane %v3985_v50, 1  ;;  %v1785_v50 = vrot.slane %v4082_v6, 1  ;;  %v1788_v6 = vrot.slane %v4120_v42, 1 }
  0x9f   : > { %3253 = vmatprep.subr.bf16.mxu1 %v4074_v62 }
  0xa0   : > { %v1787_v55 = vsel %vm527_vm0, %v1785_v50, %v1786_v56  ;;  %v1790_v59 = vsel %vm527_vm0, %v1788_v6, %v1789_v11 }
  0xa2   : > { %3261 = vmatpush3.bf16.msra.mxu1 %v4074_v62  ;;  %v1775_v62 = vsel %vm527_vm0, %v1773_v51, %v1774_v8 }
  0xa3   : > { %2081 = vmatmul.mubr.bf16.gmra.mrb[60].mxu0 %v4120_v42  ;;  %3254 = vmatprep.subr.bf16.mxu1 %v4090_v16 }
  0xa4   : > { %3232 = vmatprep.mubr.bf16.mxu0 %v4112_v31 }
  0xa5   : > { %3213 = vmatmul.mubr.bf16.gmra.mrb[12].mxu1 %v551_v19 }
  0xa6   : > { %3262 = vmatpush3.bf16.msra.mxu1 %v4090_v16  ;;  %3240 = vmatprep.mubr.bf16.mxu1 %v1781_v9  ;;  %v1777_v16 = vrot.slane %v4024_v18, 1 }
  0xa7   : > { %3255 = vmatprep.subr.bf16.mxu1 %v4103_v22 }
  0xa8   : > { %v1778_v57 = vsel %vm527_vm0, %v1776_v20, %v1777_v16 }
  0xaa   : > { %3263 = vmatpush3.bf16.msra.mxu1 %v4103_v22 }
  0xab   : > { %3233 = vmatmul.mubr.bf16.vlgmr.msra.gmra.mrb[64].mxu0 %v4126_v26 }
  0xac   : > { %3236 = vmatprep.mubr.bf16.mxu0 %v1775_v62 }
  0xad   : > { %3241 = vmatmul.mubr.bf16.vlgmr.msra.gmra.mrb[8].mxu1 %v1784_v54 }
  0xae   : > { %3244 = vmatprep.mubr.bf16.mxu1 %v1787_v55 }
  0xb3   : > { %3237 = vmatmul.mubr.bf16.gmra.mrb[68].mxu0 %v1778_v57 }
  0xb5   : > { %3245 = vmatmul.mubr.bf16.gmra.mrb[12].mxu1 %v1790_v59 }
  0xfe   : > { %v2928_v12 = vpop.f32.mrb[0].mxu0 }
  0xff   : > { %v2929_v18 = vpop.f32.mrb[1].mxu0 }
 0x100   : > { %v2930_v24 = vadd.f32 %v2929_v18, %v2928_v12  ;;  %v2931_v22 = vpop.f32.mrb[2].mxu0 }
 0x101   : > { %v2932_v27 = vpop.f32.mrb[3].mxu0 }
 0x102   : > { %v2933_v28 = vadd.f32 %v2932_v27, %v2931_v22 }
 0x106   : > { %v2934_v30 = vpop.f32.mrb[4].mxu0 }
 0x107   : > { %v2935_v31 = vpop.f32.mrb[5].mxu0 }
 0x108   : > { %v2936_v35 = vadd.f32 %v2935_v31, %v2934_v30  ;;  %v2937_v37 = vpop.f32.mrb[6].mxu0 }
 0x109   : > { %v2938_v5 = vpop.f32.mrb[7].mxu0 }
 0x10a   : > { %v2939_v10 = vadd.f32 %v2938_v5, %v2937_v37 }
 0x10e   : > { %v2940_v7 = vpop.f32.mrb[8].mxu0 }
 0x10f   : > { %v2941_v41 = vpop.f32.mrb[9].mxu0 }
 0x110   : > { %v2942_v42 = vadd.f32 %v2941_v41, %v2940_v7  ;;  %v2943_v17 = vpop.f32.mrb[10].mxu0 }
 0x111   : > { %v2944_v43 = vpop.f32.mrb[11].mxu0 }
 0x112   : > { %v2945_v26 = vadd.f32 %v2944_v43, %v2943_v17 }
 0x116   : > { %v2946_v34 = vpop.f32.mrb[12].mxu0 }
 0x117   : > { %v2947_v44 = vpop.f32.mrb[13].mxu0 }
 0x118   : > { %v2948_v45 = vadd.f32 %v2947_v44, %v2946_v34  ;;  %v2949_v46 = vpop.f32.mrb[14].mxu0 }
 0x119   : > { %v2950_v52 = vpop.f32.mrb[15].mxu0 }
 0x11a   : > { %v2951_v29 = vadd.f32 %v2950_v52, %v2949_v46 }
 0x11e   : > { %v2952_v32 = vpop.f32.mrb[16].mxu0 }
 0x11f   : > { %v2953_v58 = vpop.f32.mrb[17].mxu0 }
 0x120   : > { %v4192_v40 = vadd.f32 %v2953_v58, %v2952_v32  ;;  %v2955_v60 = vpop.f32.mrb[18].mxu0  ;;  %v3008_v0 = vpop.f32.mrb[16].mxu1 }
 0x121   : > { %v2956_v61 = vpop.f32.mrb[19].mxu0  ;;  %v3009_v1 = vpop.f32.mrb[17].mxu1 }
 0x122   : > { %v4194_v63 = vadd.f32 %v2956_v61, %v2955_v60  ;;  %v3010_v48 = vadd.f32 %v3009_v1, %v3008_v0  ;;  %v3011_v53 = vpop.f32.mrb[18].mxu1 }
 0x123   : > { %v3012_v21 = vpop.f32.mrb[19].mxu1 }
 0x124   : > { %v3013_v3 = vadd.f32 %v3012_v21, %v3011_v53  ;;  %v4196_v13 = vadd.f32 %v3010_v48, %v2930_v24 }
 0x126   : > { %v2958_v33 = vpop.f32.mrb[20].mxu0  ;;  %v4200_v23 = vadd.f32 %v3013_v3, %v2933_v28 }
 0x127   : > { %v2959_v4 = vpop.f32.mrb[21].mxu0 }
 0x128   : > { %v4198_v14 = vadd.f32 %v2959_v4, %v2958_v33  ;;  %v2961_v15 = vpop.f32.mrb[22].mxu0  ;;  %v3014_v47 = vpop.f32.mrb[20].mxu1 }
 0x129   : > { %v2962_v2 = vpop.f32.mrb[23].mxu0  ;;  %v3015_v49 = vpop.f32.mrb[21].mxu1 }
 0x12a   : > { %v4202_v25 = vadd.f32 %v2962_v2, %v2961_v15  ;;  %v3016_v38 = vadd.f32 %v3015_v49, %v3014_v47  ;;  %v3017_v19 = vpop.f32.mrb[22].mxu1 }
 0x12b   : > { %v3018_v51 = vpop.f32.mrb[23].mxu1 }
 0x12c   : > { %v3019_v9 = vadd.f32 %v3018_v51, %v3017_v19  ;;  %v4204_v39 = vadd.f32 %v3016_v38, %v2936_v35 }
 0x12e   : > { %v2964_v8 = vpop.f32.mrb[24].mxu0  ;;  %v4208_v20 = vadd.f32 %v3019_v9, %v2939_v10 }
 0x12f   : > { %v2965_v36 = vpop.f32.mrb[25].mxu0 }
 0x130   : > { %v4206_v62 = vadd.f32 %v2965_v36, %v2964_v8  ;;  %v2967_v50 = vpop.f32.mrb[26].mxu0  ;;  %v3020_v54 = vpop.f32.mrb[24].mxu1 }
 0x131   : > { %v2968_v56 = vpop.f32.mrb[27].mxu0  ;;  %v3021_v55 = vpop.f32.mrb[25].mxu1 }
 0x132   : > { %v4210_v16 = vadd.f32 %v2968_v56, %v2967_v50  ;;  %v3022_v57 = vadd.f32 %v3021_v55, %v3020_v54  ;;  %v3023_v6 = vpop.f32.mrb[26].mxu1 }
 0x133   : > { %v3024_v11 = vpop.f32.mrb[27].mxu1 }
 0x134   : > { %v3025_v12 = vadd.f32 %v3024_v11, %v3023_v6  ;;  %v4212_v24 = vadd.f32 %v3022_v57, %v2942_v42 }
 0x136   : > { %v2970_v59 = vpop.f32.mrb[28].mxu0  ;;  %v4216_v30 = vadd.f32 %v3025_v12, %v2945_v26 }
 0x137   : > { %v2971_v18 = vpop.f32.mrb[29].mxu0 }
 0x138   : > { %v4214_v22 = vadd.f32 %v2971_v18, %v2970_v59  ;;  %v2973_v27 = vpop.f32.mrb[30].mxu0  ;;  %v3026_v35 = vpop.f32.mrb[28].mxu1 }
 0x139   : > { %v2974_v28 = vpop.f32.mrb[31].mxu0  ;;  %v3027_v37 = vpop.f32.mrb[29].mxu1 }
 0x13a   : > { %v4218_v31 = vadd.f32 %v2974_v28, %v2973_v27  ;;  %v3028_v5 = vadd.f32 %v3027_v37, %v3026_v35  ;;  %v3029_v10 = vpop.f32.mrb[30].mxu1 }
 0x13b   : > { %v3030_v7 = vpop.f32.mrb[31].mxu1 }
 0x13c   : > { %v3031_v17 = vadd.f32 %v3030_v7, %v3029_v10  ;;  %v4220_v34 = vadd.f32 %v3028_v5, %v2948_v45 }
 0x13e   : > { %v3088_v41 = vpop.f32.mrb[32].mxu0  ;;  %v4224_v52 = vadd.f32 %v3031_v17, %v2951_v29 }
 0x13f   : > { %v3089_v43 = vpop.f32.mrb[33].mxu0 }
 0x140   : > { %v4222_v42 = vadd.f32 %v3089_v43, %v3088_v41  ;;  %v3091_v44 = vpop.f32.mrb[34].mxu0  ;;  %v3032_v32 = vpop.f32.mrb[32].mxu1 }
 0x141   : > { %v3092_v46 = vpop.f32.mrb[35].mxu0  ;;  %v3033_v58 = vpop.f32.mrb[33].mxu1 }
 0x142   : > { %v4226_v26 = vadd.f32 %v3092_v46, %v3091_v44  ;;  %v3034_v60 = vadd.f32 %v3033_v58, %v3032_v32  ;;  %v3035_v61 = vpop.f32.mrb[34].mxu1 }
 0x143   : > { %v3036_v0 = vpop.f32.mrb[35].mxu1 }
 0x144   : > { %v3299_v48 = vadd.f32 %v3034_v60, %v4192_v40  ;;  %v3037_v53 = vadd.f32 %v3036_v0, %v3035_v61 }
 0x146   : > { %v3094_v1 = vpop.f32.mrb[36].mxu0  ;;  %v3305_v3 = vadd.f32 %v3037_v53, %v4194_v63 }
 0x147   : > { %v3095_v21 = vpop.f32.mrb[37].mxu0 }
 0x148   : > { %v3096_v45 = vadd.f32 %v3095_v21, %v3094_v1  ;;  %v3097_v33 = vpop.f32.mrb[38].mxu0  ;;  %v3038_v29 = vpop.f32.mrb[36].mxu1 }
 0x149   : > { %v3098_v4 = vpop.f32.mrb[39].mxu0  ;;  %v3039_v2 = vpop.f32.mrb[37].mxu1 }
 0x14a   : > { %v3099_v15 = vadd.f32 %v3098_v4, %v3097_v33  ;;  %v3040_v47 = vadd.f32 %v3039_v2, %v3038_v29  ;;  %v3041_v49 = vpop.f32.mrb[38].mxu1 }
 0x14b   : > { %v3042_v38 = vpop.f32.mrb[39].mxu1 }
 0x14c   : > { %v3296_v51 = vadd.f32 %v3040_v47, %v4198_v14  ;;  %v3043_v8 = vadd.f32 %v3042_v38, %v3041_v49 }
 0x14e   : > { %v3100_v19 = vpop.f32.mrb[40].mxu0  ;;  %v3302_v50 = vadd.f32 %v3043_v8, %v4202_v25 }
 0x14f   : > { %v3101_v9 = vpop.f32.mrb[41].mxu0 }
 0x150   : > { %v4231_v36 = vadd.f32 %v3101_v9, %v3100_v19  ;;  %v3103_v40 = vpop.f32.mrb[42].mxu0  ;;  %v3044_v63 = vpop.f32.mrb[40].mxu1 }
 0x151   : > { %v3104_v56 = vpop.f32.mrb[43].mxu0  ;;  %v3045_v55 = vpop.f32.mrb[41].mxu1 }
 0x152   : > { %v4234_v54 = vadd.f32 %v3104_v56, %v3103_v40  ;;  %v3046_v57 = vadd.f32 %v3045_v55, %v3044_v63  ;;  %v3047_v6 = vpop.f32.mrb[42].mxu1 }
 0x153   : > { %v3048_v11 = vpop.f32.mrb[43].mxu1 }
 0x154   : > { %v4237_v12 = vadd.f32 %v3046_v57, %v4206_v62  ;;  %v3049_v14 = vadd.f32 %v3048_v11, %v3047_v6 }
 0x156   : > { %v3106_v59 = vpop.f32.mrb[44].mxu0  ;;  %v3317_v35 = vadd.f32 %v3049_v14, %v4210_v16 }
 0x157   : > { %v3107_v18 = vpop.f32.mrb[45].mxu0 }
 0x158   : > { %v3108_v27 = vadd.f32 %v3107_v18, %v3106_v59  ;;  %v3109_v28 = vpop.f32.mrb[46].mxu0  ;;  %v3050_v5 = vpop.f32.mrb[44].mxu1 }
 0x159   : > { %v3110_v37 = vpop.f32.mrb[47].mxu0  ;;  %v3051_v10 = vpop.f32.mrb[45].mxu1 }
 0x15a   : > { %v3111_v25 = vadd.f32 %v3110_v37, %v3109_v28  ;;  %v3052_v7 = vadd.f32 %v3051_v10, %v3050_v5  ;;  %v3053_v41 = vpop.f32.mrb[46].mxu1 }
 0x15b   : > { %v3054_v17 = vpop.f32.mrb[47].mxu1 }
 0x15c   : > { %v3308_v44 = vadd.f32 %v3052_v7, %v4214_v22  ;;  %v3055_v46 = vadd.f32 %v3054_v17, %v3053_v41  ;;  %v4295_v7 = vld [vmem:[%s4378_s2] ss:$0 sm:$0xff]  ;;  %v2902_v41 = vld [vmem:[%s4285_s29 + $0x28] sm:$0xff]  }
 0x15e   : > { %v3112_v43 = vpop.f32.mrb[48].mxu0  ;;  %v3314_v60 = vadd.f32 %v3055_v46, %v4218_v31  ;;  %v2827_v46 = vld [vmem:[%s4285_s29] sm:$0xff]  }
 0x15f   : > { %v3113_v32 = vpop.f32.mrb[49].mxu0 }
 0x160   : > { %v3114_v62 = vadd.f32 %v3113_v32, %v3112_v43  ;;  %v3115_v58 = vpop.f32.mrb[50].mxu0  ;;  %v3202_v16 = vpop.f32.mrb[0].mxu1 }
 0x161   : > { %v3116_v61 = vpop.f32.mrb[51].mxu0  ;;  %v3265_v53 = vadd.f32 %v4204_v39, %v3202_v16  ;;  %v1503_v21 = vpop.f32.mrb[1].mxu1 }
 0x162   : > { %v3117_v0 = vadd.f32 %v3116_v61, %v3115_v58  ;;  %v4242_v1 = vadd.f32 %v3299_v48, %v3114_v62  ;;  %v3269_v4 = vadd.f32 %v4196_v13, %v1503_v21  ;;  %v3203_v29 = vpop.f32.mrb[2].mxu1  ;;  %v2848_v61 = vunpack.c.l.bf16 %v2902_v41  ;;  %v4302_v21 = vld [vmem:[%s4285_s29 + $0x18] sm:$0xff]  }
 0x163   : > { %v3273_v22 = vadd.f32 %v4208_v20, %v3203_v29  ;;  %v1506_v2 = vpop.f32.mrb[3].mxu1  ;;  %v3266_v49 = vadd.f32 %v3265_v53, %v3096_v45 }
 0x164   : > { %v4245_v33 = vadd.f32 %v3305_v3, %v3117_v0  ;;  %v3277_v31 = vadd.f32 %v4200_v23, %v1506_v2  ;;  %v3270_v48 = vadd.f32 %v3269_v4, %v4222_v42  ;;  %v4305_v4 = vld [vmem:[%s4285_s29 + $0x38] sm:$0xff]  }
 0x165   : > { %v3274_v9 = vadd.f32 %v3273_v22, %v3099_v15  ;;  %v2828_v22 = vunpack.c.l.bf16 %v2827_v46 }
 0x166   : > { %v3118_v47 = vpop.f32.mrb[52].mxu0  ;;  %v3278_v3 = vadd.f32 %v3277_v31, %v4226_v26 }
 0x167   : > { %v3119_v38 = vpop.f32.mrb[53].mxu0 }
 0x168   : > { %v3120_v19 = vadd.f32 %v3119_v38, %v3118_v47  ;;  %v3121_v8 = vpop.f32.mrb[54].mxu0  ;;  %v3206_v13 = vpop.f32.mrb[4].mxu1  ;;  %v2829_v47 = vunpack.c.h.bf16 %v2827_v46 }
 0x169   : > { %v3122_v39 = vpop.f32.mrb[55].mxu0  ;;  %v3281_v20 = vadd.f32 %v4220_v34, %v3206_v13  ;;  %v1519_v63 = vpop.f32.mrb[5].mxu1  ;;  %v2840_v13 = vunpack.c.l.bf16 %v4302_v21 }
 0x16a   : > { %v3123_v40 = vadd.f32 %v3122_v39, %v3121_v8  ;;  %v4252_v56 = vadd.f32 %v3296_v51, %v3120_v19  ;;  %v3285_v23 = vadd.f32 %v4212_v24, %v1519_v63  ;;  %v3207_v42 = vpop.f32.mrb[6].mxu1  ;;  %v2849_v19 = vunpack.c.h.bf16 %v2902_v41 }
 0x16b   : > { %v3289_v55 = vadd.f32 %v4224_v52, %v3207_v42  ;;  %v1522_v15 = vpop.f32.mrb[7].mxu1  ;;  %v4259_v6 = vadd.f32 %v3281_v20, %v3108_v27  ;;  %v2856_v20 = vunpack.c.l.bf16 %v4305_v4 }
 0x16c   : > { %v4255_v45 = vadd.f32 %v3302_v50, %v3123_v40  ;;  %v3293_v26 = vadd.f32 %v4216_v30, %v1522_v15  ;;  %v4263_v11 = vadd.f32 %v3285_v23, %v4231_v36 }
 0x16d   : > { %v4265_v14 = vadd.f32 %v3289_v55, %v3111_v25 }
 0x16e   : > { %v3124_v57 = vpop.f32.mrb[56].mxu0  ;;  %v4270_v24 = vadd.f32 %v3293_v26, %v4234_v54 }
 0x16f   : > { %v3125_v51 = vpop.f32.mrb[57].mxu0 }
 0x170   : > { %v3126_v34 = vadd.f32 %v3125_v51, %v3124_v57  ;;  %v3127_v59 = vpop.f32.mrb[58].mxu0 }
 0x171   : > { %v3128_v50 = vpop.f32.mrb[59].mxu0 }
 0x172   : > { %v3129_v52 = vadd.f32 %v3128_v50, %v3127_v59  ;;  %v4273_v18 = vadd.f32 %v4237_v12, %v3126_v34 }
 0x174   : > { %v4277_v30 = vadd.f32 %v3317_v35, %v3129_v52  ;;  %v2898_v35 = vld [vmem:[%s4285_s29 + $0x8] sm:$0xff]  }
 0x175   : > { %v2832_v32 = vunpack.c.l.bf16 %v2898_v35  ;;  %v2833_v16 = vunpack.c.h.bf16 %v2898_v35 }
 0x176   : > { %v3130_v36 = vpop.f32.mrb[60].mxu0 }
 0x177   : > { %v3131_v27 = vpop.f32.mrb[61].mxu0 }
 0x178   : > { %v3132_v28 = vadd.f32 %v3131_v27, %v3130_v36  ;;  %v3133_v37 = vpop.f32.mrb[62].mxu0 }
 0x179   : > { %v3134_v25 = vpop.f32.mrb[63].mxu0 }
 0x17a   : > { %v3135_v5 = vadd.f32 %v3134_v25, %v3133_v37  ;;  %v4287_v54 = vadd.f32 %v3308_v44, %v3132_v28  ;;  %v2901_v44 = vld [vmem:[%s4285_s29 + $0x20] sm:$0xff]   ;;  %v2903_v25 = vld [vmem:[%s4285_s29 + $0x30] sm:$0xff]  }
 0x17b   : > { %v2844_v38 = vunpack.c.l.bf16 %v2901_v44  ;;  %v2845_v8 = vunpack.c.h.bf16 %v2901_v44 }
 0x17c   : > { %v4289_v12 = vadd.f32 %v3314_v60, %v3135_v5 }
 0x17e   : > { %v3234_v10 = vpop.f32.mrb[64].mxu0 }
 0x17f   : > { %v3267_v17 = vadd.f32 %v3266_v49, %v3234_v10  ;;  %v2123_v43 = vpop.f32.mrb[65].mxu0  ;;  %v4309_v49 = vld [vmem:[%s4285_s29 + $0x10] sm:$0xff]  }
 0x180   : > { %v3271_v62 = vadd.f32 %v3270_v48, %v2123_v43  ;;  %v3235_v58 = vpop.f32.mrb[66].mxu0  ;;  %v3242_v31 = vpop.f32.mrb[8].mxu1  ;;  %v2836_v55 = vunpack.c.l.bf16 %v4309_v49 }
 0x181   : > { %v2211_v60 = vadd.f32 %v3267_v17, %v4295_v7  ;;  %v3275_v0 = vadd.f32 %v3274_v9, %v3235_v58  ;;  %v2126_v53 = vpop.f32.mrb[67].mxu0  ;;  %v3298_v9 = vadd.f32 %v4252_v56, %v3242_v31  ;;  %v2155_v39 = vpop.f32.mrb[9].mxu1  ;;  %v2852_v58 = vunpack.c.l.bf16 %v2903_v25 }
 0x182   : > { %v2209_v29 = vadd.f32 %v3271_v62, %v4295_v7  ;;  %v3279_v2 = vadd.f32 %v3278_v3, %v2126_v53  ;;  %v3301_v63 = vadd.f32 %v4242_v1, %v2155_v39  ;;  %v3243_v42 = vpop.f32.mrb[10].mxu1 }
 0x183   : > { %v2212_v48 = vadd.f32 %v3275_v0, %v4295_v7  ;;  %v2259_v3 = vadd.f32 %v2832_v32, %v2211_v60  ;;  %v2219_v15 = vadd.f32 %v3298_v9, %v4295_v7  ;;  %v3304_v56 = vadd.f32 %v4255_v45, %v3243_v42  ;;  %v2158_v51 = vpop.f32.mrb[11].mxu1 }
 0x184   : > { %v2210_v40 = vadd.f32 %v3279_v2, %v4295_v7  ;;  %v2257_v57 = vadd.f32 %v2828_v22, %v2209_v29  ;;  %v2217_v34 = vadd.f32 %v3301_v63, %v4295_v7  ;;  %v3307_v50 = vadd.f32 %v4245_v33, %v2158_v51 }
 0x185   : > { %v2260_v23 = vadd.f32 %v2833_v16, %v2212_v48  ;;  %v2220_v27 = vadd.f32 %v3304_v56, %v4295_v7  ;;  %v2841_v45 = vunpack.c.h.bf16 %v4302_v21  ;;  %v2267_v17 = vadd.f32 %v2848_v61, %v2219_v15 }
 0x186   : > { %v2258_v26 = vadd.f32 %v2829_v47, %v2210_v40  ;;  %v3238_v1 = vpop.f32.mrb[68].mxu0  ;;  %v2218_v35 = vadd.f32 %v3307_v50, %v4295_v7  ;;  %v2265_v32 = vadd.f32 %v2844_v38, %v2217_v34  ;;  %v2857_v61 = vunpack.c.h.bf16 %v4305_v4 }
 0x187   : > { %v2866_v59 = vpack.c.bf16 %v2260_v23, %v2259_v3  ;;  %v3283_v52 = vadd.f32 %v4259_v6, %v3238_v1  ;;  %v2139_v36 = vpop.f32.mrb[69].mxu0  ;;  %v2837_v6 = vunpack.c.h.bf16 %v4309_v49  ;;  %v2268_v43 = vadd.f32 %v2849_v19, %v2220_v27 }
 0x188   : > { %v2861_v28 = vpack.c.bf16 %v2258_v26, %v2257_v57  ;;  %v3287_v37 = vadd.f32 %v4263_v11, %v2139_v36  ;;  %v3239_v5 = vpop.f32.mrb[70].mxu0  ;;  %v2266_v62 = vadd.f32 %v2845_v8, %v2218_v35  ;;  %v3246_v44 = vpop.f32.mrb[12].mxu1  ;;  %v2853_v8 = vunpack.c.h.bf16 %v2903_v25 }
 0x189   : > { %2905 = vst [vmem:[%s4324_s9 + $0x8] sm:$0xff] %v2866_v59   ;;  %v2215_v10 = vadd.f32 %v3283_v52, %v4295_v7  ;;  %v3291_v33 = vadd.f32 %v4265_v14, %v3239_v5  ;;  %v2142_v41 = vpop.f32.mrb[71].mxu0  ;;  %v2886_v0 = vpack.c.bf16 %v2268_v43, %v2267_v17  ;;  %v3310_v14 = vadd.f32 %v4287_v54, %v3246_v44  ;;  %v2171_v16 = vpop.f32.mrb[13].mxu1 }
 0x18a   : > { %2862 = vst [vmem:[%s4324_s9] sm:$0xff] %v2861_v28   ;;  %v2213_v46 = vadd.f32 %v3287_v37, %v4295_v7  ;;  %v3295_v11 = vadd.f32 %v4270_v24, %v2142_v41  ;;  %v2881_v21 = vpack.c.bf16 %v2266_v62, %v2265_v32  ;;  %v3313_v24 = vadd.f32 %v4273_v18, %v2171_v16  ;;  %v3247_v2 = vpop.f32.mrb[14].mxu1 }
 0x18b   : > { %v2216_v60 = vadd.f32 %v3291_v33, %v4295_v7  ;;  %v2263_v29 = vadd.f32 %v2840_v13, %v2215_v10  ;;  %2909 = vst [vmem:[%s4324_s9 + $0x28] sm:$0xff] %v2886_v0   ;;  %v2223_v47 = vadd.f32 %v3310_v14, %v4295_v7  ;;  %v3316_v31 = vadd.f32 %v4289_v12, %v3247_v2  ;;  %v2174_v38 = vpop.f32.mrb[15].mxu1 }
 0x18c   : > { %v2214_v53 = vadd.f32 %v3295_v11, %v4295_v7  ;;  %v2261_v49 = vadd.f32 %v2836_v55, %v2213_v46  ;;  %2908 = vst [vmem:[%s4324_s9 + $0x20] sm:$0xff] %v2881_v21   ;;  %v2221_v48 = vadd.f32 %v3313_v24, %v4295_v7  ;;  %v3319_v18 = vadd.f32 %v4277_v30, %v2174_v38 }
 0x18d   : > { %v2264_v22 = vadd.f32 %v2841_v45, %v2216_v60  ;;  %v2224_v9 = vadd.f32 %v3316_v31, %v4295_v7  ;;  %v2271_v12 = vadd.f32 %v2856_v20, %v2223_v47 }
 0x18e   : > { %v2262_v54 = vadd.f32 %v2837_v6, %v2214_v53  ;;  %v2222_v40 = vadd.f32 %v3319_v18, %v4295_v7  ;;  %v2269_v3 = vadd.f32 %v2852_v58, %v2221_v48 }
 0x18f   : > { %v2876_v19 = vpack.c.bf16 %v2264_v22, %v2263_v29  ;;  %v2272_v13 = vadd.f32 %v2857_v61, %v2224_v9 }
 0x190   : > { %v2871_v39 = vpack.c.bf16 %v2262_v54, %v2261_v49  ;;  %v2270_v63 = vadd.f32 %v2853_v8, %v2222_v40 }
 0x191   : > { %2907 = vst [vmem:[%s4324_s9 + $0x18] sm:$0xff] %v2876_v19   ;;  %v2896_v23 = vpack.c.bf16 %v2272_v13, %v2271_v12 }
 0x192   : > { %2906 = vst [vmem:[%s4324_s9 + $0x10] sm:$0xff] %v2871_v39   ;;  %v2891_v42 = vpack.c.bf16 %v2270_v63, %v2269_v3 }
 0x193   : > { %2911 = vst [vmem:[%s4324_s9 + $0x38] sm:$0xff] %v2896_v23  }
 0x194   : > { %2910 = vst [vmem:[%s4324_s9 + $0x30] sm:$0xff] %v2891_v42  }
 0x195 PF: > { %s14_s19 = sadd.s32 1, %s3544_s19   ;;  %s4381_s15 = smov %s3536_s17 }
 0x196   : > { %p11_p7 = scmp.ge.s32.totalorder %s14_s19, 6   ;;  %s4382_s16 = smov %s3540_s18 }
 0x197   : > { %s4383_s17 = smov %s4386_s20  ;;  %s4384_s18 = smov %s4390_s21 }
 0x198   :  { %13 = sbr.rel (!%p11_p7) target bundleno = 3 (0x3), region = 79 }

</bundles_post_ra>
